<compile_context>
chip_gen: v5e
topology: v5e:2x2
jax: 0.10.0
libtpu: 0.0.40
codegen_flags: <defaults>
</compile_context>

<pallas_src>
import functools

import jax
import jax.numpy as jnp
from jax import lax
from jax.experimental import pallas as pl
from jax.experimental.pallas import tpu as pltpu


# ----------------------------------------------------------------------------
# Kernel
# ----------------------------------------------------------------------------
def se_res2net_kernel(x_ref,
                      w1_ref, wr_ref, w2_ref, ws1_ref, ws2_ref,
                      vc_ref, vr_ref, bs1_ref,
                      o_ref,
                      h2_buf, y_buf, sum_buf, gate_buf,
                      *, scale, hd, tl, inv_len, true_len, mask_tail):
    """Two-pass SERes2NetBlock forward for one (batch, pass, time-tile) grid point.

    x_ref/o_ref: (1, C, tl) blocks, channels on sublanes, time on lanes.
    vc_ref columns: [b1, a1, c1, b2, a2, c2, bs2]; vr_ref last axis: [br, ar, cr].
    """
    p = pl.program_id(1)          # 0: compute h2 + accumulate SE sum; 1: gate + residual
    l = pl.program_id(2)          # time-tile index
    cdt = w1_ref.dtype            # MXU compute dtype (e.g. bfloat16)
    f32 = jnp.float32

    @pl.when(p == 0)
    def _compute_pass():
        @pl.when(l == 0)
        def _init():
            sum_buf[...] = jnp.zeros_like(sum_buf)

        x = x_ref[0]                                               # (C_in, tl)

        # ---- tdnn1: 1x1 conv + ReLU + folded BatchNorm, then one cast to bf16 ----
        h = jnp.dot(w1_ref[...], x, preferred_element_type=f32)    # (C, tl) f32
        h = jnp.maximum(h + vc_ref[:, 0:1], 0.0) * vc_ref[:, 1:2] + vc_ref[:, 2:3]
        h = h.astype(cdt)                                          # carry cascade in bf16

        # ---- Res2Net cascade: assemble Y into y_buf (sublane offsets i*hd), so tdnn2
        #      becomes ONE full-width K=C matmul instead of `scale` K=hd matmuls. ----
        y_buf[0:hd, :] = h[0:hd, :]                                # chunk 0 passes through
        y_prev = None
        for i in range(1, scale):
            x_i = h[i * hd:(i + 1) * hd, :]
            inp = x_i if i == 1 else x_i + y_prev
            z = jnp.dot(wr_ref[i - 1], inp, preferred_element_type=f32)
            vri = vr_ref[i - 1]                                    # (hd, 3) f32
            y_i = (jnp.maximum(z + vri[:, 0:1], 0.0) * vri[:, 1:2] + vri[:, 2:3]).astype(cdt)
            y_buf[i * hd:(i + 1) * hd, :] = y_i
            y_prev = y_i

        # ---- tdnn2: single full-width matmul + bias + ReLU + folded BatchNorm ----
        acc = jnp.dot(w2_ref[...], y_buf[...], preferred_element_type=f32)   # (C, tl)
        h2 = jnp.maximum(acc + vc_ref[:, 3:4], 0.0) * vc_ref[:, 4:5] + vc_ref[:, 5:6]

        # ---- SE squeeze: accumulate (masked) sum over valid frames; stash h2 ----
        if mask_tail:
            col = l * tl + lax.broadcasted_iota(jnp.int32, (1, tl), 1)
            h2_sum = jnp.where(col < true_len, h2, 0.0)
        else:
            h2_sum = h2
        sum_buf[...] += jnp.sum(h2_sum, axis=1, keepdims=True)

        start = pl.multiple_of(l * tl, tl)
        h2_buf[:, pl.ds(start, tl)] = h2.astype(h2_buf.dtype)

    @pl.when(p == 1)
    def _gate_pass():
        @pl.when(l == 0)
        def _gate():
            # N=1 matvecs; kept in f32 (tiny, once per batch).
            s = sum_buf[...] * inv_len                                       # mean over L, (C,1)
            s = jnp.dot(ws1_ref[...].astype(f32), s) + bs1_ref[...]          # (se,1)
            s = jnp.maximum(s, 0.0)
            s = jnp.dot(ws2_ref[...].astype(f32), s) + vc_ref[:, 6:7]        # (C,1)
            gate_buf[...] = jax.nn.sigmoid(s)

        start = pl.multiple_of(l * tl, tl)
        h2 = h2_buf[:, pl.ds(start, tl)].astype(f32)
        residual = x_ref[0].astype(f32)          # identity shortcut (C_in == C_out)
        o_ref[0] = (gate_buf[...] * h2 + residual).astype(o_ref.dtype)


# ----------------------------------------------------------------------------
# Wrapper
# ----------------------------------------------------------------------------
def _padded_bytes(shape, dtype):
    """VMEM bytes of a tile after (sublane, lane) padding."""
    it = jnp.dtype(dtype).itemsize
    shape = tuple(int(d) for d in shape)
    if len(shape) < 2:
        shape = (1,) * (2 - len(shape)) + shape
    sub = 8 * max(1, 4 // it)                      # f32: 8, bf16: 16, int8/fp8: 32
    lead = 1
    for d in shape[:-2]:
        lead *= d
    rows = -(-shape[-2] // sub) * sub
    cols = -(-shape[-1] // 128) * 128
    return lead * rows * cols * it


def se_res2net_block(x, params, scale, *, time_tile=None):
    """x: (B, C_in, L) channels-first, exactly like the PyTorch module (no transposes)."""
    B, C_in, L = x.shape
    C_out = params["w1"].shape[0]
    assert C_in == C_out, "identity shortcut only (shortcut Conv1d not implemented)"
    assert C_out % scale == 0
    hd = C_out // scale
    cdt = params["w1"].dtype

    # ---- time tiling: lane-aligned tile, pad L up to a multiple of it ----
    lane_len = -(-L // 128) * 128
    tl = time_tile if time_tile is not None else min(lane_len, 512)
    assert tl % 128 == 0, "time tile must be lane-aligned (multiple of 128)"
    L_pad = -(-L // tl) * tl
    nl = L_pad // tl
    mask_tail = (L_pad != L)
    x_p = jnp.pad(x, ((0, 0), (0, 0), (0, L_pad - L))) if mask_tail else x

    # ---- pack per-channel f32 vectors into shared padded tiles ----
    f32 = jnp.float32
    vc = jnp.concatenate([params["b1"], params["a1"], params["c1"],
                          params["b2"], params["a2"], params["c2"],
                          params["bs2"]], axis=1).astype(f32)                 # (C, 7)
    vr = jnp.concatenate([params["br"], params["ar"], params["cr"]],
                         axis=2).astype(f32)                                  # (scale-1, hd, 3)

    weights = [params["w1"], params["wr"], params["w2"],
               params["ws1"], params["ws2"], vc, vr, params["bs1"]]

    def const_spec(arr):
        nd = arr.ndim
        # Block never changes -> single-buffer it (saves weight VMEM, esp. on v7x).
        return pl.BlockSpec(arr.shape, lambda b, p, l, _nd=nd: (0,) * _nd,
                            pipeline_mode=pl.Buffered(buffer_count=1))

    in_specs = [pl.BlockSpec((1, C_in, tl), lambda b, p, l: (b, 0, l))]
    in_specs += [const_spec(w) for w in weights]
    # NOTE: during pass 0 (p == 0) the output block index is pinned to tile 0.  This is
    # valid only because pass 0 never writes o_ref and the p=0 -> p=1 transition keeps
    # the same block index, so output blocks are only revisited consecutively.
    out_specs = pl.BlockSpec((1, C_out, tl), lambda b, p, l: (b, 0, l * p))

    # ---- VMEM budget from PADDED tile sizes ----
    io_bytes = 2 * _padded_bytes((C_in, tl), x.dtype) + 2 * _padded_bytes((C_out, tl), x.dtype)
    weight_bytes = sum(_padded_bytes(w.shape, w.dtype) for w in weights)  # single-buffered
    scratch_bytes = (_padded_bytes((C_out, L_pad), x.dtype) +
                     _padded_bytes((C_out, tl), cdt) +
                     2 * _padded_bytes((C_out, 1), jnp.float32))
    need = io_bytes + weight_bytes + scratch_bytes
    vmem_limit = int(min(max(1.25 * need + (4 << 20), 16 << 20), 48 << 20))

    kernel = functools.partial(
        se_res2net_kernel, scale=scale, hd=hd, tl=tl,
        inv_len=1.0 / float(L), true_len=L, mask_tail=mask_tail)

    out = pl.pallas_call(
        kernel,
        out_shape=jax.ShapeDtypeStruct((B, C_out, L_pad), x.dtype),
        grid=(B, 2, nl),
        in_specs=in_specs,
        out_specs=out_specs,
        scratch_shapes=[
            pltpu.VMEM((C_out, L_pad), x.dtype),   # per-batch h2 stash (compute dtype)
            pltpu.VMEM((C_out, tl), cdt),          # Y assembly buffer for the fused tdnn2 matmul
            pltpu.VMEM((C_out, 1), jnp.float32),   # masked sum over time of h2 (SE squeeze)
            pltpu.VMEM((C_out, 1), jnp.float32),   # SE gate
        ],
        compiler_params=pltpu.CompilerParams(
            dimension_semantics=("parallel", "arbitrary", "arbitrary"),
            vmem_limit_bytes=vmem_limit,
        ),
    )(x_p, *weights)

    return out[:, :, :L] if mask_tail else out


# ----------------------------------------------------------------------------
# Deterministic synthetic parameters (BN folded to scale/shift), (out,in) layout
# ----------------------------------------------------------------------------
def _fold_bn(gamma, beta, mean, var, eps=1e-5):
    a = gamma / jnp.sqrt(var + eps)
    c = beta - mean * a
    return a, c


def make_params(key, c_in, c_out, scale, se_channels):
    hd = c_out // scale
    ks = jax.random.split(key, 22)
    f32 = jnp.float32

    def rnd(k, shape, s=0.1):
        return (s * jax.random.normal(k, shape)).astype(f32)

    a1, c1 = _fold_bn(1.0 + rnd(ks[2], (c_out, 1)), rnd(ks[3], (c_out, 1)),
                      rnd(ks[4], (c_out, 1)), 1.0 + jnp.abs(rnd(ks[5], (c_out, 1))))
    ar, cr = _fold_bn(1.0 + rnd(ks[8], (scale - 1, hd, 1)), rnd(ks[9], (scale - 1, hd, 1)),
                      rnd(ks[10], (scale - 1, hd, 1)),
                      1.0 + jnp.abs(rnd(ks[11], (scale - 1, hd, 1))))
    a2, c2 = _fold_bn(1.0 + rnd(ks[14], (c_out, 1)), rnd(ks[15], (c_out, 1)),
                      rnd(ks[16], (c_out, 1)), 1.0 + jnp.abs(rnd(ks[17], (c_out, 1))))
    return dict(
        w1=rnd(ks[0], (c_out, c_in)), b1=rnd(ks[1], (c_out, 1)), a1=a1, c1=c1,
        wr=rnd(ks[6], (scale - 1, hd, hd)), br=rnd(ks[7], (scale - 1, hd, 1)), ar=ar, cr=cr,
        w2=rnd(ks[12], (c_out, c_out)), b2=rnd(ks[13], (c_out, 1)), a2=a2, c2=c2,
        ws1=rnd(ks[18], (se_channels, c_out)), bs1=rnd(ks[19], (se_channels, 1)),
        ws2=rnd(ks[20], (c_out, se_channels)), bs2=rnd(ks[21], (c_out, 1)),
    )


# ----------------------------------------------------------------------------
# Pure-JAX f32 reference (same math, (B, C, L) layout) for a correctness check
# ----------------------------------------------------------------------------
def reference(x, p, scale):
    f32 = jnp.float32
    x = x.astype(f32)
    w = {k: v.astype(f32) for k, v in p.items()}

    def conv1x1(h, wgt, b):
        return jnp.einsum("oi,bil->bol", wgt, h) + b[None]

    def tdnn(h, wgt, b, a, c):
        return jnp.maximum(conv1x1(h, wgt, b), 0.0) * a[None] + c[None]

    residual = x
    h = tdnn(x, w["w1"], w["b1"], w["a1"], w["c1"])
    C = h.shape[1]
    hd = C // scale
    parts = [h[:, 0:hd, :]]
    y_i = None
    for i in range(1, scale):
        x_i = h[:, i * hd:(i + 1) * hd, :]
        inp = x_i if i == 1 else x_i + y_i
        y_i = tdnn(inp, w["wr"][i - 1], w["br"][i - 1], w["ar"][i - 1], w["cr"][i - 1])
        parts.append(y_i)
    y = jnp.concatenate(parts, axis=1)
    h2 = tdnn(y, w["w2"], w["b2"], w["a2"], w["c2"])
    s = jnp.mean(h2, axis=2, keepdims=True)
    s = jnp.maximum(conv1x1(s, w["ws1"], w["bs1"]), 0.0)
    s = jax.nn.sigmoid(conv1x1(s, w["ws2"], w["bs2"]))
    return s * h2 + residual


# ----------------------------------------------------------------------------
if __name__ == "__main__":
    B, C, L = 2, 64, 1000        # (batch, channels, time) -- PyTorch NCL layout; L not a
    SCALE = 4                    # multiple of 128 to exercise the pad + masked-SE path.
    SE_CH = 16                   # se_channels
    CDT = jnp.bfloat16           # MXU compute dtype for activations & matmul weights

    key = jax.random.PRNGKey(0)
    kx, kp = jax.random.split(key)
    params = make_params(kp, C, C, SCALE, SE_CH)
    x = jax.random.normal(kx, (B, C, L), dtype=jnp.float32)

    # bf16 activations & MXU weights; SE weights, folded-BN scale/shift and biases
    # stay f32 (the SE matvecs are N=1, so bf16 would only add casts).
    x_c = x.astype(CDT)
    params_c = dict(params)
    for name in ("w1", "wr", "w2"):
        params_c[name] = params[name].astype(CDT)

    # Default time tile (512) -> two time tiles of 512 with the last 24 frames masked.
    out = se_res2net_block(x_c, params_c, SCALE)
    out = jax.block_until_ready(out)
    assert out.shape == (B, C, L)

    ref = jax.block_until_ready(reference(x_c, params_c, SCALE))
    out_f32 = out.astype(jnp.float32)
    max_err = float(jnp.max(jnp.abs(out_f32 - ref)))
    assert jnp.allclose(out_f32, ref, atol=5e-2, rtol=5e-2), f"mismatch vs reference: {max_err}"

    print("KERNEL_OK")
</pallas_src>

<mosaic_0001>
module attributes {stable_mosaic.version = 11 : i64} {
  func.func @se_res2net_kernel(%arg0: i32, %arg1: i32, %arg2: i32, %arg3: memref<1x64x512xbf16, #tpu.memory_space<vmem>>, %arg4: memref<64x64xbf16, #tpu.memory_space<vmem>>, %arg5: memref<3x16x16xbf16, #tpu.memory_space<vmem>>, %arg6: memref<64x64xbf16, #tpu.memory_space<vmem>>, %arg7: memref<16x64xf32, #tpu.memory_space<vmem>>, %arg8: memref<64x16xf32, #tpu.memory_space<vmem>>, %arg9: memref<64x7xf32, #tpu.memory_space<vmem>>, %arg10: memref<3x16x3xf32, #tpu.memory_space<vmem>>, %arg11: memref<16x1xf32, #tpu.memory_space<vmem>>, %arg12: memref<1x64x512xbf16, #tpu.memory_space<vmem>>, %arg13: memref<64x1024xbf16, #tpu.memory_space<vmem>>, %arg14: memref<64x512xbf16, #tpu.memory_space<vmem>>, %arg15: memref<64x1xf32, #tpu.memory_space<vmem>>, %arg16: memref<64x1xf32, #tpu.memory_space<vmem>>) attributes {dimension_semantics = [#tpu.dimension_semantics<parallel>, #tpu.dimension_semantics<arbitrary>, #tpu.dimension_semantics<arbitrary>], iteration_bounds = array<i64: 2, 2, 2>, scalar_prefetch = 0 : i64, scratch_operands = 4 : i64, tpu.core_type = #tpu.core_type<tc>, window_params = [{transform_indices = @transform_0, window_bounds = array<i64: 1, 64, 512>}, {pipeline_mode = #tpu.pipeline_mode<synchronous>, transform_indices = @transform_1, window_bounds = array<i64: 64, 64>}, {pipeline_mode = #tpu.pipeline_mode<synchronous>, transform_indices = @transform_2, window_bounds = array<i64: 3, 16, 16>}, {pipeline_mode = #tpu.pipeline_mode<synchronous>, transform_indices = @transform_3, window_bounds = array<i64: 64, 64>}, {pipeline_mode = #tpu.pipeline_mode<synchronous>, transform_indices = @transform_4, window_bounds = array<i64: 16, 64>}, {pipeline_mode = #tpu.pipeline_mode<synchronous>, transform_indices = @transform_5, window_bounds = array<i64: 64, 16>}, {pipeline_mode = #tpu.pipeline_mode<synchronous>, transform_indices = @transform_6, window_bounds = array<i64: 64, 7>}, {pipeline_mode = #tpu.pipeline_mode<synchronous>, transform_indices = @transform_7, window_bounds = array<i64: 3, 16, 3>}, {pipeline_mode = #tpu.pipeline_mode<synchronous>, transform_indices = @transform_8, window_bounds = array<i64: 16, 1>}, {transform_indices = @transform_9, window_bounds = array<i64: 1, 64, 512>}]} {
    %c0_i32 = arith.constant 0 : i32
    %0 = arith.cmpi eq, %arg1, %c0_i32 : i32
    %1 = arith.extui %0 : i1 to i32
    %c0_i32_0 = arith.constant 0 : i32
    %2 = arith.cmpi ne, %1, %c0_i32_0 : i32
    scf.if %2 {
      %c0_i32_2 = arith.constant 0 : i32
      %6 = arith.cmpi eq, %arg2, %c0_i32_2 : i32
      %7 = arith.extui %6 : i1 to i32
      %c0_i32_3 = arith.constant 0 : i32
      %8 = arith.cmpi ne, %7, %c0_i32_3 : i32
      scf.if %8 {
        %cst_59 = arith.constant 0.000000e+00 : f32
        %120 = vector.broadcast %cst_59 : f32 to vector<64x1xf32>
        %c0_60 = arith.constant 0 : index
        %c0_61 = arith.constant 0 : index
        %121 = vector.load %arg15[%c0_60, %c0_61] : memref<64x1xf32, #tpu.memory_space<vmem>>, vector<64x1xf32>
        tpu.vector_store %arg15[%c0_60, %c0_61], %120 {strides = array<i32>} : memref<64x1xf32, #tpu.memory_space<vmem>>, vector<64x1xf32>,
      } else {
      }
      %c0 = arith.constant 0 : index
      %c0_4 = arith.constant 0 : index
      %c0_5 = arith.constant 0 : index
      %9 = vector.load %arg3[%c0, %c0_4, %c0_5] : memref<1x64x512xbf16, #tpu.memory_space<vmem>>, vector<1x64x512xbf16>
      %10 = vector.shape_cast %9 : vector<1x64x512xbf16> to vector<64x512xbf16>
      %c0_6 = arith.constant 0 : index
      %c0_7 = arith.constant 0 : index
      %11 = vector.load %arg4[%c0_6, %c0_7] : memref<64x64xbf16, #tpu.memory_space<vmem>>, vector<64x64xbf16>
      %cst = arith.constant dense<0.000000e+00> : vector<64x512xf32>
      %12 = tpu.matmul %11, %10, %cst {dimension_numbers = #tpu.dot_dimension_numbers<[1], [0], [0], [1], [0, 0, 1, 1], [], []>} : vector<64x64xbf16>, vector<64x512xbf16>, vector<64x512xf32> -> vector<64x512xf32>
      %c0_8 = arith.constant 0 : index
      %c0_9 = arith.constant 0 : index
      %13 = vector.load %arg9[%c0_8, %c0_9] : memref<64x7xf32, #tpu.memory_space<vmem>>, vector<64x1xf32>
      %14 = vector.broadcast %13 : vector<64x1xf32> to vector<64x512xf32>
      %15 = arith.addf %12, %14 : vector<64x512xf32>
      %cst_10 = arith.constant 0.000000e+00 : f32
      %16 = vector.broadcast %cst_10 : f32 to vector<64x512xf32>
      %17 = arith.maximumf %15, %16 : vector<64x512xf32>
      %c0_11 = arith.constant 0 : index
      %c1 = arith.constant 1 : index
      %18 = vector.load %arg9[%c0_11, %c1] : memref<64x7xf32, #tpu.memory_space<vmem>>, vector<64x1xf32>
      %19 = vector.broadcast %18 : vector<64x1xf32> to vector<64x512xf32>
      %20 = arith.mulf %17, %19 : vector<64x512xf32>
      %c0_12 = arith.constant 0 : index
      %c2 = arith.constant 2 : index
      %21 = vector.load %arg9[%c0_12, %c2] : memref<64x7xf32, #tpu.memory_space<vmem>>, vector<64x1xf32>
      %22 = vector.broadcast %21 : vector<64x1xf32> to vector<64x512xf32>
      %23 = arith.addf %20, %22 : vector<64x512xf32>
      %24 = arith.truncf %23 : vector<64x512xf32> to vector<64x512xbf16>
      %25 = vector.extract_strided_slice %24 {offsets = [0, 0], sizes = [16, 512], strides = [1, 1]} : vector<64x512xbf16> to vector<16x512xbf16>
      %c0_13 = arith.constant 0 : index
      %c0_14 = arith.constant 0 : index
      %26 = vector.load %arg14[%c0_13, %c0_14] : memref<64x512xbf16, #tpu.memory_space<vmem>>, vector<16x512xbf16>
      tpu.vector_store %arg14[%c0_13, %c0_14], %25 {strides = array<i32>} : memref<64x512xbf16, #tpu.memory_space<vmem>>, vector<16x512xbf16>,
      %27 = vector.extract_strided_slice %24 {offsets = [16, 0], sizes = [16, 512], strides = [1, 1]} : vector<64x512xbf16> to vector<16x512xbf16>
      %c0_15 = arith.constant 0 : index
      %c0_16 = arith.constant 0 : index
      %c0_17 = arith.constant 0 : index
      %28 = vector.load %arg5[%c0_15, %c0_16, %c0_17] : memref<3x16x16xbf16, #tpu.memory_space<vmem>>, vector<1x16x16xbf16>
      %29 = vector.shape_cast %28 : vector<1x16x16xbf16> to vector<16x16xbf16>
      %cst_18 = arith.constant dense<0.000000e+00> : vector<16x512xf32>
      %30 = tpu.matmul %29, %27, %cst_18 {dimension_numbers = #tpu.dot_dimension_numbers<[1], [0], [0], [1], [0, 0, 1, 1], [], []>} : vector<16x16xbf16>, vector<16x512xbf16>, vector<16x512xf32> -> vector<16x512xf32>
      %c0_19 = arith.constant 0 : index
      %c0_20 = arith.constant 0 : index
      %c0_21 = arith.constant 0 : index
      %31 = vector.load %arg10[%c0_19, %c0_20, %c0_21] : memref<3x16x3xf32, #tpu.memory_space<vmem>>, vector<1x16x3xf32>
      %32 = vector.shape_cast %31 : vector<1x16x3xf32> to vector<16x3xf32>
      %33 = vector.extract_strided_slice %32 {offsets = [0, 0], sizes = [16, 1], strides = [1, 1]} : vector<16x3xf32> to vector<16x1xf32>
      %34 = vector.broadcast %33 : vector<16x1xf32> to vector<16x512xf32>
      %35 = arith.addf %30, %34 : vector<16x512xf32>
      %cst_22 = arith.constant 0.000000e+00 : f32
      %36 = vector.broadcast %cst_22 : f32 to vector<16x512xf32>
      %37 = arith.maximumf %35, %36 : vector<16x512xf32>
      %38 = vector.extract_strided_slice %32 {offsets = [0, 1], sizes = [16, 1], strides = [1, 1]} : vector<16x3xf32> to vector<16x1xf32>
      %39 = vector.broadcast %38 : vector<16x1xf32> to vector<16x512xf32>
      %40 = arith.mulf %37, %39 : vector<16x512xf32>
      %41 = vector.extract_strided_slice %32 {offsets = [0, 2], sizes = [16, 1], strides = [1, 1]} : vector<16x3xf32> to vector<16x1xf32>
      %42 = vector.broadcast %41 : vector<16x1xf32> to vector<16x512xf32>
      %43 = arith.addf %40, %42 : vector<16x512xf32>
      %44 = arith.truncf %43 : vector<16x512xf32> to vector<16x512xbf16>
      %c16 = arith.constant 16 : index
      %c0_23 = arith.constant 0 : index
      %45 = vector.load %arg14[%c16, %c0_23] : memref<64x512xbf16, #tpu.memory_space<vmem>>, vector<16x512xbf16>
      tpu.vector_store %arg14[%c16, %c0_23], %44 {strides = array<i32>} : memref<64x512xbf16, #tpu.memory_space<vmem>>, vector<16x512xbf16>,
      %46 = vector.extract_strided_slice %24 {offsets = [32, 0], sizes = [16, 512], strides = [1, 1]} : vector<64x512xbf16> to vector<16x512xbf16>
      %47 = arith.addf %46, %44 : vector<16x512xbf16>
      %c1_24 = arith.constant 1 : index
      %c0_25 = arith.constant 0 : index
      %c0_26 = arith.constant 0 : index
      %48 = vector.load %arg5[%c1_24, %c0_25, %c0_26] : memref<3x16x16xbf16, #tpu.memory_space<vmem>>, vector<1x16x16xbf16>
      %49 = vector.shape_cast %48 : vector<1x16x16xbf16> to vector<16x16xbf16>
      %cst_27 = arith.constant dense<0.000000e+00> : vector<16x512xf32>
      %50 = tpu.matmul %49, %47, %cst_27 {dimension_numbers = #tpu.dot_dimension_numbers<[1], [0], [0], [1], [0, 0, 1, 1], [], []>} : vector<16x16xbf16>, vector<16x512xbf16>, vector<16x512xf32> -> vector<16x512xf32>
      %c1_28 = arith.constant 1 : index
      %c0_29 = arith.constant 0 : index
      %c0_30 = arith.constant 0 : index
      %51 = vector.load %arg10[%c1_28, %c0_29, %c0_30] : memref<3x16x3xf32, #tpu.memory_space<vmem>>, vector<1x16x3xf32>
      %52 = vector.shape_cast %51 : vector<1x16x3xf32> to vector<16x3xf32>
      %53 = vector.extract_strided_slice %52 {offsets = [0, 0], sizes = [16, 1], strides = [1, 1]} : vector<16x3xf32> to vector<16x1xf32>
      %54 = vector.broadcast %53 : vector<16x1xf32> to vector<16x512xf32>
      %55 = arith.addf %50, %54 : vector<16x512xf32>
      %cst_31 = arith.constant 0.000000e+00 : f32
      %56 = vector.broadcast %cst_31 : f32 to vector<16x512xf32>
      %57 = arith.maximumf %55, %56 : vector<16x512xf32>
      %58 = vector.extract_strided_slice %52 {offsets = [0, 1], sizes = [16, 1], strides = [1, 1]} : vector<16x3xf32> to vector<16x1xf32>
      %59 = vector.broadcast %58 : vector<16x1xf32> to vector<16x512xf32>
      %60 = arith.mulf %57, %59 : vector<16x512xf32>
      %61 = vector.extract_strided_slice %52 {offsets = [0, 2], sizes = [16, 1], strides = [1, 1]} : vector<16x3xf32> to vector<16x1xf32>
      %62 = vector.broadcast %61 : vector<16x1xf32> to vector<16x512xf32>
      %63 = arith.addf %60, %62 : vector<16x512xf32>
      %64 = arith.truncf %63 : vector<16x512xf32> to vector<16x512xbf16>
      %c32 = arith.constant 32 : index
      %c0_32 = arith.constant 0 : index
      %65 = vector.load %arg14[%c32, %c0_32] : memref<64x512xbf16, #tpu.memory_space<vmem>>, vector<16x512xbf16>
      tpu.vector_store %arg14[%c32, %c0_32], %64 {strides = array<i32>} : memref<64x512xbf16, #tpu.memory_space<vmem>>, vector<16x512xbf16>,
      %66 = vector.extract_strided_slice %24 {offsets = [48, 0], sizes = [16, 512], strides = [1, 1]} : vector<64x512xbf16> to vector<16x512xbf16>
      %67 = arith.addf %66, %64 : vector<16x512xbf16>
      %c2_33 = arith.constant 2 : index
      %c0_34 = arith.constant 0 : index
      %c0_35 = arith.constant 0 : index
      %68 = vector.load %arg5[%c2_33, %c0_34, %c0_35] : memref<3x16x16xbf16, #tpu.memory_space<vmem>>, vector<1x16x16xbf16>
      %69 = vector.shape_cast %68 : vector<1x16x16xbf16> to vector<16x16xbf16>
      %cst_36 = arith.constant dense<0.000000e+00> : vector<16x512xf32>
      %70 = tpu.matmul %69, %67, %cst_36 {dimension_numbers = #tpu.dot_dimension_numbers<[1], [0], [0], [1], [0, 0, 1, 1], [], []>} : vector<16x16xbf16>, vector<16x512xbf16>, vector<16x512xf32> -> vector<16x512xf32>
      %c2_37 = arith.constant 2 : index
      %c0_38 = arith.constant 0 : index
      %c0_39 = arith.constant 0 : index
      %71 = vector.load %arg10[%c2_37, %c0_38, %c0_39] : memref<3x16x3xf32, #tpu.memory_space<vmem>>, vector<1x16x3xf32>
      %72 = vector.shape_cast %71 : vector<1x16x3xf32> to vector<16x3xf32>
      %73 = vector.extract_strided_slice %72 {offsets = [0, 0], sizes = [16, 1], strides = [1, 1]} : vector<16x3xf32> to vector<16x1xf32>
      %74 = vector.broadcast %73 : vector<16x1xf32> to vector<16x512xf32>
      %75 = arith.addf %70, %74 : vector<16x512xf32>
      %cst_40 = arith.constant 0.000000e+00 : f32
      %76 = vector.broadcast %cst_40 : f32 to vector<16x512xf32>
      %77 = arith.maximumf %75, %76 : vector<16x512xf32>
      %78 = vector.extract_strided_slice %72 {offsets = [0, 1], sizes = [16, 1], strides = [1, 1]} : vector<16x3xf32> to vector<16x1xf32>
      %79 = vector.broadcast %78 : vector<16x1xf32> to vector<16x512xf32>
      %80 = arith.mulf %77, %79 : vector<16x512xf32>
      %81 = vector.extract_strided_slice %72 {offsets = [0, 2], sizes = [16, 1], strides = [1, 1]} : vector<16x3xf32> to vector<16x1xf32>
      %82 = vector.broadcast %81 : vector<16x1xf32> to vector<16x512xf32>
      %83 = arith.addf %80, %82 : vector<16x512xf32>
      %84 = arith.truncf %83 : vector<16x512xf32> to vector<16x512xbf16>
      %c48 = arith.constant 48 : index
      %c0_41 = arith.constant 0 : index
      %85 = vector.load %arg14[%c48, %c0_41] : memref<64x512xbf16, #tpu.memory_space<vmem>>, vector<16x512xbf16>
      tpu.vector_store %arg14[%c48, %c0_41], %84 {strides = array<i32>} : memref<64x512xbf16, #tpu.memory_space<vmem>>, vector<16x512xbf16>,
      %c0_42 = arith.constant 0 : index
      %c0_43 = arith.constant 0 : index
      %86 = vector.load %arg6[%c0_42, %c0_43] : memref<64x64xbf16, #tpu.memory_space<vmem>>, vector<64x64xbf16>
      %c0_44 = arith.constant 0 : index
      %c0_45 = arith.constant 0 : index
      %87 = vector.load %arg14[%c0_44, %c0_45] : memref<64x512xbf16, #tpu.memory_space<vmem>>, vector<64x512xbf16>
      %cst_46 = arith.constant dense<0.000000e+00> : vector<64x512xf32>
      %88 = tpu.matmul %86, %87, %cst_46 {dimension_numbers = #tpu.dot_dimension_numbers<[1], [0], [0], [1], [0, 0, 1, 1], [], []>} : vector<64x64xbf16>, vector<64x512xbf16>, vector<64x512xf32> -> vector<64x512xf32>
      %c0_47 = arith.constant 0 : index
      %c3 = arith.constant 3 : index
      %89 = vector.load %arg9[%c0_47, %c3] : memref<64x7xf32, #tpu.memory_space<vmem>>, vector<64x1xf32>
      %90 = vector.broadcast %89 : vector<64x1xf32> to vector<64x512xf32>
      %91 = arith.addf %88, %90 : vector<64x512xf32>
      %cst_48 = arith.constant 0.000000e+00 : f32
      %92 = vector.broadcast %cst_48 : f32 to vector<64x512xf32>
      %93 = arith.maximumf %91, %92 : vector<64x512xf32>
      %c0_49 = arith.constant 0 : index
      %c4 = arith.constant 4 : index
      %94 = vector.load %arg9[%c0_49, %c4] : memref<64x7xf32, #tpu.memory_space<vmem>>, vector<64x1xf32>
      %95 = vector.broadcast %94 : vector<64x1xf32> to vector<64x512xf32>
      %96 = arith.mulf %93, %95 : vector<64x512xf32>
      %c0_50 = arith.constant 0 : index
      %c5 = arith.constant 5 : index
      %97 = vector.load %arg9[%c0_50, %c5] : memref<64x7xf32, #tpu.memory_space<vmem>>, vector<64x1xf32>
      %98 = vector.broadcast %97 : vector<64x1xf32> to vector<64x512xf32>
      %99 = arith.addf %96, %98 : vector<64x512xf32>
      %c512_i32 = arith.constant 512 : i32
      %100 = arith.muli %arg2, %c512_i32 : i32
      %101 = tpu.iota {dimensions = array<i32: 1>} : vector<1x512xi32>
      %102 = vector.broadcast %100 : i32 to vector<1x512xi32>
      %103 = arith.addi %102, %101 : vector<1x512xi32>
      %c1000_i32 = arith.constant 1000 : i32
      %104 = vector.broadcast %c1000_i32 : i32 to vector<1x512xi32>
      %105 = arith.cmpi slt, %103, %104 : vector<1x512xi32>
      %cst_51 = arith.constant 0.000000e+00 : f32
      %106 = vector.shape_cast %105 : vector<1x512xi1> to vector<1x512xi1>
      %107 = vector.broadcast %106 : vector<1x512xi1> to vector<64x512xi1>
      %108 = vector.broadcast %cst_51 : f32 to vector<64x512xf32>
      %109 = arith.select %107, %99, %108 : vector<64x512xi1>, vector<64x512xf32>
      %c0_52 = arith.constant 0 : index
      %c0_53 = arith.constant 0 : index
      %110 = vector.load %arg15[%c0_52, %c0_53] : memref<64x1xf32, #tpu.memory_space<vmem>>, vector<64x1xf32>
      %cst_54 = arith.constant dense<0.000000e+00> : vector<64xf32>
      %111 = vector.multi_reduction <add>, %109, %cst_54 [1] : vector<64x512xf32> to vector<64xf32>
      %112 = vector.shape_cast %111 : vector<64xf32> to vector<64x1xf32>
      %113 = arith.addf %110, %112 : vector<64x1xf32>
      %c0_55 = arith.constant 0 : index
      %c0_56 = arith.constant 0 : index
      %114 = vector.load %arg15[%c0_55, %c0_56] : memref<64x1xf32, #tpu.memory_space<vmem>>, vector<64x1xf32>
      tpu.vector_store %arg15[%c0_55, %c0_56], %113 {strides = array<i32>} : memref<64x1xf32, #tpu.memory_space<vmem>>, vector<64x1xf32>,
      %c512_i32_57 = arith.constant 512 : i32
      %115 = arith.muli %arg2, %c512_i32_57 : i32
      %116 = tpu.assume_multiple %115, 512 : i32
      %117 = arith.truncf %99 : vector<64x512xf32> to vector<64x512xbf16>
      %c0_58 = arith.constant 0 : index
      %118 = arith.index_cast %116 : i32 to index
      %119 = vector.load %arg13[%c0_58, %118] : memref<64x1024xbf16, #tpu.memory_space<vmem>>, vector<64x512xbf16>
      tpu.vector_store %arg13[%c0_58, %118], %117 {strides = array<i32>} : memref<64x1024xbf16, #tpu.memory_space<vmem>>, vector<64x512xbf16>,
    } else {
    }
    %c1_i32 = arith.constant 1 : i32
    %3 = arith.cmpi eq, %arg1, %c1_i32 : i32
    %4 = arith.extui %3 : i1 to i32
    %c0_i32_1 = arith.constant 0 : i32
    %5 = arith.cmpi ne, %4, %c0_i32_1 : i32
    scf.if %5 {
      %c0_i32_2 = arith.constant 0 : i32
      %6 = arith.cmpi eq, %arg2, %c0_i32_2 : i32
      %7 = arith.extui %6 : i1 to i32
      %c0_i32_3 = arith.constant 0 : i32
      %8 = arith.cmpi ne, %7, %c0_i32_3 : i32
      scf.if %8 {
        %c0_12 = arith.constant 0 : index
        %c0_13 = arith.constant 0 : index
        %25 = vector.load %arg15[%c0_12, %c0_13] : memref<64x1xf32, #tpu.memory_space<vmem>>, vector<64x1xf32>
        %cst = arith.constant 1.000000e-03 : f32
        %26 = vector.broadcast %cst : f32 to vector<64x1xf32>
        %27 = arith.mulf %25, %26 : vector<64x1xf32>
        %c0_14 = arith.constant 0 : index
        %c0_15 = arith.constant 0 : index
        %28 = vector.load %arg7[%c0_14, %c0_15] : memref<16x64xf32, #tpu.memory_space<vmem>>, vector<16x64xf32>
        %cst_16 = arith.constant dense<0.000000e+00> : vector<16x1xf32>
        %29 = tpu.matmul %28, %27, %cst_16 {dimension_numbers = #tpu.dot_dimension_numbers<[1], [0], [0], [1], [0, 0, 1, 1], [], []>} : vector<16x64xf32>, vector<64x1xf32>, vector<16x1xf32> -> vector<16x1xf32>
        %c0_17 = arith.constant 0 : index
        %c0_18 = arith.constant 0 : index
        %30 = vector.load %arg11[%c0_17, %c0_18] : memref<16x1xf32, #tpu.memory_space<vmem>>, vector<16x1xf32>
        %31 = arith.addf %29, %30 : vector<16x1xf32>
        %cst_19 = arith.constant 0.000000e+00 : f32
        %32 = vector.broadcast %cst_19 : f32 to vector<16x1xf32>
        %33 = arith.maximumf %31, %32 : vector<16x1xf32>
        %c0_20 = arith.constant 0 : index
        %c0_21 = arith.constant 0 : index
        %34 = vector.load %arg8[%c0_20, %c0_21] : memref<64x16xf32, #tpu.memory_space<vmem>>, vector<64x16xf32>
        %cst_22 = arith.constant dense<0.000000e+00> : vector<64x1xf32>
        %35 = tpu.matmul %34, %33, %cst_22 {dimension_numbers = #tpu.dot_dimension_numbers<[1], [0], [0], [1], [0, 0, 1, 1], [], []>} : vector<64x16xf32>, vector<16x1xf32>, vector<64x1xf32> -> vector<64x1xf32>
        %c0_23 = arith.constant 0 : index
        %c6 = arith.constant 6 : index
        %36 = vector.load %arg9[%c0_23, %c6] : memref<64x7xf32, #tpu.memory_space<vmem>>, vector<64x1xf32>
        %37 = arith.addf %35, %36 : vector<64x1xf32>
        %38 = arith.negf %37 : vector<64x1xf32>
        %39 = math.exp %38 : vector<64x1xf32>
        %cst_24 = arith.constant 1.000000e+00 : f32
        %40 = vector.broadcast %cst_24 : f32 to vector<64x1xf32>
        %41 = arith.addf %40, %39 : vector<64x1xf32>
        %42 = arith.divf %40, %41 : vector<64x1xf32>
        %c0_25 = arith.constant 0 : index
        %c0_26 = arith.constant 0 : index
        %43 = vector.load %arg16[%c0_25, %c0_26] : memref<64x1xf32, #tpu.memory_space<vmem>>, vector<64x1xf32>
        tpu.vector_store %arg16[%c0_25, %c0_26], %42 {strides = array<i32>} : memref<64x1xf32, #tpu.memory_space<vmem>>, vector<64x1xf32>,
      } else {
      }
      %c512_i32 = arith.constant 512 : i32
      %9 = arith.muli %arg2, %c512_i32 : i32
      %10 = tpu.assume_multiple %9, 512 : i32
      %c0 = arith.constant 0 : index
      %11 = arith.index_cast %10 : i32 to index
      %12 = vector.load %arg13[%c0, %11] : memref<64x1024xbf16, #tpu.memory_space<vmem>>, vector<64x512xbf16>
      %13 = arith.extf %12 : vector<64x512xbf16> to vector<64x512xf32>
      %c0_4 = arith.constant 0 : index
      %c0_5 = arith.constant 0 : index
      %c0_6 = arith.constant 0 : index
      %14 = vector.load %arg3[%c0_4, %c0_5, %c0_6] : memref<1x64x512xbf16, #tpu.memory_space<vmem>>, vector<1x64x512xbf16>
      %15 = vector.shape_cast %14 : vector<1x64x512xbf16> to vector<64x512xbf16>
      %16 = arith.extf %15 : vector<64x512xbf16> to vector<64x512xf32>
      %c0_7 = arith.constant 0 : index
      %c0_8 = arith.constant 0 : index
      %17 = vector.load %arg16[%c0_7, %c0_8] : memref<64x1xf32, #tpu.memory_space<vmem>>, vector<64x1xf32>
      %18 = vector.broadcast %17 : vector<64x1xf32> to vector<64x512xf32>
      %19 = arith.mulf %18, %13 : vector<64x512xf32>
      %20 = arith.addf %19, %16 : vector<64x512xf32>
      %21 = arith.truncf %20 : vector<64x512xf32> to vector<64x512xbf16>
      %c0_9 = arith.constant 0 : index
      %c0_10 = arith.constant 0 : index
      %c0_11 = arith.constant 0 : index
      %22 = vector.load %arg12[%c0_9, %c0_10, %c0_11] : memref<1x64x512xbf16, #tpu.memory_space<vmem>>, vector<1x64x512xbf16>
      %23 = vector.shape_cast %22 : vector<1x64x512xbf16> to vector<64x512xbf16>
      %24 = vector.shape_cast %21 : vector<64x512xbf16> to vector<1x64x512xbf16>
      tpu.vector_store %arg12[%c0_9, %c0_10, %c0_11], %24 {strides = array<i32>} : memref<1x64x512xbf16, #tpu.memory_space<vmem>>, vector<1x64x512xbf16>,
    } else {
    }
    return
  }
  func.func @transform_0(%arg0: i32, %arg1: i32, %arg2: i32) -> (i32, i32, i32) {
    %c0_i32 = arith.constant 0 : i32
    %c0_i32_0 = arith.constant 0 : i32
    return %arg0, %c0_i32, %arg2 : i32, i32, i32
  }
  func.func @transform_1(%arg0: i32, %arg1: i32, %arg2: i32) -> (i32, i32) {
    %c0_i32 = arith.constant 0 : i32
    %c0_i32_0 = arith.constant 0 : i32
    %c0_i32_1 = arith.constant 0 : i32
    return %c0_i32, %c0_i32_0 : i32, i32
  }
  func.func @transform_2(%arg0: i32, %arg1: i32, %arg2: i32) -> (i32, i32, i32) {
    %c0_i32 = arith.constant 0 : i32
    %c0_i32_0 = arith.constant 0 : i32
    %c0_i32_1 = arith.constant 0 : i32
    %c0_i32_2 = arith.constant 0 : i32
    return %c0_i32, %c0_i32_0, %c0_i32_1 : i32, i32, i32
  }
  func.func @transform_3(%arg0: i32, %arg1: i32, %arg2: i32) -> (i32, i32) {
    %c0_i32 = arith.constant 0 : i32
    %c0_i32_0 = arith.constant 0 : i32
    %c0_i32_1 = arith.constant 0 : i32
    return %c0_i32, %c0_i32_0 : i32, i32
  }
  func.func @transform_4(%arg0: i32, %arg1: i32, %arg2: i32) -> (i32, i32) {
    %c0_i32 = arith.constant 0 : i32
    %c0_i32_0 = arith.constant 0 : i32
    %c0_i32_1 = arith.constant 0 : i32
    return %c0_i32, %c0_i32_0 : i32, i32
  }
  func.func @transform_5(%arg0: i32, %arg1: i32, %arg2: i32) -> (i32, i32) {
    %c0_i32 = arith.constant 0 : i32
    %c0_i32_0 = arith.constant 0 : i32
    %c0_i32_1 = arith.constant 0 : i32
    return %c0_i32, %c0_i32_0 : i32, i32
  }
  func.func @transform_6(%arg0: i32, %arg1: i32, %arg2: i32) -> (i32, i32) {
    %c0_i32 = arith.constant 0 : i32
    %c0_i32_0 = arith.constant 0 : i32
    %c0_i32_1 = arith.constant 0 : i32
    return %c0_i32, %c0_i32_0 : i32, i32
  }
  func.func @transform_7(%arg0: i32, %arg1: i32, %arg2: i32) -> (i32, i32, i32) {
    %c0_i32 = arith.constant 0 : i32
    %c0_i32_0 = arith.constant 0 : i32
    %c0_i32_1 = arith.constant 0 : i32
    %c0_i32_2 = arith.constant 0 : i32
    return %c0_i32, %c0_i32_0, %c0_i32_1 : i32, i32, i32
  }
  func.func @transform_8(%arg0: i32, %arg1: i32, %arg2: i32) -> (i32, i32) {
    %c0_i32 = arith.constant 0 : i32
    %c0_i32_0 = arith.constant 0 : i32
    %c0_i32_1 = arith.constant 0 : i32
    return %c0_i32, %c0_i32_0 : i32, i32
  }
  func.func @transform_9(%arg0: i32, %arg1: i32, %arg2: i32) -> (i32, i32, i32) {
    %0 = arith.muli %arg2, %arg1 : i32
    %c0_i32 = arith.constant 0 : i32
    %c0_i32_0 = arith.constant 0 : i32
    return %arg0, %c0_i32, %0 : i32, i32, i32
  }
}

</mosaic_0001>

<bundles_post_ra>
// kernel: tpu_custom_call.1
= control target key start
LH: loop header
LB: loop body
LE: loop exit
PB: predicated region body
PF: predicated region fallthrough
CT: control target
= control target key end

     0   :  { %s4667_s0 = inlined_call_operand.hbm [shape: bf16[2,64,1024], index: 0, kind: input, shape index: {}]   ;;  %s4668_s1 = inlined_call_operand.vmem [shape: bf16[64,64], index: 1, kind: input, shape index: {}]   ;;  %s4669_s2 = inlined_call_operand.vmem [shape: bf16[3,16,16], index: 2, kind: input, shape index: {}]   ;;  %s4670_s3 = inlined_call_operand.vmem [shape: bf16[64,64], index: 3, kind: input, shape index: {}]   ;;  %s4671_s4 = inlined_call_operand.vmem [shape: f32[16,64], index: 4, kind: input, shape index: {}]   ;;  %s4672_s5 = inlined_call_operand.vmem [shape: f32[64,16], index: 5, kind: input, shape index: {}]   ;;  %s4673_s6 = inlined_call_operand.vmem [shape: f32[64,7], index: 6, kind: input, shape index: {}]   ;;  %s4674_s7 = inlined_call_operand.vmem [shape: f32[3,16,3], index: 7, kind: input, shape index: {}]   ;;  %s4675_s8 = inlined_call_operand.vmem [shape: f32[16,1], index: 8, kind: input, shape index: {}]   ;;  %s4676_s9 = inlined_call_operand.hbm [shape: bf16[2,64,1024], index: 9, kind: output, shape index: {}]  }
   0x1   :  { %4691 = sst [smem:[#allocation23_spill]] %s4667_s0 }
   0x2   :  { %4692 = sst [smem:[#allocation24_spill]] %s4668_s1 }
   0x3   :  { %4693 = sst [smem:[#allocation25_spill]] %s4669_s2 }
   0x4   :  { %4694 = sst [smem:[#allocation26_spill]] %s4670_s3 }
   0x5   :  { %4695 = sst [smem:[#allocation27_spill]] %s4671_s4 }
   0x6   :  { %4696 = sst [smem:[#allocation28_spill]] %s4672_s5 }
   0x7   :  { %4697 = sst [smem:[#allocation29_spill]] %s4673_s6 }
   0x8   :  { %4698 = sst [smem:[#allocation30_spill]] %s4675_s8 }
   0x9   :  { %4699 = sst [smem:[#allocation31_spill]] %s4676_s9 }
   0xa   :  { %14 = vsyncpa [#allocation7], 0 }
   0xb   :  { %16 = vsyncpa [#allocation7 + $0x1], 0 }
   0xc   :  { %17 = vsyncpa [#allocation8], 0 }
   0xd   :  { %19 = vsyncpa [#allocation8 + $0x1], 0  ;;  %s3413_s30 = smov 0   ;;  %s3415_s10 = smov 0  }
   0xe   :  { %s3417_s11 = smov 0   ;;  %s3419_s12 = smov 0  }
   0xf   :  { %s3421_s13 = smov 0   ;;  %s3423_s14 = smov 0  }
  0x10   :  { %s3425_s15 = smov 0   ;;  %s3427_s16 = smov 0  }
  0x11   :  { %s3429_s17 = smov 0   ;;  %s3431_s18 = smov 0  }
  0x12   :  { %s3433_s19 = smov 0   ;;  %s3435_s20 = smov 0  }
  0x13   :  { %s3437_s21 = smov 0  }
  0x14 LB: > { %4700 = sst [smem:[#allocation12_spill]] %s3306_s11  ;;  %s2656_s22 = sadd.s32 4294967295, %s3346_s21   ;;  %s3346_s21 = sphi %s3437_s21, %s25_s21   ;;  %s3342_s20 = sphi %s3435_s20, %s4751_s20   ;;  %s3338_s19 = sphi %s3433_s19, %s4744_s19   ;;  %s3334_s18 = sphi %s3431_s18, %s4743_s18   ;;  %s3330_s17 = sphi %s3429_s17, %s4750_s17   ;;  %s3326_s16 = sphi %s3427_s16, %s4742_s16   ;;  %s3322_s15 = sphi %s3425_s15, %s4741_s15   ;;  %s3318_s14 = sphi %s3423_s14, %s4740_s14   ;;  %s3314_s13 = sphi %s3421_s13, %s4749_s13   ;;  %s3310_s12 = sphi %s3419_s12, %s4748_s12   ;;  %s3306_s11 = sphi %s3417_s11, %s4738_s11   ;;  %s3302_s10 = sphi %s3415_s10, %s4747_s10   ;;  %s3298_s30 = sphi %s3413_s30, %s4746_s30  }
  0x15   : > { %4701 = sst [smem:[#allocation13_spill]] %s3318_s14  ;;  %s37_s24 = sadd.s32 1, %s3334_s18 }
  0x16   : > { %4702 = sst [smem:[#allocation14_spill]] %s3330_s17  ;;  %s40_s25 = sadd.s32 1, %s3338_s19 }
  0x17   : > { %4703 = sst [smem:[#allocation15_spill]] %s3334_s18  ;;  %p38_p0 = scmp.ge.s32.totalorder %s37_s24, 2 }
  0x18   : > { %4704 = sst [smem:[#allocation16_spill]] %s3338_s19  ;;  %s44_s26 = sadd.s32 1, %s3342_s20 }
  0x19   : > { %p60_p1 = scmp.ne.s32.totalorder %s3318_s14, %s3314_s13  ;;  %s4753_s24 = smov (%p38_p0, %s37_s24), 0 }
  0x1a   : > { %4705 = sst [smem:[#allocation17_spill]] %s4753_s24  ;;  %s4755_s25 = smov (!%p38_p0, %s40_s25), %s3338_s19 }
  0x1b   : > { %s49_s28 = ssub.s32 %s3334_s18, %s4753_s24  ;;  %p61_p2 = scmp.eq.s32.totalorder %s3346_s21, 0 }
  0x1c   : > { %p42_p3 = scmp.ge.s32.totalorder %s4755_s25, 2  ;;  %p66_p4 = scmp.ne.s32.totalorder %s3314_s13, %s3310_s12 }
  0x1d   : > { %p3491_p5 = por %p61_p2, %p60_p1  ;;  %p67_p6 = scmp.eq.s32.totalorder %s2656_s22, 0 }
  0x1e   : > { %s4757_s25 = smov (%p42_p3, %s4755_s25), 0  ;;  %s4759_s26 = smov (!%p42_p3, %s44_s26), %s3342_s20 }
  0x1f   : > { %4707 = sst [smem:[#allocation18_spill]] %s4757_s25  ;;  %p3498_p7 = por %p67_p6, %p66_p4 }
  0x20   : > { %s244_s23 = smul.u32 %s3334_s18, %s3338_s19  ;;  %p46_p8 = scmp.ge.s32.totalorder %s4759_s26, 2 }
  0x21   : > { %s245_s12 = smul.u32 %s4757_s25, %s4753_s24  ;;  %s251_s9 = sadd.s32 1, %s3306_s11 }
  0x22   : > { %p261_p9 = scmp.ne.s32.totalorder %s3306_s11, %s3302_s10  ;;  %s4761_s26 = smov (%p46_p8, %s4759_s26), 0 }
  0x23   : > { %4709 = sst [smem:[#allocation19_spill]] %s4761_s26  ;;  %s247_s17 = ssub.s32 %s244_s23, %s245_s12 }
  0x24   : > { %p262_p10 = scmp.eq.s32.totalorder %s2656_s22, 7  ;;  %s48_s5 = ssub.s32 %s3342_s20, %s4761_s26 }
  0x25   : > { %p267_p11 = scmp.ne.s32.totalorder %s3302_s10, %s3298_s30  ;;  %s50_s8 = sor.u32 %s49_s28, %s48_s5 }
  0x26   : > { %s248_s19 = sor.u32 %s247_s17, %s48_s5  ;;  %p51_p12 = scmp.eq.s32.totalorder %s50_s8, 0 }
  0x27   : > { %p249_p13 = scmp.eq.s32.totalorder %s248_s19, 0  ;;  %p3515_p0 = por %p262_p10, %p261_p9 }
  0x28   : > { %s4711_s24 = sadd.s32 4294967294, %s3346_s21   ;;  %s4712_s4 = sadd.s32 1, %s3318_s14 }
  0x29   : > { %p268_p1 = scmp.eq.s32.totalorder %s4711_s24, 7  ;;  %p2982_p3 = scmp.lt.s32.totalorder %s3346_s21, 8 }
  0x2a   : > { %s3524_s3 = scalar_select %p51_p12, %s3318_s14, %s4712_s4  }
  0x2b   : > { %s3527_s23 = scalar_select %p249_p13, %s3306_s11, %s251_s9  }
  0x2c   : > { %4713 = sst [smem:[#allocation20_spill]] %s3524_s3  ;;  %p3529_p2 = por %p268_p1, %p267_p11 }
  0x2d   : > { %4714 = sst [smem:[#allocation21_spill]] %s3527_s23  ;;  %s312_s5 = sand.u32 1, %s3318_s14  }
  0x2e   : > { %s4715_s22 = scalar_select %p3529_p2, 1, 0 }
  0x2f   : > { %s2660_s8 = sshll.u32 %s312_s5, 7  ;;  %s2661_s17 = sshll.u32 %s3334_s18, 2 }
  0x30   : > { %4716 = sst [smem:[#allocation22_spill]] %s4715_s22  ;;  %s2662_s19 = sshll.u32 %s3342_s20, 6 }
  0x31   : > { %s316_s28 = scalar_lea.vmem [#allocation6], %s2660_s8  ;;  %s321_s26 = sadd.s32 %s2662_s19, %s2661_s17 }
  0x32   : > { %s326_s12 = sshll.u32 %s316_s28, 4  ;;  %s2663_s24 = sshll.u32 %s321_s26, 2  ;;  %s327_s12 = int_to_ptr.vmem [resolvable:$true] %s326_s12 }
  0x33   : > { %p2975_p4 = pnand %p2982_p3, %p3491_p5  ;;  %s4717_s0 = sld [smem:[#allocation23_spill]] }
  0x34   : > { %p2664_p6 = scmp.ge.s32.totalorder %s3346_s21, 1  ;;  %s313_s11 = scalar_lea.sflag [#allocation7], %s312_s5 }
  0x35   : > { %s3348_s14 = smov 512   ;;  %s3349_s22 = smov 256  }
  0x36   : > { %s3350_s18 = smov 16   ;;  %p334_p8 = scmp.lt.s32.totalorder %s3346_s21, 9 }
  0x38   : > { %p335_p9 = pnand %p2664_p6, %p334_p8 }
  0x39   : > { %s323_s3 = scalar_lea.hbm %s4717_s0, %s2663_s24  ;;  %s340_s26 = sand.u32 (!%p335_p9), 1, %s3314_s13  }
  0x3a   : > { %s324_s23 = sshll.u32 %s323_s3, 4  ;;  %338 = sbr.rel (%p335_p9) target bundleno = 1614 (0x64e), region = 56  ;;  %s325_s23 = int_to_ptr.hbm [resolvable:$true] %s324_s23 }
  0x3b   : > { %2977 = dma.hbm_to_vmem [thread:$0]  (!%p2975_p4), %s325_s23, 2048, %s327_s12, %s313_s11, %s3348_s14, %s3349_s22, %s3350_s18  }
  0x3c   : > { %s2665_s29 = sshll.u32 (!%p335_p9), %s340_s26, 7  ;;  %s341_s8 = scalar_lea.sflag (!%p335_p9), [#allocation7], %s340_s26 }
  0x3d   : > { %s3545_s17 = scalar_lea.vmem (!%p335_p9), [#allocation6], %s2665_s29 }
  0x3f   : > { %3289 = dma.done.wait (%p3498_p7), %s341_s8, 2048  }
  0x40   : > { %3291 = vsyncadd (%p3498_p7), %s341_s8, 4294965248  ;;  %s4690_s3 = sand.u32 1, %s3302_s10   ;;  %p2667_p5 = scmp.ne.s32.totalorder %s3326_s16, 0 }
  0x41   : > { %s2666_s11 = sshll.u32 %s4690_s3, 7  ;;  %p2668_p10 = scmp.ne.s32.totalorder (!%p2667_p5), %s3322_s15, 0 }
  0x42   : > { %s3554_s14 = scalar_lea.vmem [#allocation9], %s2666_s11  ;;  %387 = sbr.rel (%p2667_p5) target bundleno = 1093 (0x445), region = 64 }
  0x47   : > { %391 = sbr.rel (%p2668_p10) target bundleno = 85 (0x55), region = 68 }
  0x4c   : > { %vm392_vm0 = vcmask 7168   ;;  %v3351_v0 = vmov 0.0  }
  0x4d   : > { %393 = vst.msk [vmem:[#allocation4] sm:$0xff] %vm392_vm0, %v3351_v0 }
  0x4e   : > { %394 = vst.msk [vmem:[#allocation4 + $0x8] sm:$0xff] %vm392_vm0, %v3351_v0 }
  0x4f   : > { %395 = vst.msk [vmem:[#allocation4 + $0x10] sm:$0xff] %vm392_vm0, %v3351_v0 }
  0x50   : > { %396 = vst.msk [vmem:[#allocation4 + $0x18] sm:$0xff] %vm392_vm0, %v3351_v0 }
  0x51   : > { %397 = vst.msk [vmem:[#allocation4 + $0x20] sm:$0xff] %vm392_vm0, %v3351_v0 }
  0x52   : > { %398 = vst.msk [vmem:[#allocation4 + $0x28] sm:$0xff] %vm392_vm0, %v3351_v0 }
  0x53   : > { %399 = vst.msk [vmem:[#allocation4 + $0x30] sm:$0xff] %vm392_vm0, %v3351_v0 }
  0x54   : > { %400 = vst.msk [vmem:[#allocation4 + $0x38] sm:$0xff] %vm392_vm0, %v3351_v0 }
  0x55 PF: > { %s4718_s6 = sld [smem:[#allocation29_spill]]  ;;  %v2735_v2 = vld [vmem:[%s3545_s17 + $0x60] sm:$0xf]  ;;  %v3352_v3 = vmov 2   ;;  %v3353_v4 = vmov 1   ;;  %v3354_v8 = vmov 0  }
  0x56   : > { %3105 = vset.pattern.permute.xlu2 %v3352_v3  ;;  %3104 = vset.pattern.permute.xlu1 %v3353_v4  ;;  %v2937_v5 = vld [vmem:[%s3545_s17 + $0x6c] sm:$0xf0]  ;;  %v2935_v6 = vld [vmem:[%s3545_s17 + $0x64] sm:$0xf]  ;;  %v2737_v7 = vld [vmem:[%s3545_s17 + $0x70] sm:$0xf0] }
  0x57   : > { %3103 = vset.pattern.permute.xlu0 %v3354_v8  ;;  %v2736_v9 = vor.u32 %v2937_v5, %v2735_v2  ;;  %v2740_v10 = vor.u32 %v2935_v6, %v2737_v7  ;;  %v2743_v11 = vld [vmem:[%s3545_s17 + $0x68] sm:$0xf]  ;;  %v2938_v12 = vld [vmem:[%s3545_s17 + $0x74] sm:$0xf0]  ;;  %v2936_v13 = vld [vmem:[%s3545_s17 + $0x6c] sm:$0xf] }
  0x58   : > { %v2744_v14 = vor.u32 %v2938_v12, %v2743_v11  ;;  %v2745_v15 = vld [vmem:[%s3545_s17 + $0x78] sm:$0xf0]  ;;  %v2719_v16 = vld [vmem:[%s3545_s17 + $0x40] sm:$0xf]  ;;  %v2933_v17 = vld [vmem:[%s3545_s17 + $0x4c] sm:$0xf0] }
  0x59   : > { %590 = vmatpush.bf16.msra.mxu0 %v2736_v9  ;;  %619 = vmatpush.bf16.msra.mxu1 %v2740_v10  ;;  %v2748_v18 = vor.u32 %v2936_v13, %v2745_v15  ;;  %v2720_v19 = vor.u32 %v2933_v17, %v2719_v16  ;;  %v2931_v20 = vld [vmem:[%s3545_s17 + $0x44] sm:$0xf]  ;;  %v2721_v21 = vld [vmem:[%s3545_s17 + $0x50] sm:$0xf0]  ;;  %v2727_v22 = vld [vmem:[%s3545_s17 + $0x48] sm:$0xf] }
  0x5a   : > { %648 = vmatpush.bf16.msra.mxu2 %v2744_v14  ;;  %v2724_v23 = vor.u32 %v2931_v20, %v2721_v21  ;;  %v2934_v24 = vld [vmem:[%s3545_s17 + $0x54] sm:$0xf0]  ;;  %v2932_v25 = vld [vmem:[%s3545_s17 + $0x4c] sm:$0xf]  ;;  %v2729_v26 = vld [vmem:[%s3545_s17 + $0x58] sm:$0xf0] }
  0x5b   : > { %v427_v1 = vld [vmem:[%s4718_s6 + $0x10] sm:$0xff]  ;;  %677 = vmatpush.bf16.msra.mxu3 %v2748_v18  ;;  %v2728_v27 = vor.u32 %v2934_v24, %v2727_v22  ;;  %v2732_v28 = vor.u32 %v2932_v25, %v2729_v26  ;;  %v428_v29 = vld [vmem:[%s4718_s6 + $0x18] sm:$0xff]  ;;  %v2703_v30 = vld [vmem:[%s3545_s17 + $0x20] sm:$0xf]  ;;  %s4719_s1 = sld [smem:[#allocation24_spill]]  ;;  %vm573_vm1 = vcmask 523264  }
  0x5c   : > { %807 = vperm.xlu2 %3105, %v427_v1   ;;  %743 = vperm.xlu1 %3104, %v427_v1   ;;  %v2929_v31 = vld [vmem:[%s3545_s17 + $0x2c] sm:$0xf0]  ;;  %v2927_v32 = vld [vmem:[%s3545_s17 + $0x24] sm:$0xf]  ;;  %v2705_v33 = vld [vmem:[%s3545_s17 + $0x30] sm:$0xf0] }
  0x5d   : > { %445 = vperm.xlu0 %3103, %v427_v1   ;;  %v2711_v34 = vld [vmem:[%s3545_s17 + $0x28] sm:$0xf]  ;;  %591 = vmatpush.bf16.msra.mxu0 %v2720_v19  ;;  %v2704_v35 = vor.u32 %v2929_v31, %v2703_v30  ;;  %v2708_v36 = vor.u32 %v2927_v32, %v2705_v33  ;;  %v2930_v37 = vld [vmem:[%s3545_s17 + $0x34] sm:$0xf0]  ;;  %v2928_v38 = vld [vmem:[%s3545_s17 + $0x2c] sm:$0xf] }
  0x5e   : > { %620 = vmatpush.bf16.msra.mxu1 %v2724_v23  ;;  %v2713_v39 = vld [vmem:[%s3545_s17 + $0x38] sm:$0xf0]  ;;  %649 = vmatpush.bf16.msra.mxu2 %v2728_v27  ;;  %v2712_v40 = vor.u32 %v2930_v37, %v2711_v34  ;;  %v2687_v41 = vld [vmem:[%s3545_s17] sm:$0xf]  ;;  %v2925_v42 = vld [vmem:[%s3545_s17 + $0xc] sm:$0xf0] }
  0x5f   : > { %v2923_v43 = vld [vmem:[%s3545_s17 + $0x4] sm:$0xf]  ;;  %678 = vmatpush.bf16.msra.mxu3 %v2732_v28  ;;  %v2716_v44 = vor.u32 %v2928_v38, %v2713_v39  ;;  %v2689_v45 = vld [vmem:[%s3545_s17 + $0x10] sm:$0xf0]  ;;  %v2695_v46 = vld [vmem:[%s3545_s17 + $0x8] sm:$0xf]  ;;  %v2688_v50 = vor.u32 %v2925_v42, %v2687_v41 }
  0x60   : > { %v2926_v47 = vld [vmem:[%s3545_s17 + $0x14] sm:$0xf0]  ;;  %v2924_v48 = vld [vmem:[%s3545_s17 + $0xc] sm:$0xf]  ;;  %v2697_v49 = vld [vmem:[%s3545_s17 + $0x18] sm:$0xf0]  ;;  %v2692_v51 = vor.u32 %v2923_v43, %v2689_v45 }
  0x61   : > { %592 = vmatpush.bf16.msra.mxu0 %v2704_v35  ;;  %v2696_v52 = vor.u32 %v2926_v47, %v2695_v46  ;;  %v2700_v53 = vor.u32 %v2924_v48, %v2697_v49  ;;  %v429_v54 = vld [vmem:[%s4718_s6 + $0x20] sm:$0xff]  ;;  %v430_v57 = vld [vmem:[%s4718_s6 + $0x28] sm:$0xff]  ;;  %v2941_v60 = vld [vmem:[%s4719_s1 + $0x10] sm:$0xff]  ;;  %s4720_s2 = sld [smem:[#allocation25_spill]]  ;;  %vm921_vm2 = vcmask 130048   ;;  %s2893_s12 = sshll.u32 %s3322_s15, 9 }
  0x62   : > { %621 = vmatpush.bf16.msra.mxu1 %v2708_v36  ;;  %650 = vmatpush.bf16.msra.mxu2 %v2712_v40  ;;  %v2939_v55 = vld [vmem:[%s4719_s1] sm:$0xff]  ;;  %v885_v58 = vld [vmem:[%s4674_s7 + $0x8] sm:$0xff]  ;;  %v431_v61 = vld [vmem:[%s4718_s6 + $0x30] sm:$0xff]  ;;  %s4721_s8 = sld [smem:[#allocation26_spill]]  ;;  %s1937_s24 = sshra.s32 %s2893_s12, 7  ;;  %vm1912_vm7 = vcmask 7168  }
  0x63   : > { %679 = vmatpush.bf16.msra.mxu3 %v2716_v44  ;;  %v884_v56 = vld [vmem:[%s4674_s7] sm:$0xff]  ;;  %v2940_v59 = vld [vmem:[%s4719_s1 + $0x8] sm:$0xff]  ;;  %v432_v62 = vld [vmem:[%s4718_s6 + $0x38] sm:$0xff]  ;;  %s2894_s4 = sshll.u32 %s1937_s24, 2 }
  0x64   : > { %811 = vperm.xlu2 %3105, %v428_v29   ;;  %747 = vperm.xlu1 %3104, %v428_v29   ;;  %v2776_v63 = vld [vmem:[%s4674_s7 + $0x18] sm:$0xff]  ;;  %v2775_v0 = vld [vmem:[%s4674_s7 + $0x10] sm:$0xff]  ;;  %v2787_v1 = vld [vmem:[%s4674_s7 + $0x20] sm:$0xff]  ;;  %s4122_s9 = scalar_lea.vmem [#allocation2], %s2894_s4 }
  0x65   : > { %450 = vperm.xlu0 %3103, %v428_v29   ;;  %593 = vmatpush.bf16.msra.mxu0 %v2688_v50  ;;  %v426_v2 = vld [vmem:[%s4718_s6 + $0x8] sm:$0xff]  ;;  %v425_v10 = vld [vmem:[%s4718_s6] sm:$0xff] }
  0x66   : > { %622 = vmatpush.bf16.msra.mxu1 %v2692_v51  ;;  %651 = vmatpush.bf16.msra.mxu2 %v2696_v52  ;;  %v2788_v6 = vld [vmem:[%s4674_s7 + $0x28] sm:$0xff] }
  0x67   : > { %680 = vmatpush.bf16.msra.mxu3 %v2700_v53 }
  0x68   : > { %2749 = vmatmul.msk.bf16.vlgmr.msra.gmra.mxu0 %vm573_vm1, %v2939_v55 }
  0x69   : > { %2753 = vmatmul.msk.bf16.vlgmr.msra.gmra.mxu1 %vm573_vm1, %v2939_v55  ;;  %2757 = vmatmul.msk.bf16.vlgmr.msra.gmra.mxu2 %vm573_vm1, %v2939_v55 }
  0x6a   : > { %2761 = vmatmul.msk.bf16.vlgmr.msra.gmra.mxu3 %vm573_vm1, %v2939_v55 }
  0x6c   : > { %3107 = vset.pattern.permute.xlu2 %v3354_v8  ;;  %3106 = vset.pattern.permute.xlu1 %v3354_v8 }
  0x6d   : > { %455 = vperm.xlu0 %3103, %v429_v54   ;;  %888 = vperm.xlu2 %3107, %v884_v56  }
  0x6e   : > { %460 = vperm.xlu1 %3106, %v430_v57  }
  0x75   : > { %893 = vperm.xlu0 %3103, %v885_v58   ;;  %3109 = vset.pattern.permute.xlu2 %v3353_v4 }
  0x76   : > { %3108 = vset.pattern.permute.xlu1 %v3353_v4  ;;  %755 = vperm.xlu2 %3109, %v430_v57  }
  0x77   : > { %751 = vperm.xlu1 %3108, %v429_v54  }
  0x78   : > { %2750 = vmatmul.msk.bf16.gmra.mxu0 %vm573_vm1, %v2940_v59 }
  0x79   : > { %2754 = vmatmul.msk.bf16.gmra.mxu1 %vm573_vm1, %v2940_v59  ;;  %2758 = vmatmul.msk.bf16.gmra.mxu2 %vm573_vm1, %v2940_v59 }
  0x7a   : > { %2762 = vmatmul.msk.bf16.gmra.mxu3 %vm573_vm1, %v2940_v59 }
  0x7d   : > { %3110 = vset.pattern.permute.xlu0 %v3353_v4 }
  0x7e   : > { %990 = vperm.xlu0 %3110, %v884_v56   ;;  %3111 = vset.pattern.permute.xlu2 %v3352_v3 }
  0x7f   : > { %994 = vperm.xlu1 %3108, %v885_v58   ;;  %815 = vperm.xlu2 %3111, %v429_v54  }
  0x86   : > { %3113 = vset.pattern.permute.xlu0 %v3352_v3 }
  0x87   : > { %3112 = vset.pattern.permute.xlu1 %v3352_v3  ;;  %1010 = vperm.xlu0 %3113, %v885_v58  }
  0x88   : > { %1006 = vperm.xlu2 %3111, %v884_v56   ;;  %819 = vperm.xlu1 %3112, %v430_v57  }
  0x89   : > { %2751 = vmatmul.msk.bf16.gmra.mxu0 %vm573_vm1, %v2941_v60  ;;  %2755 = vmatmul.msk.bf16.gmra.mxu1 %vm573_vm1, %v2941_v60 }
  0x8a   : > { %2759 = vmatmul.msk.bf16.gmra.mxu2 %vm573_vm1, %v2941_v60  ;;  %2763 = vmatmul.msk.bf16.gmra.mxu3 %vm573_vm1, %v2941_v60 }
  0x8f   : > { %3116 = vset.pattern.permute.xlu0 %v3353_v4 }
  0x90   : > { %3115 = vset.pattern.permute.xlu2 %v3354_v8  ;;  %3114 = vset.pattern.permute.xlu1 %v3354_v8 }
  0x91   : > { %759 = vperm.xlu0 %3116, %v431_v61   ;;  %470 = vperm.xlu2 %3115, %v432_v62  }
  0x92   : > { %465 = vperm.xlu1 %3114, %v431_v61  }
  0x99   : > { %3120 = vset.pattern.permute.xlu0 %v3352_v3  ;;  %1070 = vperm.xlu2 %3115, %v2776_v63  }
  0x9a   : > { %1065 = vperm.xlu1 %3114, %v2775_v0   ;;  %827 = vperm.xlu0 %3120, %v432_v62  }
  0xa1   : > { %3118 = vset.pattern.permute.xlu2 %v3353_v4 }
  0xa2   : > { %3117 = vset.pattern.permute.xlu1 %v3353_v4  ;;  %3124 = vset.pattern.permute.xlu0 %v3353_v4 }
  0xa3   : > { %1146 = vperm.xlu2 %3118, %v2775_v0   ;;  %763 = vperm.xlu1 %3117, %v432_v62  }
  0xa4   : > { %1302 = vperm.xlu0 %3124, %v2787_v1  }
  0xab   : > { %3119 = vset.pattern.permute.xlu2 %v3352_v3  ;;  %1150 = vperm.xlu1 %3117, %v2776_v63  }
  0xac   : > { %3129 = vset.pattern.permute.xlu0 %v3354_v8  ;;  %823 = vperm.xlu2 %3119, %v431_v61  }
  0xad   : > { %440 = vperm.xlu0 %3129, %v426_v2  }
  0xb3   : > { %3121 = vset.pattern.permute.xlu1 %v3352_v3 }
  0xb4   : > { %1166 = vperm.xlu2 %3119, %v2776_v63   ;;  %1162 = vperm.xlu1 %3121, %v2775_v0  }
  0xb6   : > { %v3668_v5 = vpop.permute.xlu2 %807 }
  0xbc   : > { %3123 = vset.pattern.permute.xlu2 %v3354_v8  ;;  %3122 = vset.pattern.permute.xlu1 %v3354_v8 }
  0xbd   : > { %1226 = vperm.xlu2 %3123, %v2788_v6   ;;  %1221 = vperm.xlu1 %3122, %v2787_v1  }
  0xbe   : > { %v3675_v7 = vpop.permute.xlu2 %811 }
  0xc5   : > { %3126 = vset.pattern.permute.xlu2 %v3352_v3  ;;  %3125 = vset.pattern.permute.xlu1 %v3353_v4 }
  0xc6   : > { %1318 = vperm.xlu2 %3126, %v2787_v1   ;;  %1306 = vperm.xlu1 %3125, %v2788_v6  }
  0xc7   : > { %v3679_v9 = vpop.permute.xlu2 %888 }
  0xce   : > { %v3684_v11 = vpop.permute.xlu1 %743  ;;  %3128 = vset.pattern.permute.xlu2 %v3354_v8  ;;  %3127 = vset.pattern.permute.xlu1 %v3352_v3 }
  0xcf   : > { %1322 = vperm.xlu1 %3127, %v2788_v6   ;;  %435 = vperm.xlu2 %3128, %v425_v10   ;;  %v446_v13 = vpop.permute.xlu0 %445 }
  0xd0   : > { %v3688_v12 = vpop.permute.xlu2 %755 }
  0xd6   : > { %v3690_v14 = vpop.permute.xlu1 %747 }
  0xd7   : > { %3130 = vset.pattern.permute.xlu1 %v3353_v4  ;;  %3131 = vset.pattern.permute.xlu2 %v3353_v4  ;;  %v3696_v16 = vpop.permute.xlu0 %450  ;;  %v2942_v4 = vld [vmem:[%s4719_s1 + $0x18] sm:$0xff] }
  0xd8   : > { %735 = vperm.xlu1 %3130, %v425_v10   ;;  %739 = vperm.xlu2 %3131, %v426_v2  }
  0xd9   : > { %v3694_v15 = vpop.permute.xlu2 %815  ;;  %2752 = vmatmul.msk.bf16.gmra.mxu0 %vm573_vm1, %v2942_v4  ;;  %2756 = vmatmul.msk.bf16.gmra.mxu1 %vm573_vm1, %v2942_v4 }
  0xda   : > { %2760 = vmatmul.msk.bf16.gmra.mxu2 %vm573_vm1, %v2942_v4  ;;  %2764 = vmatmul.msk.bf16.gmra.mxu3 %vm573_vm1, %v2942_v4 }
  0xdf   : > { %v3711_v18 = vpop.permute.xlu0 %455 }
  0xe0   : > { %3132 = vset.pattern.permute.xlu1 %v3352_v3  ;;  %3133 = vset.pattern.permute.xlu2 %v3352_v3  ;;  %v3700_v8 = vpop.permute.xlu1 %460 }
  0xe1   : > { %799 = vperm.xlu1 %3132, %v425_v10   ;;  %803 = vperm.xlu2 %3133, %v426_v2  }
  0xe2   : > { %v3702_v17 = vpop.permute.xlu2 %1006 }
  0xe5   : > { %v3713_v3 = vpop.f32.mrf.mxu0 }
  0xe6   : > { %v3715_v19 = vpop.f32.mrf.mxu1 }
  0xe7   : > { %v3731_v27 = vpop.permute.xlu0 %893 }
  0xe9   : > { %v3717_v20 = vpop.permute.xlu1 %751 }
  0xeb   : > { %v3719_v21 = vpop.permute.xlu2 %470 }
  0xec   : > { %v3721_v22 = vpop.f32.mrf.mxu2 }
  0xed   : > { %v3723_v23 = vpop.f32.mrf.mxu3  ;;  %v3725_v24 = vpop.f32.mrf.mxu0 }
  0xee   : > { %v3727_v25 = vpop.f32.mrf.mxu1 }
  0xf0   : > { %v3741_v38 = vpop.permute.xlu0 %990 }
  0xf1   : > { %v3729_v26 = vpop.permute.xlu1 %994 }
  0xf3   : > { %v3733_v28 = vpop.permute.xlu2 %1070 }
  0xf4   : > { %v3735_v29 = vpop.f32.mrf.mxu2 }
  0xf5   : > { %v3737_v30 = vpop.f32.mrf.mxu3  ;;  %v600_v31 = vpop.f32.mrf.mxu0 }
  0xf6   : > { %v629_v32 = vpop.f32.mrf.mxu1  ;;  %v601_v33 = vadd.f32 %v600_v31, %v446_v13 }
  0xf7   : > { %v630_v34 = vadd.f32 %v629_v32, %v446_v13 }
  0xf8   : > { %v710_v36 = vmax.f32 %v601_v33, 0.0 }
  0xf9   : > { %v711_v37 = vmax.f32 %v630_v34, 0.0  ;;  %v3759_v62 = vpop.permute.xlu0 %1010 }
  0xfa   : > { %v3739_v35 = vpop.permute.xlu1 %819  ;;  %v774_v40 = vmul.f32 %v3684_v11, %v710_v36 }
  0xfb   : > { %v775_v41 = vmul.f32 %v3684_v11, %v711_v37 }
  0xfc   : > { %v658_v42 = vpop.f32.mrf.mxu2  ;;  %v838_v50 = vadd.f32 %v3668_v5, %v774_v40 }
  0xfd   : > { %v3743_v39 = vpop.permute.xlu2 %1146  ;;  %v687_v43 = vpop.f32.mrf.mxu3  ;;  %v659_v44 = vadd.f32 %v658_v42, %v446_v13  ;;  %v839_v51 = vadd.f32 %v3668_v5, %v775_v41 }
  0xfe   : > { %v688_v45 = vadd.f32 %v687_v43, %v446_v13  ;;  %v602_v46 = vpop.f32.mrf.mxu0  ;;  %v631_v47 = vpop.f32.mrf.mxu1 }
  0xff   : > { %v603_v48 = vadd.f32 %v602_v46, %v3696_v16  ;;  %v632_v49 = vadd.f32 %v631_v47, %v3696_v16  ;;  %v712_v52 = vmax.f32 %v659_v44, 0.0  ;;  %v866_v63 = vpack.c.bf16 %v839_v51, %v838_v50 }
 0x100   : > { %v713_v53 = vmax.f32 %v688_v45, 0.0 }
 0x101   : > { %v714_v54 = vmax.f32 %v603_v48, 0.0  ;;  %v715_v55 = vmax.f32 %v632_v49, 0.0  ;;  %v776_v57 = vmul.f32 %v3684_v11, %v712_v52  ;;  %v905_v41 = vunpack.c.l.b16 %v866_v63 }
 0x102   : > { %v777_v58 = vmul.f32 %v3684_v11, %v713_v53  ;;  %v906_v42 = vunpack.c.h.b16 %v866_v63 }
 0x103   : > { %v778_v59 = vmul.f32 %v3690_v14, %v714_v54  ;;  %v779_v60 = vmul.f32 %v3690_v14, %v715_v55  ;;  %v840_v10 = vadd.f32 %v3668_v5, %v776_v57  ;;  %v2943_v57 = vld [vmem:[%s4720_s2] sm:$0xff] }
 0x104   : > { %v3751_v56 = vpop.permute.xlu1 %465  ;;  %v660_v2 = vpop.f32.mrf.mxu2  ;;  %v841_v13 = vadd.f32 %v3668_v5, %v777_v58 }
 0x105   : > { %v842_v0 = vadd.f32 %v3675_v7, %v778_v59  ;;  %v843_v1 = vadd.f32 %v3675_v7, %v779_v60  ;;  %v689_v6 = vpop.f32.mrf.mxu3  ;;  %v661_v11 = vadd.f32 %v660_v2, %v3696_v16 }
 0x106   : > { %v3757_v61 = vpop.permute.xlu2 %823  ;;  %v690_v4 = vadd.f32 %v689_v6, %v3696_v16  ;;  %v605_v31 = vpop.f32.mrf.mxu0  ;;  %v867_v48 = vpack.c.bf16 %v841_v13, %v840_v10 }
 0x107   : > { %v634_v32 = vpop.f32.mrf.mxu1  ;;  %v606_v33 = vadd.f32 %v605_v31, %v3711_v18  ;;  %v868_v36 = vpack.c.bf16 %v843_v1, %v842_v0  ;;  %v716_v37 = vmax.f32 %v661_v11, 0.0  ;;  %v3788_v10 = vpop.permute.xlu0 %759 }
 0x108   : > { %v635_v34 = vadd.f32 %v634_v32, %v3711_v18  ;;  %v717_v40 = vmax.f32 %v690_v4, 0.0  ;;  %v908_v6 = vunpack.c.h.b16 %v867_v48 }
 0x109   : > { %v718_v43 = vmax.f32 %v606_v33, 0.0  ;;  %v909_v5 = vunpack.c.l.b16 %v868_v36  ;;  %v910_v46 = vunpack.c.h.b16 %v868_v36  ;;  %v780_v47 = vmul.f32 %v3690_v14, %v716_v37 }
 0x10a   : > { %v719_v44 = vmax.f32 %v635_v34, 0.0  ;;  %v781_v16 = vmul.f32 %v3690_v14, %v717_v40 }
 0x10b   : > { %v782_v49 = vmul.f32 %v3717_v20, %v718_v43  ;;  %v913_v52 = vpack.c.b16 %v909_v5, %v905_v41  ;;  %v914_v53 = vpack.c.b16 %v910_v46, %v906_v42  ;;  %v844_v54 = vadd.f32 %v3675_v7, %v780_v47 }
 0x10c   : > { %v3769_v45 = vpop.permute.xlu1 %1065  ;;  %v783_v50 = vmul.f32 %v3717_v20, %v719_v44  ;;  %v845_v55 = vadd.f32 %v3675_v7, %v781_v16  ;;  %v907_v7 = vunpack.c.l.b16 %v867_v48 }
 0x10d   : > { %v846_v58 = vadd.f32 %v3694_v15, %v782_v49  ;;  %v663_v59 = vpop.f32.mrf.mxu2  ;;  %v692_v60 = vpop.f32.mrf.mxu3  ;;  %932 = vmatpush.bf16.msrb.mxu0 %v913_v52  ;;  %946 = vmatpush.bf16.msrb.mxu1 %v914_v53 }
 0x10e   : > { %v3775_v51 = vpop.permute.xlu2 %1166  ;;  %v847_v14 = vadd.f32 %v3694_v15, %v783_v50  ;;  %v664_v63 = vadd.f32 %v663_v59, %v3711_v18  ;;  %v693_v0 = vadd.f32 %v692_v60, %v3711_v18  ;;  %v869_v1 = vpack.c.bf16 %v845_v55, %v844_v54 }
 0x10f   : > { %v3804_v43 = vpop.permute.xlu0 %827 }
 0x110   : > { %v3786_v2 = vpack.c.bf16 %v847_v14, %v846_v58  ;;  %v720_v13 = vmax.f32 %v664_v63, 0.0  ;;  %v721_v11 = vmax.f32 %v693_v0, 0.0  ;;  %2769 = vmatmul.msk.bf16.vlgmr.msrb.gmra.mxu0 %vm921_vm2, %v2943_v57  ;;  %2770 = vmatmul.msk.bf16.vlgmr.msrb.gmra.mxu1 %vm921_vm2, %v2943_v57  ;;  %v911_v4 = vunpack.c.l.b16 %v869_v1 }
 0x111   : > { %v912_v31 = vunpack.c.h.b16 %v869_v1 }
 0x112   : > { %v784_v32 = vmul.f32 %v3717_v20, %v720_v13  ;;  %v785_v33 = vmul.f32 %v3717_v20, %v721_v11  ;;  %v915_v18 = vpack.c.b16 %v911_v4, %v907_v7 }
 0x113   : > { %v916_v34 = vpack.c.b16 %v912_v31, %v908_v6 }
 0x114   : > { %v848_v37 = vadd.f32 %v3694_v15, %v784_v32  ;;  %v849_v40 = vadd.f32 %v3694_v15, %v785_v33  ;;  %960 = vmatpush.bf16.msrb.mxu2 %v915_v18 }
 0x115   : > { %v3794_v36 = vpop.permute.xlu1 %763  ;;  %974 = vmatpush.bf16.msrb.mxu3 %v916_v34 }
 0x116   : > { %v3800_v42 = vpack.c.bf16 %v849_v40, %v848_v37 }
 0x117   : > { %v3798_v41 = vpop.permute.xlu2 %1226  ;;  %2771 = vmatmul.msk.bf16.vlgmr.msrb.gmra.mxu2 %vm921_vm2, %v2943_v57  ;;  %v3812_v46 = vpop.permute.xlu0 %1302 }
 0x118   : > { %2772 = vmatmul.msk.bf16.vlgmr.msrb.gmra.mxu3 %vm921_vm2, %v2943_v57 }
 0x11d   : > { %v3806_v20 = vpop.permute.xlu1 %1150 }
 0x11f   : > { %v441_v16 = vpop.permute.xlu0 %440 }
 0x120   : > { %v3808_v44 = vpop.permute.xlu2 %1318  ;;  %v598_v49 = vadd.f32 %v3725_v24, %v441_v16  ;;  %v627_v50 = vadd.f32 %v3727_v25, %v441_v16  ;;  %v656_v52 = vadd.f32 %v3735_v29, %v441_v16  ;;  %v685_v53 = vadd.f32 %v3737_v30, %v441_v16 }
 0x122   : > { %v706_v54 = vmax.f32 %v598_v49, 0.0  ;;  %v707_v55 = vmax.f32 %v627_v50, 0.0  ;;  %v708_v57 = vmax.f32 %v656_v52, 0.0  ;;  %v709_v58 = vmax.f32 %v685_v53, 0.0 }
 0x126   : > { %v3810_v5 = vpop.permute.xlu1 %1162 }
 0x129   : > { %v436_v15 = vpop.permute.xlu2 %435 }
 0x12a   : > { %v596_v4 = vadd.f32 %v3713_v3, %v436_v15  ;;  %v625_v31 = vadd.f32 %v3715_v19, %v436_v15  ;;  %v654_v32 = vadd.f32 %v3721_v22, %v436_v15  ;;  %v683_v33 = vadd.f32 %v3723_v23, %v436_v15  ;;  %v607_v19 = vpop.f32.mrf.mxu0  ;;  %v3828_v22 = vpop.f32.mrf.mxu2 }
 0x12b   : > { %v3830_v23 = vpop.f32.mrf.mxu3 }
 0x12c   : > { %v702_v18 = vmax.f32 %v596_v4, 0.0  ;;  %v703_v34 = vmax.f32 %v625_v31, 0.0  ;;  %v704_v37 = vmax.f32 %v654_v32, 0.0  ;;  %v705_v40 = vmax.f32 %v683_v33, 0.0 }
 0x12f   : > { %v3814_v47 = vpop.permute.xlu1 %1221 }
 0x132   : > { %v740_v48 = vpop.permute.xlu2 %739 }
 0x133   : > { %v770_v59 = vmul.f32 %v740_v48, %v706_v54  ;;  %v771_v60 = vmul.f32 %v740_v48, %v707_v55  ;;  %v772_v63 = vmul.f32 %v740_v48, %v708_v57  ;;  %v773_v0 = vmul.f32 %v740_v48, %v709_v58 }
 0x138   : > { %v3820_v14 = vpop.permute.xlu1 %1306 }
 0x13b   : > { %v804_v1 = vpop.permute.xlu2 %803 }
 0x13c   : > { %v834_v7 = vadd.f32 %v804_v1, %v770_v59  ;;  %v835_v6 = vadd.f32 %v804_v1, %v771_v60  ;;  %v836_v24 = vadd.f32 %v804_v1, %v772_v63  ;;  %v837_v13 = vadd.f32 %v804_v1, %v773_v0  ;;  %v636_v59 = vpop.f32.mrf.mxu1 }
 0x13e   : > { %v864_v25 = vpack.c.bf16 %v835_v6, %v834_v7  ;;  %v865_v11 = vpack.c.bf16 %v837_v13, %v836_v24 }
 0x140   : > { %880 = vst [vmem:[#allocation3 + $0x10] sm:$0xff] %v864_v25 }
 0x141   : > { %881 = vst [vmem:[#allocation3 + $0x18] sm:$0xff] %v865_v11  ;;  %v3822_v29 = vpop.permute.xlu1 %1322 }
 0x14a   : > { %v736_v30 = vpop.permute.xlu1 %735 }
 0x14b   : > { %v766_v16 = vmul.f32 %v736_v30, %v702_v18  ;;  %v767_v48 = vmul.f32 %v736_v30, %v703_v34  ;;  %v768_v49 = vmul.f32 %v736_v30, %v704_v37  ;;  %v769_v50 = vmul.f32 %v736_v30, %v705_v40 }
 0x153   : > { %v800_v52 = vpop.permute.xlu1 %799 }
 0x154   : > { %v830_v53 = vadd.f32 %v800_v52, %v766_v16  ;;  %v831_v54 = vadd.f32 %v800_v52, %v767_v48  ;;  %v832_v55 = vadd.f32 %v800_v52, %v768_v49  ;;  %v833_v57 = vadd.f32 %v800_v52, %v769_v50 }
 0x156   : > { %v862_v3 = vpack.c.bf16 %v831_v54, %v830_v53  ;;  %v863_v58 = vpack.c.bf16 %v833_v57, %v832_v55  ;;  %v610_v15 = vpop.f32.mrf.mxu0  ;;  %v639_v60 = vpop.f32.mrf.mxu1 }
 0x157   : > { %v611_v63 = vadd.f32 %v610_v15, %v3751_v56  ;;  %v640_v0 = vadd.f32 %v639_v60, %v3751_v56 }
 0x158   : > { %878 = vst [vmem:[#allocation3] sm:$0xff] %v862_v3 }
 0x159   : > { %879 = vst [vmem:[#allocation3 + $0x8] sm:$0xff] %v863_v58  ;;  %v726_v1 = vmax.f32 %v611_v63, 0.0  ;;  %v727_v7 = vmax.f32 %v640_v0, 0.0 }
 0x15b   : > { %v790_v6 = vmul.f32 %v3788_v10, %v726_v1  ;;  %v791_v24 = vmul.f32 %v3788_v10, %v727_v7 }
 0x15d   : > { %v854_v13 = vadd.f32 %v3757_v61, %v790_v6  ;;  %v855_v25 = vadd.f32 %v3757_v61, %v791_v24  ;;  %v668_v11 = vpop.f32.mrf.mxu2  ;;  %v697_v30 = vpop.f32.mrf.mxu3 }
 0x15e   : > { %v612_v4 = vpop.f32.mrf.mxu0  ;;  %v641_v31 = vpop.f32.mrf.mxu1  ;;  %v669_v32 = vadd.f32 %v668_v11, %v3751_v56  ;;  %v698_v33 = vadd.f32 %v697_v30, %v3751_v56  ;;  %v608_v11 = vadd.f32 %v607_v19, %v3700_v8  ;;  %v637_v30 = vadd.f32 %v636_v59, %v3700_v8 }
 0x15f   : > { %v3840_v18 = vpack.c.bf16 %v855_v25, %v854_v13  ;;  %v613_v34 = vadd.f32 %v612_v4, %v3719_v21  ;;  %v642_v37 = vadd.f32 %v641_v31, %v3719_v21 }
 0x160   : > { %v728_v40 = vmax.f32 %v669_v32, 0.0  ;;  %v729_v16 = vmax.f32 %v698_v33, 0.0  ;;  %v722_v33 = vmax.f32 %v608_v11, 0.0 }
 0x161   : > { %v730_v48 = vmax.f32 %v613_v34, 0.0  ;;  %v731_v49 = vmax.f32 %v642_v37, 0.0  ;;  %v723_v34 = vmax.f32 %v637_v30, 0.0 }
 0x162   : > { %v792_v50 = vmul.f32 %v3788_v10, %v728_v40  ;;  %v793_v52 = vmul.f32 %v3788_v10, %v729_v16  ;;  %v786_v16 = vmul.f32 %v3688_v12, %v722_v33  ;;  %v1030_v33 = vunpack.c.h.bf16 %v3786_v2 }
 0x163   : > { %v794_v53 = vmul.f32 %v3794_v36, %v730_v48  ;;  %v795_v54 = vmul.f32 %v3794_v36, %v731_v49  ;;  %v787_v19 = vmul.f32 %v3688_v12, %v723_v34 }
 0x164   : > { %v856_v56 = vadd.f32 %v3757_v61, %v792_v50  ;;  %v857_v55 = vadd.f32 %v3757_v61, %v793_v52 }
 0x165   : > { %v858_v57 = vadd.f32 %v3804_v43, %v794_v53  ;;  %v859_v3 = vadd.f32 %v3804_v43, %v795_v54  ;;  %v670_v58 = vpop.f32.mrf.mxu2  ;;  %v699_v15 = vpop.f32.mrf.mxu3 }
 0x166   : > { %v3852_v60 = vpack.c.bf16 %v857_v55, %v856_v56  ;;  %v671_v63 = vadd.f32 %v670_v58, %v3719_v21  ;;  %v700_v10 = vadd.f32 %v699_v15, %v3719_v21  ;;  %v850_v56 = vadd.f32 %v3739_v35, %v786_v16 }
 0x167   : > { %v3856_v0 = vpack.c.bf16 %v859_v3, %v858_v57  ;;  %v851_v55 = vadd.f32 %v3739_v35, %v787_v19  ;;  %v666_v58 = vadd.f32 %v3828_v22, %v3700_v8  ;;  %v695_v15 = vadd.f32 %v3830_v23, %v3700_v8 }
 0x168   : > { %v732_v1 = vmax.f32 %v671_v63, 0.0  ;;  %v733_v7 = vmax.f32 %v700_v10, 0.0 }
 0x169   : > { %v724_v30 = vmax.f32 %v666_v58, 0.0  ;;  %v725_v22 = vmax.f32 %v695_v15, 0.0 }
 0x16a   : > { %v796_v6 = vmul.f32 %v3794_v36, %v732_v1  ;;  %v797_v61 = vmul.f32 %v3794_v36, %v733_v7 }
 0x16b   : > { %v788_v16 = vmul.f32 %v3688_v12, %v724_v30  ;;  %v789_v19 = vmul.f32 %v3688_v12, %v725_v22 }
 0x16c   : > { %v860_v24 = vadd.f32 %v3804_v43, %v796_v6  ;;  %v861_v13 = vadd.f32 %v3804_v43, %v797_v61 }
 0x16d   : > { %v852_v58 = vadd.f32 %v3739_v35, %v788_v16  ;;  %v853_v12 = vadd.f32 %v3739_v35, %v789_v19 }
 0x16e   : > { %v3862_v25 = vpack.c.bf16 %v861_v13, %v860_v24  ;;  %v872_v24 = vpack.c.bf16 %v851_v55, %v850_v56 }
 0x18d   : > { %v934_v4 = vpop.f32.mrf.mxu0  ;;  %v948_v21 = vpop.f32.mrf.mxu1 }
 0x18e   : > { %v935_v31 = vadd.f32 %v934_v4, %v3679_v9  ;;  %v949_v32 = vadd.f32 %v948_v21, %v3679_v9 }
 0x190   : > { %v981_v37 = vmax.f32 %v935_v31, 0.0  ;;  %v982_v36 = vmax.f32 %v949_v32, 0.0  ;;  %v1029_v32 = vunpack.c.l.bf16 %v3786_v2 }
 0x192   : > { %v997_v40 = vmul.f32 %v3741_v38, %v981_v37  ;;  %v998_v43 = vmul.f32 %v3741_v38, %v982_v36  ;;  %v1033_v37 = vunpack.c.l.bf16 %v872_v24  ;;  %v1034_v36 = vunpack.c.h.bf16 %v872_v24 }
 0x194   : > { %v1013_v59 = vadd.f32 %v3702_v17, %v997_v40  ;;  %v1014_v48 = vadd.f32 %v3702_v17, %v998_v43 }
 0x195   : > { %v936_v49 = vpop.f32.mrf.mxu0  ;;  %v950_v50 = vpop.f32.mrf.mxu1 }
 0x196   : > { %v1021_v52 = vpack.c.bf16 %v1014_v48, %v1013_v59  ;;  %v937_v53 = vadd.f32 %v936_v49, %v3731_v27  ;;  %v951_v54 = vadd.f32 %v950_v50, %v3731_v27 }
 0x198   : > { %1025 = vst [vmem:[#allocation3 + $0x20] sm:$0xff] %v1021_v52  ;;  %v985_v57 = vmax.f32 %v937_v53, 0.0  ;;  %v986_v3 = vmax.f32 %v951_v54, 0.0  ;;  %v1037_v23 = vunpack.c.l.bf16 %v1021_v52  ;;  %v1038_v31 = vunpack.c.h.bf16 %v1021_v52 }
 0x19a   : > { %v1001_v63 = vmul.f32 %v3729_v26, %v985_v57  ;;  %v1002_v10 = vmul.f32 %v3729_v26, %v986_v3  ;;  %v962_v1 = vpop.f32.mrf.mxu2  ;;  %v1045_v2 = vadd.f32 %v1037_v23, %v1029_v32  ;;  %v1046_v53 = vadd.f32 %v1038_v31, %v1030_v33 }
 0x19b   : > { %v976_v7 = vpop.f32.mrf.mxu3  ;;  %v963_v6 = vadd.f32 %v962_v1, %v3679_v9 }
 0x19c   : > { %v977_v61 = vadd.f32 %v976_v7, %v3679_v9  ;;  %v1017_v13 = vadd.f32 %v3759_v62, %v1001_v63  ;;  %v1018_v11 = vadd.f32 %v3759_v62, %v1002_v10  ;;  %v2944_v63 = vld [vmem:[%s4720_s2 + $0x8] sm:$0xff] }
 0x19d   : > { %v983_v4 = vmax.f32 %v963_v6, 0.0 }
 0x19e   : > { %v984_v21 = vmax.f32 %v977_v61, 0.0  ;;  %v1023_v8 = vpack.c.bf16 %v1018_v11, %v1017_v13  ;;  %v1031_v13 = vunpack.c.l.bf16 %v3800_v42  ;;  %v1032_v11 = vunpack.c.h.bf16 %v3800_v42 }
 0x19f   : > { %v999_v34 = vmul.f32 %v3741_v38, %v983_v4 }
 0x1a0   : > { %v1000_v9 = vmul.f32 %v3741_v38, %v984_v21  ;;  %1027 = vst [vmem:[#allocation3 + $0x30] sm:$0xff] %v1023_v8  ;;  %v1041_v40 = vunpack.c.l.bf16 %v1023_v8  ;;  %v1042_v43 = vunpack.c.h.bf16 %v1023_v8 }
 0x1a1   : > { %v1015_v59 = vadd.f32 %v3702_v17, %v999_v34 }
 0x1a2   : > { %v1016_v48 = vadd.f32 %v3702_v17, %v1000_v9  ;;  %v964_v49 = vpop.f32.mrf.mxu2  ;;  %v1049_v52 = vadd.f32 %v1041_v40, %v1033_v37  ;;  %v1050_v54 = vadd.f32 %v1042_v43, %v1034_v36 }
 0x1a3   : > { %v978_v50 = vpop.f32.mrf.mxu3  ;;  %v965_v56 = vadd.f32 %v964_v49, %v3731_v27 }
 0x1a4   : > { %v1022_v38 = vpack.c.bf16 %v1016_v48, %v1015_v59  ;;  %v979_v55 = vadd.f32 %v978_v50, %v3731_v27  ;;  %v1053_v57 = vpack.c.bf16 %v1049_v52, %v1045_v2  ;;  %v1054_v3 = vpack.c.bf16 %v1050_v54, %v1046_v53 }
 0x1a5   : > { %v987_v15 = vmax.f32 %v965_v56, 0.0  ;;  %v873_v27 = vpack.c.bf16 %v853_v12, %v852_v58  ;;  %v1185_v12 = vunpack.c.l.bf16 %v3840_v18 }
 0x1a6   : > { %1026 = vst [vmem:[#allocation3 + $0x28] sm:$0xff] %v1022_v38  ;;  %v988_v17 = vmax.f32 %v979_v55, 0.0  ;;  %1088 = vmatpush.bf16.msra.mxu0 %v1053_v57  ;;  %1102 = vmatpush.bf16.msra.mxu1 %v1054_v3  ;;  %v1039_v61 = vunpack.c.l.bf16 %v1022_v38  ;;  %v1040_v24 = vunpack.c.h.bf16 %v1022_v38 }
 0x1a7   : > { %v1003_v10 = vmul.f32 %v3729_v26, %v987_v15  ;;  %v1035_v30 = vunpack.c.l.bf16 %v873_v27  ;;  %v1036_v22 = vunpack.c.h.bf16 %v873_v27  ;;  %v1186_v15 = vunpack.c.h.bf16 %v3840_v18 }
 0x1a8   : > { %v1004_v1 = vmul.f32 %v3729_v26, %v988_v17  ;;  %v1047_v21 = vadd.f32 %v1039_v61, %v1031_v13  ;;  %v1048_v23 = vadd.f32 %v1040_v24, %v1032_v11  ;;  %v1189_v17 = vunpack.c.l.bf16 %v3856_v0 }
 0x1a9   : > { %v1019_v7 = vadd.f32 %v3759_v62, %v1003_v10  ;;  %2781 = vmatmul.msk.bf16.vlgmr.msra.gmra.mxu0 %vm921_vm2, %v2944_v63  ;;  %2782 = vmatmul.msk.bf16.vlgmr.msra.gmra.mxu1 %vm921_vm2, %v2944_v63 }
 0x1aa   : > { %v1020_v6 = vadd.f32 %v3759_v62, %v1004_v1 }
 0x1ac   : > { %v1024_v35 = vpack.c.bf16 %v1020_v6, %v1019_v7 }
 0x1ae   : > { %1028 = vst [vmem:[#allocation3 + $0x38] sm:$0xff] %v1024_v35  ;;  %v1043_v26 = vunpack.c.l.bf16 %v1024_v35  ;;  %v1044_v4 = vunpack.c.h.bf16 %v1024_v35 }
 0x1b0   : > { %v1051_v8 = vadd.f32 %v1043_v26, %v1035_v30  ;;  %v1052_v62 = vadd.f32 %v1044_v4, %v1036_v22 }
 0x1b2   : > { %v1055_v31 = vpack.c.bf16 %v1051_v8, %v1047_v21  ;;  %v1056_v32 = vpack.c.bf16 %v1052_v62, %v1048_v23  ;;  %v2945_v21 = vld [vmem:[%s4720_s2 + $0x10] sm:$0xff] }
 0x1b4   : > { %1116 = vmatpush.bf16.msra.mxu2 %v1055_v31  ;;  %1130 = vmatpush.bf16.msra.mxu3 %v1056_v32 }
 0x1b7   : > { %2783 = vmatmul.msk.bf16.vlgmr.msra.gmra.mxu2 %vm921_vm2, %v2944_v63  ;;  %2784 = vmatmul.msk.bf16.vlgmr.msra.gmra.mxu3 %vm921_vm2, %v2944_v63  ;;  %v1190_v63 = vunpack.c.h.bf16 %v3856_v0 }
 0x226   : > { %v1090_v33 = vpop.f32.mrf.mxu0  ;;  %v1104_v34 = vpop.f32.mrf.mxu1 }
 0x227   : > { %v1091_v42 = vadd.f32 %v1090_v33, %v3769_v45  ;;  %v1105_v9 = vadd.f32 %v1104_v34, %v3769_v45 }
 0x229   : > { %v1137_v37 = vmax.f32 %v1091_v42, 0.0  ;;  %v1138_v36 = vmax.f32 %v1105_v9, 0.0 }
 0x22b   : > { %v1153_v40 = vmul.f32 %v3743_v39, %v1137_v37  ;;  %v1154_v43 = vmul.f32 %v3743_v39, %v1138_v36 }
 0x22d   : > { %v1169_v16 = vadd.f32 %v3810_v5, %v1153_v40  ;;  %v1170_v19 = vadd.f32 %v3810_v5, %v1154_v43 }
 0x22e   : > { %v1092_v59 = vpop.f32.mrf.mxu0  ;;  %v1106_v48 = vpop.f32.mrf.mxu1 }
 0x22f   : > { %v1177_v49 = vpack.c.bf16 %v1170_v19, %v1169_v16  ;;  %v1093_v50 = vadd.f32 %v1092_v59, %v3733_v28  ;;  %v1107_v2 = vadd.f32 %v1106_v48, %v3733_v28  ;;  %v1188_v16 = vunpack.c.h.bf16 %v3852_v60 }
 0x230   : > { %v1191_v19 = vunpack.c.l.bf16 %v3862_v25  ;;  %v1192_v59 = vunpack.c.h.bf16 %v3862_v25  ;;  %v3955_v25 = vld [vmem:[%s4718_s6 + $0x8] sm:$0xff] }
 0x231   : > { %1181 = vst [vmem:[#allocation3 + $0x40] sm:$0xff] %v1177_v49  ;;  %v1141_v52 = vmax.f32 %v1093_v50, 0.0  ;;  %v1142_v53 = vmax.f32 %v1107_v2, 0.0  ;;  %v1193_v3 = vunpack.c.l.bf16 %v1177_v49  ;;  %v1194_v58 = vunpack.c.h.bf16 %v1177_v49 }
 0x233   : > { %v1157_v54 = vmul.f32 %v3806_v20, %v1141_v52  ;;  %v1158_v38 = vmul.f32 %v3806_v20, %v1142_v53  ;;  %v1201_v61 = vadd.f32 %v1193_v3, %v1185_v12  ;;  %v1202_v13 = vadd.f32 %v1194_v58, %v1186_v15  ;;  %v3965_v15 = vld [vmem:[%s4718_s6 + $0x18] sm:$0xff] }
 0x235   : > { %v1173_v56 = vadd.f32 %v3775_v51, %v1157_v54  ;;  %v1174_v55 = vadd.f32 %v3775_v51, %v1158_v38 }
 0x237   : > { %v1179_v57 = vpack.c.bf16 %v1174_v55, %v1173_v56 }
 0x239   : > { %1183 = vst [vmem:[#allocation3 + $0x50] sm:$0xff] %v1179_v57  ;;  %v1197_v27 = vunpack.c.l.bf16 %v1179_v57  ;;  %v1198_v7 = vunpack.c.h.bf16 %v1179_v57 }
 0x23a   : > { %v1118_v10 = vpop.f32.mrf.mxu2  ;;  %v1132_v1 = vpop.f32.mrf.mxu3 }
 0x23b   : > { %v1119_v6 = vadd.f32 %v1118_v10, %v3769_v45  ;;  %v1133_v35 = vadd.f32 %v1132_v1, %v3769_v45  ;;  %v1205_v24 = vadd.f32 %v1197_v27, %v1189_v17  ;;  %v1206_v11 = vadd.f32 %v1198_v7, %v1190_v63 }
 0x23d   : > { %v1139_v30 = vmax.f32 %v1119_v6, 0.0  ;;  %v1140_v22 = vmax.f32 %v1133_v35, 0.0  ;;  %v1209_v18 = vpack.c.bf16 %v1205_v24, %v1201_v61  ;;  %v1210_v26 = vpack.c.bf16 %v1206_v11, %v1202_v13  ;;  %v3977_v11 = vld [vmem:[%s4718_s6 + $0x30] sm:$0xff] }
 0x23f   : > { %v1155_v4 = vmul.f32 %v3743_v39, %v1139_v30  ;;  %v1156_v0 = vmul.f32 %v3743_v39, %v1140_v22  ;;  %1244 = vmatpush.bf16.msrb.mxu0 %v1209_v18  ;;  %1258 = vmatpush.bf16.msrb.mxu1 %v1210_v26  ;;  %v3356_v26 = vmov 4  }
 0x241   : > { %v1171_v45 = vadd.f32 %v3810_v5, %v1155_v4  ;;  %v1172_v8 = vadd.f32 %v3810_v5, %v1156_v0 }
 0x242   : > { %v1120_v23 = vpop.f32.mrf.mxu2  ;;  %v1134_v62 = vpop.f32.mrf.mxu3  ;;  %2793 = vmatmul.msk.bf16.vlgmr.msrb.gmra.mxu0 %vm921_vm2, %v2945_v21  ;;  %2794 = vmatmul.msk.bf16.vlgmr.msrb.gmra.mxu1 %vm921_vm2, %v2945_v21 }
 0x243   : > { %v1178_v31 = vpack.c.bf16 %v1172_v8, %v1171_v45  ;;  %v1121_v32 = vadd.f32 %v1120_v23, %v3733_v28  ;;  %v1135_v33 = vadd.f32 %v1134_v62, %v3733_v28  ;;  %v1187_v28 = vunpack.c.l.bf16 %v3852_v60  ;;  %v3987_v8 = vld [vmem:[%s4718_s6] sm:$0xff] }
 0x244   : > { %v3355_v60 = vmov 3  }
 0x245   : > { %1182 = vst [vmem:[#allocation3 + $0x48] sm:$0xff] %v1178_v31  ;;  %v1143_v39 = vmax.f32 %v1121_v32, 0.0  ;;  %v1144_v34 = vmax.f32 %v1135_v33, 0.0  ;;  %v1195_v40 = vunpack.c.l.bf16 %v1178_v31  ;;  %v1196_v43 = vunpack.c.h.bf16 %v1178_v31  ;;  %3135 = vset.pattern.permute.xlu1 %v3355_v60  ;;  %3134 = vset.pattern.permute.xlu0 %v3355_v60 }
 0x246   : > { %1380 = vperm.xlu1 %3135, %v3955_v25   ;;  %3136 = vset.pattern.permute.xlu2 %v3355_v60  ;;  %v2954_v60 = vld [vmem:[#allocation3 + $0x24] sm:$0xf] }
 0x247   : > { %v1159_v42 = vmul.f32 %v3806_v20, %v1143_v39  ;;  %v1160_v9 = vmul.f32 %v3806_v20, %v1144_v34  ;;  %v1203_v50 = vadd.f32 %v1195_v40, %v1187_v28  ;;  %v1204_v2 = vadd.f32 %v1196_v43, %v1188_v16  ;;  %1375 = vperm.xlu0 %3134, %v3987_v8   ;;  %v2847_v40 = vld [vmem:[#allocation3 + $0x40] sm:$0xf]  ;;  %v2958_v43 = vld [vmem:[#allocation3 + $0x44] sm:$0xf] }
 0x249   : > { %v1175_v5 = vadd.f32 %v3775_v51, %v1159_v42  ;;  %v1176_v37 = vadd.f32 %v3775_v51, %v1160_v9  ;;  %v2960_v9 = vld [vmem:[#allocation3 + $0x4c] sm:$0xf0] }
 0x24a   : > { %v2848_v28 = vor.u32 %v2960_v9, %v2847_v40  ;;  %v2825_v9 = vld [vmem:[#allocation3 + $0x18] sm:$0xf0] }
 0x24b   : > { %v1180_v36 = vpack.c.bf16 %v1176_v37, %v1175_v5  ;;  %v2849_v5 = vld [vmem:[#allocation3 + $0x50] sm:$0xf0] }
 0x24c   : > { %v3995_v37 = vld [vmem:[%s4718_s6 + $0x10] sm:$0xff]  ;;  %v2852_v16 = vor.u32 %v2958_v43, %v2849_v5 }
 0x24d   : > { %1184 = vst [vmem:[#allocation3 + $0x58] sm:$0xff] %v1180_v36  ;;  %v1199_v48 = vunpack.c.l.bf16 %v1180_v36  ;;  %v1200_v49 = vunpack.c.h.bf16 %v1180_v36  ;;  %1385 = vperm.xlu2 %3136, %v3995_v37  }
 0x24e   : > { %1390 = vperm.xlu1 %3135, %v3965_v15  }
 0x24f   : > { %v1207_v20 = vadd.f32 %v1199_v48, %v1191_v19  ;;  %v1208_v52 = vadd.f32 %v1200_v49, %v1192_v59  ;;  %v2956_v48 = vld [vmem:[#allocation3 + $0x2c] sm:$0xf0]  ;;  %v2833_v49 = vld [vmem:[#allocation3 + $0x30] sm:$0xf0] }
 0x251   : > { %v1211_v53 = vpack.c.bf16 %v1207_v20, %v1203_v50  ;;  %v1212_v51 = vpack.c.bf16 %v1208_v52, %v1204_v2 }
 0x253   : > { %1272 = vmatpush.bf16.msrb.mxu2 %v1211_v53  ;;  %1286 = vmatpush.bf16.msrb.mxu3 %v1212_v51  ;;  %v2831_v51 = vld [vmem:[#allocation3 + $0x20] sm:$0xf] }
 0x256   : > { %2795 = vmatmul.msk.bf16.vlgmr.msrb.gmra.mxu2 %vm921_vm2, %v2945_v21  ;;  %2796 = vmatmul.msk.bf16.vlgmr.msrb.gmra.mxu3 %vm921_vm2, %v2945_v21 }
 0x257   : > { %1405 = vperm.xlu1 %3135, %v3977_v11  }
 0x25f   : > { %3138 = vset.pattern.permute.xlu1 %v3356_v26 }
 0x260   : > { %1678 = vperm.xlu1 %3138, %v3955_v25  }
 0x268   : > { %1686 = vperm.xlu1 %3138, %v3965_v15  }
 0x270   : > { %1698 = vperm.xlu1 %3138, %v3977_v11  }
 0x2bf   : > { %v1246_v54 = vpop.f32.mrf.mxu0  ;;  %v1260_v38 = vpop.f32.mrf.mxu1 }
 0x2c0   : > { %v1247_v56 = vadd.f32 %v1246_v54, %v3814_v47  ;;  %v1261_v55 = vadd.f32 %v1260_v38, %v3814_v47  ;;  %v2836_v54 = vor.u32 %v2954_v60, %v2833_v49  ;;  %v2815_v38 = vld [vmem:[#allocation3] sm:$0xf] }
 0x2c2   : > { %v1293_v57 = vmax.f32 %v1247_v56, 0.0  ;;  %v1294_v3 = vmax.f32 %v1261_v55, 0.0 }
 0x2c4   : > { %v1309_v58 = vmul.f32 %v3812_v46, %v1293_v57  ;;  %v1310_v12 = vmul.f32 %v3812_v46, %v1294_v3  ;;  %v2950_v57 = vld [vmem:[#allocation3 + $0x4] sm:$0xf] }
 0x2c5   : > { %v4014_v3 = vld [vmem:[%s4718_s6 + $0x20] sm:$0xff] }
 0x2c6   : > { %v1325_v17 = vadd.f32 %v3808_v44, %v1309_v58  ;;  %v1326_v63 = vadd.f32 %v3808_v44, %v1310_v12  ;;  %v2952_v12 = vld [vmem:[#allocation3 + $0xc] sm:$0xf0]  ;;  %1395 = vperm.xlu2 %3136, %v4014_v3  }
 0x2c7   : > { %v1248_v10 = vpop.f32.mrf.mxu0  ;;  %v1262_v1 = vpop.f32.mrf.mxu1 }
 0x2c8   : > { %v1333_v27 = vpack.c.bf16 %v1326_v63, %v1325_v17  ;;  %v1249_v7 = vadd.f32 %v1248_v10, %v3798_v41  ;;  %v1263_v6 = vadd.f32 %v1262_v1, %v3798_v41  ;;  %v2817_v17 = vld [vmem:[#allocation3 + $0x10] sm:$0xf0]  ;;  %v2816_v63 = vor.u32 %v2952_v12, %v2815_v38 }
 0x2c9   : > { %v2820_v10 = vor.u32 %v2950_v57, %v2817_v17 }
 0x2ca   : > { %1337 = vst [vmem:[#allocation3 + $0x60] sm:$0xff] %v1333_v27  ;;  %v1297_v35 = vmax.f32 %v1249_v7, 0.0  ;;  %v1298_v61 = vmax.f32 %v1263_v6, 0.0  ;;  %v2946_v7 = vld [vmem:[%s4721_s8] sm:$0xff] }
 0x2cc   : > { %v1313_v24 = vmul.f32 %v3820_v14, %v1297_v35  ;;  %v1314_v13 = vmul.f32 %v3820_v14, %v1298_v61 }
 0x2ce   : > { %v1329_v30 = vadd.f32 %v3822_v29, %v1313_v24  ;;  %v1330_v22 = vadd.f32 %v3822_v29, %v1314_v13 }
 0x2d0   : > { %v1335_v18 = vpack.c.bf16 %v1330_v22, %v1329_v30 }
 0x2d1   : > { %v2863_v4 = vld [vmem:[#allocation3 + $0x60] sm:$0xf]  ;;  %v2962_v0 = vld [vmem:[#allocation3 + $0x64] sm:$0xf] }
 0x2d2   : > { %1339 = vst [vmem:[#allocation3 + $0x70] sm:$0xff] %v1335_v18  ;;  %v2961_v18 = vld [vmem:[#allocation3 + $0x54] sm:$0xf0] }
 0x2d9   : > { %v1274_v21 = vpop.f32.mrf.mxu2  ;;  %v1288_v45 = vpop.f32.mrf.mxu3  ;;  %v2964_v31 = vld [vmem:[#allocation3 + $0x6c] sm:$0xf0]  ;;  %v2865_v32 = vld [vmem:[#allocation3 + $0x70] sm:$0xf0] }
 0x2da   : > { %v1275_v23 = vadd.f32 %v1274_v21, %v3814_v47  ;;  %v1289_v62 = vadd.f32 %v1288_v45, %v3814_v47  ;;  %v2864_v33 = vor.u32 %v2964_v31, %v2863_v4  ;;  %v2868_v39 = vor.u32 %v2962_v0, %v2865_v32  ;;  %v2857_v4 = vld [vmem:[#allocation3 + $0x58] sm:$0xf0]  ;;  %v2855_v0 = vld [vmem:[#allocation3 + $0x48] sm:$0xf]  ;;  %v2959_v21 = vld [vmem:[#allocation3 + $0x4c] sm:$0xf] }
 0x2db   : > { %v2856_v45 = vor.u32 %v2961_v18, %v2855_v0  ;;  %v2841_v31 = vld [vmem:[#allocation3 + $0x38] sm:$0xf0]  ;;  %v2839_v32 = vld [vmem:[#allocation3 + $0x28] sm:$0xf] }
 0x2dc   : > { %v1295_v34 = vmax.f32 %v1275_v23, 0.0  ;;  %v1296_v42 = vmax.f32 %v1289_v62, 0.0  ;;  %1529 = vmatpush.bf16.msra.mxu0 %v2864_v33  ;;  %1558 = vmatpush.bf16.msra.mxu1 %v2868_v39  ;;  %v2860_v23 = vor.u32 %v2959_v21, %v2857_v4  ;;  %v2957_v62 = vld [vmem:[#allocation3 + $0x34] sm:$0xf0]  ;;  %v2955_v33 = vld [vmem:[#allocation3 + $0x2c] sm:$0xf] }
 0x2dd   : > { %v2840_v39 = vor.u32 %v2957_v62, %v2839_v32 }
 0x2de   : > { %v1311_v36 = vmul.f32 %v3812_v46, %v1295_v34  ;;  %v1312_v47 = vmul.f32 %v3812_v46, %v1296_v42  ;;  %v4006_v46 = vld [vmem:[%s4718_s6 + $0x28] sm:$0xff]  ;;  %v2844_v34 = vor.u32 %v2955_v33, %v2841_v31 }
 0x2df   : > { %1400 = vperm.xlu0 %3134, %v4006_v46   ;;  %v2951_v42 = vld [vmem:[#allocation3 + $0xc] sm:$0xf] }
 0x2e0   : > { %v1327_v19 = vadd.f32 %v3808_v44, %v1311_v36  ;;  %v1328_v59 = vadd.f32 %v3808_v44, %v1312_v47  ;;  %1530 = vmatpush.bf16.msra.mxu0 %v2848_v28  ;;  %1559 = vmatpush.bf16.msra.mxu1 %v2852_v16  ;;  %v2832_v44 = vor.u32 %v2956_v48, %v2831_v51  ;;  %v4073_v47 = vpop.permute.xlu2 %1385  ;;  %v4079_v28 = vpop.permute.xlu0 %1375 }
 0x2e1   : > { %v1276_v50 = vpop.f32.mrf.mxu2  ;;  %v1290_v20 = vpop.f32.mrf.mxu3  ;;  %v2828_v36 = vor.u32 %v2951_v42, %v2825_v9 }
 0x2e2   : > { %v1334_v2 = vpack.c.bf16 %v1328_v59, %v1327_v19  ;;  %v1277_v52 = vadd.f32 %v1276_v50, %v3798_v41  ;;  %v1291_v53 = vadd.f32 %v1290_v20, %v3798_v41 }
 0x2e4   : > { %1338 = vst [vmem:[#allocation3 + $0x68] sm:$0xff] %v1334_v2  ;;  %v1299_v56 = vmax.f32 %v1277_v52, 0.0  ;;  %v1300_v55 = vmax.f32 %v1291_v53, 0.0  ;;  %1531 = vmatpush.bf16.msra.mxu0 %v2832_v44  ;;  %1560 = vmatpush.bf16.msra.mxu1 %v2836_v54 }
 0x2e6   : > { %v1315_v41 = vmul.f32 %v3820_v14, %v1299_v56  ;;  %v1316_v58 = vmul.f32 %v3820_v14, %v1300_v55  ;;  %v4032_v14 = vld [vmem:[%s4718_s6 + $0x38] sm:$0xff] }
 0x2e7   : > { %3137 = vset.pattern.permute.xlu0 %v3356_v26  ;;  %1410 = vperm.xlu2 %3136, %v4032_v14  }
 0x2e8   : > { %v1331_v1 = vadd.f32 %v3822_v29, %v1315_v41  ;;  %v1332_v27 = vadd.f32 %v3822_v29, %v1316_v58  ;;  %1532 = vmatpush.bf16.msra.mxu0 %v2816_v63  ;;  %1561 = vmatpush.bf16.msra.mxu1 %v2820_v10  ;;  %v3357_v29 = vmov 5  }
 0x2e9   : > { %1674 = vperm.xlu0 %3137, %v3987_v8   ;;  %3141 = vset.pattern.permute.xlu1 %v3357_v29 }
 0x2ea   : > { %v1336_v6 = vpack.c.bf16 %v1332_v27, %v1331_v1  ;;  %1742 = vperm.xlu1 %3141, %v3955_v25   ;;  %v2947_v25 = vld [vmem:[%s4721_s8 + $0x8] sm:$0xff] }
 0x2eb   : > { %2877 = vmatmul.msk.bf16.vlgmr.msra.gmra.mxu0 %vm573_vm1, %v2946_v7  ;;  %2881 = vmatmul.msk.bf16.vlgmr.msra.gmra.mxu1 %vm573_vm1, %v2946_v7  ;;  %v2871_v35 = vld [vmem:[#allocation3 + $0x68] sm:$0xf]  ;;  %v2963_v24 = vld [vmem:[#allocation3 + $0x6c] sm:$0xf] }
 0x2ec   : > { %1340 = vst [vmem:[#allocation3 + $0x78] sm:$0xff] %v1336_v6 }
 0x2ef   : > { %3139 = vset.pattern.permute.xlu2 %v3356_v26  ;;  %v2823_v26 = vld [vmem:[#allocation3 + $0x8] sm:$0xf] }
 0x2f0   : > { %1682 = vperm.xlu2 %3139, %v3995_v37  }
 0x2f1   : > { %1694 = vperm.xlu0 %3137, %v4006_v46  }
 0x2f2   : > { %1750 = vperm.xlu1 %3141, %v3965_v15   ;;  %v2953_v15 = vld [vmem:[#allocation3 + $0x14] sm:$0xf0] }
 0x2f3   : > { %v2965_v61 = vld [vmem:[#allocation3 + $0x74] sm:$0xf0]  ;;  %v2873_v13 = vld [vmem:[#allocation3 + $0x78] sm:$0xf0]  ;;  %v2824_v5 = vor.u32 %v2953_v15, %v2823_v26  ;;  %v1807_v26 = vstv %s2893_s12 }
 0x2f4   : > { %v2872_v30 = vor.u32 %v2965_v61, %v2871_v35  ;;  %v2876_v22 = vor.u32 %v2963_v24, %v2873_v13 }
 0x2f6   : > { %1587 = vmatpush.bf16.msra.mxu2 %v2872_v30  ;;  %1616 = vmatpush.bf16.msra.mxu3 %v2876_v22  ;;  %v1802_v30 = vlaneseq }
 0x2f8   : > { %1690 = vperm.xlu2 %3139, %v4014_v3  }
 0x2f9   : > { %3140 = vset.pattern.permute.xlu0 %v3357_v29 }
 0x2fa   : > { %1588 = vmatpush.bf16.msra.mxu2 %v2856_v45  ;;  %1617 = vmatpush.bf16.msra.mxu3 %v2860_v23  ;;  %v1803_v23 = vand.u32 127, %v1802_v30 }
 0x2fb   : > { %2878 = vmatmul.msk.bf16.gmra.mxu0 %vm573_vm1, %v2947_v25  ;;  %2882 = vmatmul.msk.bf16.gmra.mxu1 %vm573_vm1, %v2947_v25 }
 0x2fc   : > { %1738 = vperm.xlu0 %3140, %v3987_v8   ;;  %1762 = vperm.xlu1 %3141, %v3977_v11   ;;  %v2948_v8 = vld [vmem:[%s4721_s8 + $0x10] sm:$0xff]  ;;  %v2949_v11 = vld [vmem:[%s4721_s8 + $0x18] sm:$0xff] }
 0x2fe   : > { %1589 = vmatpush.bf16.msra.mxu2 %v2840_v39  ;;  %1618 = vmatpush.bf16.msra.mxu3 %v2844_v34  ;;  %v1804_v34 = vadd.s32 128, %v1803_v23 }
 0x300   : > { %1702 = vperm.xlu2 %3139, %v4032_v14  }
 0x302   : > { %1590 = vmatpush.bf16.msra.mxu2 %v2824_v5  ;;  %1619 = vmatpush.bf16.msra.mxu3 %v2828_v36 }
 0x304   : > { %1758 = vperm.xlu0 %3140, %v4006_v46  }
 0x305   : > { %2885 = vmatmul.msk.bf16.vlgmr.msra.gmra.mxu2 %vm573_vm1, %v2946_v7  ;;  %2889 = vmatmul.msk.bf16.vlgmr.msra.gmra.mxu3 %vm573_vm1, %v2946_v7 }
 0x308   : > { %3142 = vset.pattern.permute.xlu2 %v3357_v29 }
 0x309   : > { %1746 = vperm.xlu2 %3142, %v3995_v37   ;;  %v4071_v37 = vpop.permute.xlu1 %1380 }
 0x30b   : > { %2879 = vmatmul.msk.bf16.gmra.mxu0 %vm573_vm1, %v2948_v8  ;;  %2883 = vmatmul.msk.bf16.gmra.mxu1 %vm573_vm1, %v2948_v8 }
 0x311   : > { %1754 = vperm.xlu2 %3142, %v4014_v3   ;;  %v4075_v40 = vpop.permute.xlu1 %1390 }
 0x315   : > { %2886 = vmatmul.msk.bf16.gmra.mxu2 %vm573_vm1, %v2947_v25  ;;  %2890 = vmatmul.msk.bf16.gmra.mxu3 %vm573_vm1, %v2947_v25 }
 0x319   : > { %1766 = vperm.xlu2 %3142, %v4032_v14   ;;  %v4081_v16 = vpop.permute.xlu1 %1405 }
 0x31b   : > { %2880 = vmatmul.msk.bf16.gmra.mxu0 %vm573_vm1, %v2949_v11  ;;  %2884 = vmatmul.msk.bf16.gmra.mxu1 %vm573_vm1, %v2949_v11 }
 0x320   : > { %v4077_v43 = vpop.permute.xlu2 %1395 }
 0x321   : > { %v4087_v48 = vpop.permute.xlu1 %1678 }
 0x325   : > { %2887 = vmatmul.msk.bf16.gmra.mxu2 %vm573_vm1, %v2948_v8  ;;  %2891 = vmatmul.msk.bf16.gmra.mxu3 %vm573_vm1, %v2948_v8  ;;  %v4157_v8 = vadd.s32 %v1807_v26, %v1803_v23 }
 0x327   : > { %vm1812_vm3 = vcmp.lt.s32.totalorder %v4157_v8, 1000 }
 0x329   : > { %v4093_v20 = vpop.permute.xlu1 %1686 }
 0x331   : > { %v4102_v38 = vpop.permute.xlu1 %1698 }
 0x335   : > { %2888 = vmatmul.msk.bf16.gmra.mxu2 %vm573_vm1, %v2949_v11  ;;  %2892 = vmatmul.msk.bf16.gmra.mxu3 %vm573_vm1, %v2949_v11 }
 0x341   : > { %v4083_v19 = vpop.permute.xlu2 %1410 }
 0x34a   : > { %v4089_v49 = vpop.permute.xlu2 %1682 }
 0x351   : > { %v4085_v59 = vpop.permute.xlu0 %1400 }
 0x352   : > { %v4097_v2 = vpop.permute.xlu2 %1690 }
 0x35a   : > { %v4120_v1 = vpop.permute.xlu2 %1702 }
 0x35b   : > { %v4091_v50 = vpop.permute.xlu0 %1674 }
 0x35c   : > { %v4127_v29 = vpop.permute.xlu1 %1742 }
 0x363   : > { %v4095_v46 = vpop.permute.xlu0 %1694  ;;  %v4140_v45 = vpop.permute.xlu2 %1746 }
 0x364   : > { %v4159_v11 = vpop.permute.xlu1 %1750 }
 0x368   : > { %v1534_v52 = vpop.f32.mrf.mxu0  ;;  %v1563_v53 = vpop.f32.mrf.mxu1 }
 0x369   : > { %v1535_v51 = vadd.f32 %v1534_v52, %v4079_v28  ;;  %v1564_v60 = vadd.f32 %v1563_v53, %v4079_v28  ;;  %v1805_v52 = vadd.s32 256, %v1803_v23  ;;  %v4161_v53 = vadd.s32 %v1807_v26, %v1804_v34 }
 0x36b   : > { %v1641_v44 = vmax.f32 %v1535_v51, 0.0  ;;  %v1642_v54 = vmax.f32 %v1564_v60, 0.0  ;;  %vm1813_vm4 = vcmp.lt.s32.totalorder %v4161_v53, 1000 }
 0x36d   : > { %v1705_v56 = vmul.f32 %v4091_v50, %v1641_v44  ;;  %v1706_v55 = vmul.f32 %v4091_v50, %v1642_v54  ;;  %v1806_v44 = vadd.s32 384, %v1803_v23  ;;  %v4193_v23 = vpop.permute.xlu2 %1754 }
 0x36e   : > { %v4108_v57 = vpop.permute.xlu0 %1738 }
 0x36f   : > { %v4111_v3 = vadd.f32 %v4108_v57, %v1705_v56  ;;  %v4114_v41 = vadd.f32 %v4108_v57, %v1706_v55 }
 0x370   : > { %v1536_v58 = vpop.f32.mrf.mxu0  ;;  %v1565_v12 = vpop.f32.mrf.mxu1 }
 0x371   : > { %v1537_v17 = vadd.f32 %v1536_v58, %v4071_v37  ;;  %v1566_v63 = vadd.f32 %v1565_v12, %v4071_v37  ;;  %v1921_v10 = vpack.c.bf16 %v4114_v41, %v4111_v3 }
 0x373   : > { %v1645_v27 = vmax.f32 %v1537_v17, 0.0  ;;  %v1646_v7 = vmax.f32 %v1566_v63, 0.0  ;;  %1941 = vst [vmem:[%s4122_s9] sm:$0xff] %v1921_v10 }
 0x375   : > { %v1709_v6 = vmul.f32 %v4087_v48, %v1645_v27  ;;  %v1710_v14 = vmul.f32 %v4087_v48, %v1646_v7  ;;  %v4174_v27 = vadd.s32 %v1807_v26, %v1805_v52 }
 0x377   : > { %v4130_v35 = vadd.f32 %v4127_v29, %v1709_v6  ;;  %v4133_v61 = vadd.f32 %v4127_v29, %v1710_v14  ;;  %vm1814_vm5 = vcmp.lt.s32.totalorder %v4174_v27, 1000  ;;  %v1858_v27 = vld [vmem:[#allocation4 + $0x10] sm:$0xff] }
 0x378   : > { %v1539_v24 = vpop.f32.mrf.mxu0  ;;  %v1568_v13 = vpop.f32.mrf.mxu1 }
 0x379   : > { %v1540_v22 = vadd.f32 %v1539_v24, %v4073_v47  ;;  %v1569_v18 = vadd.f32 %v1568_v13, %v4073_v47  ;;  %v1923_v4 = vpack.c.bf16 %v4133_v61, %v4130_v35  ;;  %v4181_v24 = vadd.s32 %v1807_v26, %v1806_v44 }
 0x37b   : > { %v1649_v0 = vmax.f32 %v1540_v22, 0.0  ;;  %v1650_v21 = vmax.f32 %v1569_v18, 0.0  ;;  %1943 = vst [vmem:[%s4122_s9 + $0x20] sm:$0xff] %v1923_v4  ;;  %v1825_v22 = vsel %vm1813_vm4, %v4114_v41, 0.0  ;;  %vm1815_vm6 = vcmp.lt.s32.totalorder %v4181_v24, 1000  ;;  %v1859_v24 = vld [vmem:[#allocation4 + $0x18] sm:$0xff] }
 0x37d   : > { %v1713_v25 = vmul.f32 %v4089_v49, %v1649_v0  ;;  %v1714_v62 = vmul.f32 %v4089_v49, %v1650_v21 }
 0x37f   : > { %v4145_v31 = vadd.f32 %v4140_v45, %v1713_v25  ;;  %v4148_v32 = vadd.f32 %v4140_v45, %v1714_v62 }
 0x380   : > { %v1541_v33 = vpop.f32.mrf.mxu0  ;;  %v1570_v39 = vpop.f32.mrf.mxu1 }
 0x381   : > { %v1542_v42 = vadd.f32 %v1541_v33, %v4075_v40  ;;  %v1571_v15 = vadd.f32 %v1570_v39, %v4075_v40  ;;  %v1925_v9 = vpack.c.bf16 %v4148_v32, %v4145_v31 }
 0x383   : > { %v1653_v5 = vmax.f32 %v1542_v42, 0.0  ;;  %v1654_v36 = vmax.f32 %v1571_v15, 0.0  ;;  %1945 = vst [vmem:[%s4122_s9 + $0x40] sm:$0xff] %v1925_v9 }
 0x385   : > { %v1717_v51 = vmul.f32 %v4093_v20, %v1653_v5  ;;  %v1718_v60 = vmul.f32 %v4093_v20, %v1654_v36 }
 0x387   : > { %v4166_v55 = vadd.f32 %v4159_v11, %v1717_v51  ;;  %v4169_v58 = vadd.f32 %v4159_v11, %v1718_v60 }
 0x388   : > { %v1592_v54 = vpop.f32.mrf.mxu2  ;;  %v1621_v56 = vpop.f32.mrf.mxu3 }
 0x389   : > { %v1593_v12 = vadd.f32 %v1592_v54, %v4079_v28  ;;  %v1622_v17 = vadd.f32 %v1621_v56, %v4079_v28  ;;  %v1544_v63 = vpop.f32.mrf.mxu0  ;;  %v1573_v10 = vpop.f32.mrf.mxu1  ;;  %v1927_v14 = vpack.c.bf16 %v4169_v58, %v4166_v55  ;;  %v1824_v28 = vsel %vm1812_vm3, %v4111_v3, 0.0 }
 0x38a   : > { %v1545_v7 = vadd.f32 %v1544_v63, %v4077_v43  ;;  %v1574_v6 = vadd.f32 %v1573_v10, %v4077_v43  ;;  %v1864_v3 = vadd.f32 %v1825_v22, %v1824_v28 }
 0x38b   : > { %v1643_v13 = vmax.f32 %v1593_v12, 0.0  ;;  %v1644_v30 = vmax.f32 %v1622_v17, 0.0  ;;  %1947 = vst [vmem:[%s4122_s9 + $0x60] sm:$0xff] %v1927_v14  ;;  %v1829_v14 = vsel %vm1813_vm4, %v4133_v61, 0.0 }
 0x38c   : > { %v1657_v18 = vmax.f32 %v1545_v7, 0.0  ;;  %v1658_v4 = vmax.f32 %v1574_v6, 0.0  ;;  %v1828_v6 = vsel %vm1812_vm3, %v4130_v35, 0.0 }
 0x38d   : > { %v1707_v0 = vmul.f32 %v4091_v50, %v1643_v13  ;;  %v1708_v21 = vmul.f32 %v4091_v50, %v1644_v30  ;;  %v4226_v13 = vpop.permute.xlu0 %1758 }
 0x38e   : > { %v1721_v25 = vmul.f32 %v4097_v2, %v1657_v18  ;;  %v1722_v62 = vmul.f32 %v4097_v2, %v1658_v4 }
 0x38f   : > { %v1771_v41 = vadd.f32 %v4108_v57, %v1707_v0  ;;  %v1772_v33 = vadd.f32 %v4108_v57, %v1708_v21  ;;  %v1869_v0 = vadd.f32 %v1829_v14, %v1828_v6 }
 0x390   : > { %v1594_v39 = vpop.f32.mrf.mxu2  ;;  %v1623_v34 = vpop.f32.mrf.mxu3  ;;  %v4201_v26 = vadd.f32 %v4193_v23, %v1721_v25  ;;  %v4204_v50 = vadd.f32 %v4193_v23, %v1722_v62 }
 0x391   : > { %v1595_v42 = vadd.f32 %v1594_v39, %v4071_v37  ;;  %v1624_v15 = vadd.f32 %v1623_v34, %v4071_v37  ;;  %v1546_v9 = vpop.f32.mrf.mxu0  ;;  %v1575_v5 = vpop.f32.mrf.mxu1  ;;  %v1826_v36 = vsel %vm1814_vm5, %v1771_v41, 0.0  ;;  %v1827_v57 = vsel %vm1815_vm6, %v1772_v33, 0.0 }
 0x392   : > { %v1547_v52 = vadd.f32 %v1546_v9, %v4085_v59  ;;  %v1576_v51 = vadd.f32 %v1575_v5, %v4085_v59  ;;  %v1929_v60 = vpack.c.bf16 %v4204_v50, %v4201_v26  ;;  %v1865_v44 = vadd.f32 %v1864_v3, %v1826_v36 }
 0x393   : > { %v1647_v54 = vmax.f32 %v1595_v42, 0.0  ;;  %v1648_v56 = vmax.f32 %v1624_v15, 0.0  ;;  %v1922_v37 = vpack.c.bf16 %v1772_v33, %v1771_v41 }
 0x394   : > { %v1661_v12 = vmax.f32 %v1547_v52, 0.0  ;;  %v1662_v17 = vmax.f32 %v1576_v51, 0.0  ;;  %1949 = vst [vmem:[%s4122_s9 + $0x80] sm:$0xff] %v1929_v60  ;;  %v1866_v63 = vadd.f32 %v1865_v44, %v1827_v57  ;;  %v1832_v60 = vsel %vm1812_vm3, %v4145_v31, 0.0 }
 0x395   : > { %v1711_v10 = vmul.f32 %v4087_v48, %v1647_v54  ;;  %v1712_v7 = vmul.f32 %v4087_v48, %v1648_v56  ;;  %1942 = vst [vmem:[%s4122_s9 + $0x8] sm:$0xff] %v1922_v37  ;;  %v1833_v44 = vsel %vm1813_vm4, %v4148_v32, 0.0  ;;  %v4257_v54 = vpop.permute.xlu1 %1762 }
 0x396   : > { %v1725_v30 = vmul.f32 %v4095_v46, %v1661_v12  ;;  %v1726_v28 = vmul.f32 %v4095_v46, %v1662_v17  ;;  %1867 = vadd.xlane.f32.xlu0 %v1866_v63 }
 0x397   : > { %v1775_v22 = vadd.f32 %v4127_v29, %v1711_v10  ;;  %v1776_v48 = vadd.f32 %v4127_v29, %v1712_v7  ;;  %v1874_v10 = vadd.f32 %v1833_v44, %v1832_v60 }
 0x398   : > { %v1597_v18 = vpop.f32.mrf.mxu2  ;;  %v1626_v4 = vpop.f32.mrf.mxu3  ;;  %v4233_v35 = vadd.f32 %v4226_v13, %v1725_v30  ;;  %v4236_v21 = vadd.f32 %v4226_v13, %v1726_v28 }
 0x399   : > { %v1598_v61 = vadd.f32 %v1597_v18, %v4073_v47  ;;  %v1627_v25 = vadd.f32 %v1626_v4, %v4073_v47  ;;  %v1549_v62 = vpop.f32.mrf.mxu0  ;;  %v1578_v3 = vpop.f32.mrf.mxu1  ;;  %v1830_v41 = vsel %vm1814_vm5, %v1775_v22, 0.0  ;;  %v1924_v34 = vpack.c.bf16 %v1776_v48, %v1775_v22 }
 0x39a   : > { %v1550_v29 = vadd.f32 %v1549_v62, %v4081_v16  ;;  %v1579_v33 = vadd.f32 %v1578_v3, %v4081_v16  ;;  %v1870_v39 = vadd.f32 %v1869_v0, %v1830_v41  ;;  %v1831_v9 = vsel %vm1815_vm6, %v1776_v48, 0.0 }
 0x39b   : > { %v1651_v42 = vmax.f32 %v1598_v61, 0.0  ;;  %v1652_v15 = vmax.f32 %v1627_v25, 0.0  ;;  %v1931_v47 = vpack.c.bf16 %v4236_v21, %v4233_v35  ;;  %1944 = vst [vmem:[%s4122_s9 + $0x28] sm:$0xff] %v1924_v34  ;;  %v4290_v34 = vpop.permute.xlu2 %1766 }
 0x39c   : > { %v1665_v5 = vmax.f32 %v1550_v29, 0.0  ;;  %v1666_v36 = vmax.f32 %v1579_v33, 0.0  ;;  %v1871_v57 = vadd.f32 %v1870_v39, %v1831_v9  ;;  %v1836_v33 = vsel %vm1812_vm3, %v4166_v55, 0.0 }
 0x39d   : > { %v1715_v52 = vmul.f32 %v4089_v49, %v1651_v42  ;;  %v1716_v51 = vmul.f32 %v4089_v49, %v1652_v15  ;;  %1951 = vst [vmem:[%s4122_s9 + $0xa0] sm:$0xff] %v1931_v47  ;;  %v1837_v39 = vsel %vm1813_vm4, %v4169_v58, 0.0 }
 0x39e   : > { %v1729_v56 = vmul.f32 %v4102_v38, %v1665_v5  ;;  %v1730_v37 = vmul.f32 %v4102_v38, %v1666_v36  ;;  %1872 = vadd.xlane.f32.xlu1 %v1871_v57  ;;  %v1879_v36 = vadd.f32 %v1837_v39, %v1836_v33 }
 0x39f   : > { %v1779_v12 = vadd.f32 %v4140_v45, %v1715_v52  ;;  %v1780_v49 = vadd.f32 %v4140_v45, %v1716_v51 }
 0x3a0   : > { %v1599_v17 = vpop.f32.mrf.mxu2  ;;  %v1628_v63 = vpop.f32.mrf.mxu3  ;;  %v4265_v31 = vadd.f32 %v4257_v54, %v1729_v56  ;;  %v4268_v32 = vadd.f32 %v4257_v54, %v1730_v37 }
 0x3a1   : > { %v1600_v7 = vadd.f32 %v1599_v17, %v4075_v40  ;;  %v1629_v6 = vadd.f32 %v1628_v63, %v4075_v40  ;;  %v1834_v14 = vsel %vm1814_vm5, %v1779_v12, 0.0  ;;  %v1551_v30 = vpop.f32.mrf.mxu0  ;;  %v1580_v45 = vpop.f32.mrf.mxu1  ;;  %v1926_v22 = vpack.c.bf16 %v1780_v49, %v1779_v12 }
 0x3a2   : > { %v1875_v28 = vadd.f32 %v1874_v10, %v1834_v14  ;;  %v1552_v48 = vadd.f32 %v1551_v30, %v4083_v19  ;;  %v1581_v18 = vadd.f32 %v1580_v45, %v4083_v19  ;;  %v1835_v61 = vsel %vm1815_vm6, %v1780_v49, 0.0 }
 0x3a3   : > { %v1655_v4 = vmax.f32 %v1600_v7, 0.0  ;;  %v1656_v0 = vmax.f32 %v1629_v6, 0.0  ;;  %v1933_v40 = vpack.c.bf16 %v4268_v32, %v4265_v31  ;;  %1946 = vst [vmem:[%s4122_s9 + $0x48] sm:$0xff] %v1926_v22  ;;  %v1841_v10 = vsel %vm1813_vm4, %v4204_v50, 0.0 }
 0x3a4   : > { %v1876_v25 = vadd.f32 %v1875_v28, %v1835_v61  ;;  %v1669_v62 = vmax.f32 %v1552_v48, 0.0  ;;  %v1670_v3 = vmax.f32 %v1581_v18, 0.0 }
 0x3a5   : > { %v1719_v41 = vmul.f32 %v4093_v20, %v1655_v4  ;;  %v1720_v29 = vmul.f32 %v4093_v20, %v1656_v0  ;;  %1953 = vst [vmem:[%s4122_s9 + $0xc0] sm:$0xff] %v1933_v40  ;;  %v1845_v40 = vsel %vm1813_vm4, %v4236_v21, 0.0 }
 0x3a6   : > { %1877 = vadd.xlane.f32.xlu2 %v1876_v25  ;;  %v1733_v42 = vmul.f32 %v4120_v1, %v1669_v62  ;;  %v1734_v15 = vmul.f32 %v4120_v1, %v1670_v3 }
 0x3a7   : > { %v1783_v9 = vadd.f32 %v4159_v11, %v1719_v41  ;;  %v1784_v20 = vadd.f32 %v4159_v11, %v1720_v29 }
 0x3a8   : > { %v1602_v47 = vpop.f32.mrf.mxu2  ;;  %v1631_v5 = vpop.f32.mrf.mxu3  ;;  %v4297_v55 = vadd.f32 %v4290_v34, %v1733_v42  ;;  %v4300_v58 = vadd.f32 %v4290_v34, %v1734_v15 }
 0x3a9   : > { %v1603_v57 = vadd.f32 %v1602_v47, %v4077_v43  ;;  %v1632_v52 = vadd.f32 %v1631_v5, %v4077_v43  ;;  %v1838_v51 = vsel %vm1814_vm5, %v1783_v9, 0.0  ;;  %v1928_v11 = vpack.c.bf16 %v1784_v20, %v1783_v9 }
 0x3aa   : > { %v1880_v60 = vadd.f32 %v1879_v36, %v1838_v51  ;;  %v1935_v44 = vpack.c.bf16 %v4300_v58, %v4297_v55  ;;  %v1839_v12 = vsel %vm1815_vm6, %v1784_v20, 0.0  ;;  %v1840_v43 = vsel %vm1812_vm3, %v4201_v26, 0.0 }
 0x3ab   : > { %v1659_v56 = vmax.f32 %v1603_v57, 0.0  ;;  %v1660_v37 = vmax.f32 %v1632_v52, 0.0  ;;  %1948 = vst [vmem:[%s4122_s9 + $0x68] sm:$0xff] %v1928_v11  ;;  %v1884_v45 = vadd.f32 %v1841_v10, %v1840_v43  ;;  %v1849_v5 = vsel %vm1813_vm4, %v4268_v32, 0.0 }
 0x3ac   : > { %v1881_v49 = vadd.f32 %v1880_v60, %v1839_v12  ;;  %1955 = vst [vmem:[%s4122_s9 + $0xe0] sm:$0xff] %v1935_v44 }
 0x3ad   : > { %v1723_v17 = vmul.f32 %v4097_v2, %v1659_v56  ;;  %v1724_v63 = vmul.f32 %v4097_v2, %v1660_v37 }
 0x3ae   : > { %1882 = vadd.xlane.f32.xlu2 %v1881_v49 }
 0x3af   : > { %v1787_v7 = vadd.f32 %v4193_v23, %v1723_v17  ;;  %v1788_v6 = vadd.f32 %v4193_v23, %v1724_v63  ;;  %v1853_v63 = vsel %vm1813_vm4, %v4300_v58, 0.0 }
 0x3b0   : > { %v1604_v14 = vpop.f32.mrf.mxu2  ;;  %v1633_v30 = vpop.f32.mrf.mxu3 }
 0x3b1   : > { %v1605_v2 = vadd.f32 %v1604_v14, %v4085_v59  ;;  %v1634_v28 = vadd.f32 %v1633_v30, %v4085_v59  ;;  %v1842_v26 = vsel %vm1814_vm5, %v1787_v7, 0.0  ;;  %v1930_v48 = vpack.c.bf16 %v1788_v6, %v1787_v7 }
 0x3b2   : > { %v1885_v22 = vadd.f32 %v1884_v45, %v1842_v26  ;;  %v1843_v4 = vsel %vm1815_vm6, %v1788_v6, 0.0  ;;  %v1844_v59 = vsel %vm1812_vm3, %v4233_v35, 0.0  ;;  %v1857_v45 = vld [vmem:[#allocation4 + $0x8] sm:$0xff] }
 0x3b3   : > { %v1663_v18 = vmax.f32 %v1605_v2, 0.0  ;;  %v1664_v50 = vmax.f32 %v1634_v28, 0.0  ;;  %1950 = vst [vmem:[%s4122_s9 + $0x88] sm:$0xff] %v1930_v48  ;;  %v1889_v29 = vadd.f32 %v1845_v40, %v1844_v59  ;;  %v1862_v59 = vld [vmem:[#allocation4 + $0x30] sm:$0xff] }
 0x3b4   : > { %v1886_v0 = vadd.f32 %v1885_v22, %v1843_v4 }
 0x3b5   : > { %v1727_v23 = vmul.f32 %v4095_v46, %v1663_v18  ;;  %v1728_v61 = vmul.f32 %v4095_v46, %v1664_v50  ;;  %v1860_v18 = vld [vmem:[#allocation4 + $0x20] sm:$0xff] }
 0x3b6   : > { %1887 = vadd.xlane.f32.xlu0 %v1886_v0  ;;  %v1861_v0 = vld [vmem:[#allocation4 + $0x28] sm:$0xff] }
 0x3b7   : > { %v1791_v25 = vadd.f32 %v4226_v13, %v1727_v23  ;;  %v1792_v62 = vadd.f32 %v4226_v13, %v1728_v61 }
 0x3b8   : > { %v1607_v3 = vpop.f32.mrf.mxu2  ;;  %v1636_v41 = vpop.f32.mrf.mxu3 }
 0x3b9   : > { %v1608_v33 = vadd.f32 %v1607_v3, %v4081_v16  ;;  %v1637_v46 = vadd.f32 %v1636_v41, %v4081_v16  ;;  %v1846_v35 = vsel %vm1814_vm5, %v1791_v25, 0.0  ;;  %v1932_v42 = vpack.c.bf16 %v1792_v62, %v1791_v25 }
 0x3ba   : > { %v1890_v39 = vadd.f32 %v1889_v29, %v1846_v35  ;;  %v1847_v9 = vsel %vm1815_vm6, %v1792_v62, 0.0  ;;  %v1848_v16 = vsel %vm1812_vm3, %v4265_v31, 0.0  ;;  %v1863_v62 = vld [vmem:[#allocation4 + $0x38] sm:$0xff] }
 0x3bb   : > { %v1667_v15 = vmax.f32 %v1608_v33, 0.0  ;;  %v1668_v21 = vmax.f32 %v1637_v46, 0.0  ;;  %1952 = vst [vmem:[%s4122_s9 + $0xa8] sm:$0xff] %v1932_v42  ;;  %v1894_v60 = vadd.f32 %v1849_v5, %v1848_v16 }
 0x3bc   : > { %v1891_v20 = vadd.f32 %v1890_v39, %v1847_v9 }
 0x3bd   : > { %v1731_v13 = vmul.f32 %v4102_v38, %v1667_v15  ;;  %v1732_v47 = vmul.f32 %v4102_v38, %v1668_v21 }
 0x3be   : > { %1892 = vadd.xlane.f32.xlu1 %v1891_v20 }
 0x3bf   : > { %v1795_v36 = vadd.f32 %v4257_v54, %v1731_v13  ;;  %v1796_v57 = vadd.f32 %v4257_v54, %v1732_v47 }
 0x3c0   : > { %v1609_v52 = vpop.f32.mrf.mxu2  ;;  %v1638_v51 = vpop.f32.mrf.mxu3 }
 0x3c1   : > { %v1610_v11 = vadd.f32 %v1609_v52, %v4083_v19  ;;  %v1639_v38 = vadd.f32 %v1638_v51, %v4083_v19  ;;  %v1850_v31 = vsel %vm1814_vm5, %v1795_v36, 0.0  ;;  %v1934_v56 = vpack.c.bf16 %v1796_v57, %v1795_v36 }
 0x3c2   : > { %v1895_v44 = vadd.f32 %v1894_v60, %v1850_v31  ;;  %v1851_v12 = vsel %vm1815_vm6, %v1796_v57, 0.0  ;;  %v1852_v19 = vsel %vm1812_vm3, %v4297_v55, 0.0  ;;  %v1856_v55 = vld [vmem:[#allocation4] sm:$0xff] }
 0x3c3   : > { %v1671_v37 = vmax.f32 %v1610_v11, 0.0  ;;  %v1672_v32 = vmax.f32 %v1639_v38, 0.0  ;;  %1954 = vst [vmem:[%s4122_s9 + $0xc8] sm:$0xff] %v1934_v56  ;;  %v1899_v7 = vadd.f32 %v1853_v63, %v1852_v19 }
 0x3c4   : > { %v1896_v49 = vadd.f32 %v1895_v44, %v1851_v12 }
 0x3c5   : > { %v1735_v54 = vmul.f32 %v4120_v1, %v1671_v37  ;;  %v1736_v17 = vmul.f32 %v4120_v1, %v1672_v32 }
 0x3c6   : > { %1897 = vadd.xlane.f32.xlu2 %v1896_v49 }
 0x3c7   : > { %v1799_v43 = vadd.f32 %v4290_v34, %v1735_v54  ;;  %v1800_v10 = vadd.f32 %v4290_v34, %v1736_v17 }
 0x3c9   : > { %v1854_v6 = vsel %vm1814_vm5, %v1799_v43, 0.0  ;;  %v1936_v14 = vpack.c.bf16 %v1800_v10, %v1799_v43  ;;  %v1855_v1 = vsel %vm1815_vm6, %v1800_v10, 0.0 }
 0x3ca   : > { %v1900_v30 = vadd.f32 %v1899_v7, %v1854_v6 }
 0x3cb   : > { %1956 = vst [vmem:[%s4122_s9 + $0xe8] sm:$0xff] %v1936_v14 }
 0x3cc   : > { %v1901_v8 = vadd.f32 %v1900_v30, %v1855_v1 }
 0x3ce   : > { %1902 = vadd.xlane.f32.xlu0 %v1901_v8 }
 0x409   : > { %v1868_v53 = vpop.xlane.xlu0 %1867 }
 0x40a   : > { %v1904_v58 = vadd.f32 %v1868_v53, %v1856_v55 }
 0x40c   : > { %1913 = vst.msk [vmem:[#allocation4] sm:$0xff] %vm1912_vm7, %v1904_v58 }
 0x411   : > { %v1873_v34 = vpop.xlane.xlu1 %1872 }
 0x412   : > { %v1905_v2 = vadd.f32 %v1873_v34, %v1857_v45 }
 0x414   : > { %1914 = vst.msk [vmem:[#allocation4 + $0x8] sm:$0xff] %vm1912_vm7, %v1905_v2 }
 0x419   : > { %v1878_v28 = vpop.xlane.xlu2 %1877 }
 0x41a   : > { %v1906_v26 = vadd.f32 %v1878_v28, %v1858_v27 }
 0x41c   : > { %1915 = vst.msk [vmem:[#allocation4 + $0x10] sm:$0xff] %vm1912_vm7, %v1906_v26 }
 0x421   : > { %v1883_v22 = vpop.xlane.xlu2 %1882 }
 0x422   : > { %v1907_v48 = vadd.f32 %v1883_v22, %v1859_v24 }
 0x424   : > { %1916 = vst.msk [vmem:[#allocation4 + $0x18] sm:$0xff] %vm1912_vm7, %v1907_v48 }
 0x429   : > { %v1888_v50 = vpop.xlane.xlu0 %1887 }
 0x42a   : > { %v1908_v4 = vadd.f32 %v1888_v50, %v1860_v18 }
 0x42c   : > { %1917 = vst.msk [vmem:[#allocation4 + $0x20] sm:$0xff] %vm1912_vm7, %v1908_v4 }
 0x431   : > { %v1893_v23 = vpop.xlane.xlu1 %1892 }
 0x432   : > { %v1909_v61 = vadd.f32 %v1893_v23, %v1861_v0 }
 0x434   : > { %1918 = vst.msk [vmem:[#allocation4 + $0x28] sm:$0xff] %vm1912_vm7, %v1909_v61 }
 0x439   : > { %v1898_v40 = vpop.xlane.xlu2 %1897 }
 0x43a   : > { %v1910_v25 = vadd.f32 %v1898_v40, %v1862_v59 }
 0x43c   : > { %1919 = vst.msk [vmem:[#allocation4 + $0x30] sm:$0xff] %vm1912_vm7, %v1910_v25 }
 0x441   : > { %v1903_v3 = vpop.xlane.xlu0 %1902 }
 0x442   : > { %v1911_v41 = vadd.f32 %v1903_v3, %v1863_v62 }
 0x444   : > { %1920 = vst.msk [vmem:[#allocation4 + $0x38] sm:$0xff] %vm1912_vm7, %v1911_v41 }
 0x445 PF: > { %p2895_p7 = scmp.ne.s32.totalorder %s3326_s16, 1 }
 0x446   : > { %p2896_p11 = scmp.ne.s32.totalorder (!%p2895_p7), %s3322_s15, 0 }
 0x447   : > { %1960 = sbr.rel (%p2895_p7) target bundleno = 1589 (0x635), region = 72 }
 0x44c   : > { %1964 = sbr.rel (%p2896_p11) target bundleno = 1446 (0x5a6), region = 76  ;;  %s4722_s11 = sld [smem:[#allocation27_spill]] (!%p2896_p11) }
 0x44d   : > { %s4724_s6 = sld [smem:[#allocation29_spill]] (!%p2896_p11)  ;;  %s3358_s19 = smov (!%p2896_p11), 122  }
 0x44e   : > { %s4725_s28 = sld [smem:[#allocation30_spill]] (!%p2896_p11) }
 0x44f   : > { %s4726_s23 = sld [smem:[#allocation28_spill]] (!%p2896_p11) }
 0x451   : > { %v1972_v29 = vld [vmem:[#allocation4 + $0x38] sm:$0xff]  ;;  %v1971_v33 = vld [vmem:[#allocation4 + $0x30] sm:$0xff]  ;;  %v1970_v46 = vld [vmem:[#allocation4 + $0x28] sm:$0xff]  ;;  %vm1985_vm8 = vcmask 523264   ;;  %vm2065_vm9 = vcmask 130048   ;;  %vm2283_vm12 = vcmask 7168  }
 0x452   : > { %v1980_v35 = vmul.f32 0.001, %v1972_v29  ;;  %v1979_v39 = vmul.f32 0.001, %v1971_v33  ;;  %v1969_v42 = vld [vmem:[#allocation4 + $0x20] sm:$0xff]  ;;  %v1968_v21 = vld [vmem:[#allocation4 + $0x18] sm:$0xff]  ;;  %s4723_s27 = smov %s4722_s11 }
 0x453   : > { %v1978_v15 = vmul.f32 0.001, %v1970_v46  ;;  %v1977_v9 = vmul.f32 0.001, %v1969_v42  ;;  %v1967_v20 = vld [vmem:[#allocation4 + $0x10] sm:$0xff]  ;;  %v1966_v47 = vld [vmem:[#allocation4 + $0x8] sm:$0xff] }
 0x454   : > { %2000 = vmatpush.msra.mxu0 %v1980_v35  ;;  %v1976_v13 = vmul.f32 0.001, %v1968_v21  ;;  %v1975_v16 = vmul.f32 0.001, %v1967_v20  ;;  %v1965_v5 = vld [vmem:[#allocation4] sm:$0xff]  ;;  %v1982_v51 = vld [vmem:[%s4723_s27 + $0x8] sm:$0xff] }
 0x455   : > { %v1974_v36 = vmul.f32 0.001, %v1966_v47  ;;  %v1973_v57 = vmul.f32 0.001, %v1965_v5  ;;  %v1981_v52 = vld [vmem:[%s4722_s11] sm:$0xff]  ;;  %v2027_v11 = vld [vmem:[%s4724_s6 + $0x10] sm:$0xff] }
 0x456   : > { %2001 = vmatpush.msra.mxu0 %v1979_v39  ;;  %v2025_v60 = vld [vmem:[%s4724_s6] sm:$0xff]  ;;  %v2026_v38 = vld [vmem:[%s4724_s6 + $0x8] sm:$0xff]  ;;  %2045 = vrot.lane.b32.xlu1 %v2027_v11, %s3358_s19  ;;  %v2028_v44 = vld [vmem:[%s4724_s6 + $0x18] sm:$0xff] }
 0x457   : > { %2041 = vrot.lane.b32.xlu0 %v2025_v60, %s3358_s19  ;;  %v2031_v56 = vld [vmem:[%s4724_s6 + $0x30] sm:$0xff]  ;;  %v2029_v37 = vld [vmem:[%s4724_s6 + $0x20] sm:$0xff]  ;;  %v1984_v12 = vld [vmem:[%s4725_s28 + $0x8] sm:$0xff] }
 0x458   : > { %2002 = vmatpush.msra.mxu0 %v1978_v15  ;;  %2049 = vrot.lane.b32.xlu2 %v2029_v37, %s3358_s19  ;;  %v1983_v32 = vld [vmem:[%s4725_s28] sm:$0xff]  ;;  %v2032_v49 = vld [vmem:[%s4724_s6 + $0x38] sm:$0xff]  ;;  %v2030_v17 = vld [vmem:[%s4724_s6 + $0x28] sm:$0xff] }
 0x459   : > { %v2017_v7 = vld [vmem:[%s4726_s23] sm:$0xff]  ;;  %v2020_v6 = vld [vmem:[%s4726_s23 + $0x18] sm:$0xff]  ;;  %v2023_v14 = vld [vmem:[%s4726_s23 + $0x30] sm:$0xff] }
 0x45a   : > { %2003 = vmatpush.msra.mxu0 %v1977_v9  ;;  %v2018_v30 = vld [vmem:[%s4726_s23 + $0x8] sm:$0xff]  ;;  %v2021_v1 = vld [vmem:[%s4726_s23 + $0x20] sm:$0xff]  ;;  %v2024_v8 = vld [vmem:[%s4726_s23 + $0x38] sm:$0xff] }
 0x45b   : > { %v2019_v55 = vld [vmem:[%s4726_s23 + $0x10] sm:$0xff]  ;;  %v2022_v53 = vld [vmem:[%s4726_s23 + $0x28] sm:$0xff] }
 0x45c   : > { %2004 = vmatpush.msra.mxu0 %v1976_v13 }
 0x45e   : > { %2005 = vmatpush.msra.mxu0 %v1975_v16  ;;  %2047 = vrot.lane.b32.xlu1 %v2028_v44, %s3358_s19 }
 0x45f   : > { %2043 = vrot.lane.b32.xlu0 %v2026_v38, %s3358_s19 }
 0x460   : > { %2006 = vmatpush.msra.mxu0 %v1974_v36  ;;  %2051 = vrot.lane.b32.xlu2 %v2030_v17, %s3358_s19 }
 0x462   : > { %2007 = vmatpush.msra.mxu0 %v1973_v57 }
 0x463   : > { %2897 = vmatmul.msk.f32.vlgmr.msra.gmra.mxu0 %vm1985_vm8, %v1981_v52 }
 0x466   : > { %2055 = vrot.lane.b32.xlu1 %v2032_v49, %s3358_s19 }
 0x467   : > { %2053 = vrot.lane.b32.xlu0 %v2031_v56, %s3358_s19 }
 0x46b   : > { %2898 = vmatmul.msk.f32.gmra.mxu0 %vm1985_vm8, %v1982_v51 }
 0x4b2   : > { %v2050_v25 = vpop.permute.xlu2 %2049 }
 0x4ba   : > { %v2052_v36 = vpop.permute.xlu2 %2051 }
 0x4c8   : > { %v2046_v45 = vpop.permute.xlu1 %2045 }
 0x4c9   : > { %v2042_v58 = vpop.permute.xlu0 %2041 }
 0x4d0   : > { %v2048_v26 = vpop.permute.xlu1 %2047 }
 0x4d1   : > { %v2044_v34 = vpop.permute.xlu0 %2043 }
 0x4d8   : > { %v2056_v3 = vpop.permute.xlu1 %2055 }
 0x4d9   : > { %v2054_v24 = vpop.permute.xlu0 %2053 }
 0x4e0   : > { %v2009_v31 = vpop.f32.mrf.mxu0 }
 0x4e1   : > { %v2010_v19 = vadd.f32 %v2009_v31, %v1983_v32 }
 0x4e3   : > { %v2015_v10 = vmax.f32 %v2010_v19, 0.0 }
 0x4e8   : > { %v2012_v54 = vpop.f32.mrf.mxu0 }
 0x4e9   : > { %v2013_v63 = vadd.f32 %v2012_v54, %v1984_v12 }
 0x4eb   : > { %v2016_v43 = vmax.f32 %v2013_v63, 0.0 }
 0x4ed   : > { %2104 = vmatpush.msra.mxu1 %v2016_v43  ;;  %2966 = vmatpush.msra.mxu2 %v2016_v43 }
 0x4ee   : > { %2967 = vmatpush.msra.mxu3 %v2016_v43 }
 0x4ef   : > { %2105 = vmatpush.msra.mxu1 %v2015_v10  ;;  %2968 = vmatpush.msra.mxu2 %v2015_v10 }
 0x4f0   : > { %2969 = vmatpush.msra.mxu3 %v2015_v10  ;;  %2899 = vmatmul.msk.f32.vlgmr.msra.gmra.mxu1 %vm2065_vm9, %v2017_v7 }
 0x4f1   : > { %2902 = vmatmul.msk.f32.vlgmr.msra.gmra.mxu2 %vm2065_vm9, %v2020_v6  ;;  %2905 = vmatmul.msk.f32.vlgmr.msra.gmra.mxu3 %vm2065_vm9, %v2023_v14 }
 0x4f8   : > { %2900 = vmatmul.msk.f32.gmra.mxu1 %vm2065_vm9, %v2018_v30 }
 0x4f9   : > { %2903 = vmatmul.msk.f32.gmra.mxu2 %vm2065_vm9, %v2021_v1  ;;  %2906 = vmatmul.msk.f32.gmra.mxu3 %vm2065_vm9, %v2024_v8 }
 0x500   : > { %2901 = vmatmul.msk.f32.gmra.mxu1 %vm2065_vm9, %v2019_v55 }
 0x501   : > { %2904 = vmatmul.msk.f32.gmra.mxu2 %vm2065_vm9, %v2022_v53 }
 0x56d   : > { %v2107_v2 = vpop.f32.mrf.mxu1 }
 0x56e   : > { %v2108_v27 = vadd.f32 %v2107_v2, %v2042_v58 }
 0x570   : > { %v2907_v28 = vmul.f32 -1.442695, %v2108_v27 }
 0x572   : > { %3143 = vpow2.f32 %v2907_v28 }
 0x574   : > { %v2116_v22 = vpop.f32.mrf.mxu2  ;;  %v2125_v48 = vpop.f32.mrf.mxu3 }
 0x575   : > { %v2117_v18 = vadd.f32 %v2116_v22, %v2048_v26  ;;  %v2126_v50 = vadd.f32 %v2125_v48, %v2054_v24  ;;  %v2110_v4 = vpop.f32.mrf.mxu1 }
 0x576   : > { %v2111_v0 = vadd.f32 %v2110_v4, %v2044_v34 }
 0x577   : > { %v2910_v23 = vmul.f32 -1.442695, %v2117_v18  ;;  %v2913_v61 = vmul.f32 -1.442695, %v2126_v50 }
 0x578   : > { %v3144_v59 = vpop.eup %3143  ;;  %v2908_v40 = vmul.f32 -1.442695, %v2111_v0 }
 0x579   : > { %v2155_v62 = vadd.f32 1.0, %v3144_v59  ;;  %3145 = vpow2.f32 %v2910_v23 }
 0x57a   : > { %3147 = vpow2.f32 %v2913_v61 }
 0x57b   : > { %3149 = vrcp.f32 %v2155_v62  ;;  %v2172_v51 = vand.u32 2147483647, %v2155_v62  ;;  %v2174_v38 = vand.u32 2147483648, %v2155_v62  ;;  %vm2168_vm10 = vweird.f32 %v2155_v62 }
 0x57c   : > { %3151 = vpow2.f32 %v2908_v40  ;;  %v2119_v41 = vpop.f32.mrf.mxu2  ;;  %v2128_v29 = vpop.f32.mrf.mxu3 }
 0x57d   : > { %v2120_v33 = vadd.f32 %v2119_v41, %v2050_v25  ;;  %v2129_v46 = vadd.f32 %v2128_v29, %v2056_v3  ;;  %v2113_v35 = vpop.f32.mrf.mxu1  ;;  %vm2173_vm13 = vcmp.eq.f32.partialorder %v2172_v51, 8.507059e+37  ;;  %v2175_v17 = vor.u32 1.1754944e-38, %v2174_v38 }
 0x57e   : > { %v2114_v15 = vadd.f32 %v2113_v35, %v2046_v45 }
 0x57f   : > { %v3146_v39 = vpop.eup %3145  ;;  %v2911_v42 = vmul.f32 -1.442695, %v2120_v33  ;;  %v2914_v47 = vmul.f32 -1.442695, %v2129_v46 }
 0x580   : > { %v3148_v21 = vpop.eup %3147  ;;  %v4456_v9 = vadd.f32 1.0, %v3146_v39  ;;  %v2909_v57 = vmul.f32 -1.442695, %v2114_v15 }
 0x581   : > { %v3150_v20 = vpop.eup %3149  ;;  %v4458_v13 = vadd.f32 1.0, %v3148_v21  ;;  %3153 = vpow2.f32 %v2911_v42 }
 0x582   : > { %v3152_v16 = vpop.eup %3151  ;;  %v2164_v5 = vmul.f32 %v3150_v20, %v2155_v62  ;;  %3155 = vrcp.f32 %v4456_v9  ;;  %vm2169_vm11 = vweird.f32 %v3150_v20  ;;  %vm2213_vm15 = vweird.f32 %v4456_v9 }
 0x583   : > { %3157 = vrcp.f32 %v4458_v13  ;;  %v4462_v60 = vadd.f32 1.0, %v3152_v16  ;;  %vm2170_vm14 = vmor %vm2168_vm10, %vm2169_vm11  ;;  %v2217_v63 = vand.u32 2147483647, %v4456_v9  ;;  %v2219_v10 = vand.u32 2147483648, %v4456_v9 }
 0x584   : > { %v2165_v52 = vsub.f32 1.0, %v2164_v5  ;;  %v2122_v11 = vpop.f32.mrf.mxu2  ;;  %3159 = vpow2.f32 %v2914_v47  ;;  %vm2258_vm0 = vweird.f32 %v4458_v13  ;;  %v2264_v1 = vand.u32 2147483648, %v4458_v13 }
 0x585   : > { %v2123_v31 = vadd.f32 %v2122_v11, %v2052_v36  ;;  %3161 = vrcp.f32 %v4462_v60  ;;  %v2262_v53 = vand.u32 2147483647, %v4458_v13  ;;  %vm4479_vm2 = vcmp.eq.f32.partialorder %v2217_v63, 8.507059e+37 }
 0x586   : > { %v2166_v44 = vmul.f32 %v3150_v20, %v2165_v52  ;;  %3163 = vpow2.f32 %v2909_v57  ;;  %v2187_v26 = vand.u32 2147483647, %v4462_v60  ;;  %v2220_v22 = vor.u32 1.1754944e-38, %v2219_v10 }
 0x587   : > { %v3154_v56 = vpop.eup %3153  ;;  %v2912_v49 = vmul.f32 -1.442695, %v2123_v31  ;;  %v2265_v48 = vor.u32 1.1754944e-38, %v2264_v1  ;;  %vm2183_vm5 = vweird.f32 %v4462_v60  ;;  %v2189_v0 = vand.u32 2147483648, %v4462_v60 }
 0x588   : > { %v3156_v37 = vpop.eup %3155  ;;  %v2167_v32 = vadd.f32 %v3150_v20, %v2166_v44  ;;  %v4465_v12 = vadd.f32 1.0, %v3154_v56  ;;  %vm2263_vm8 = vcmp.eq.f32.partialorder %v2262_v53, 8.507059e+37  ;;  %vm4497_vm9 = vcmp.eq.f32.partialorder %v2187_v26, 8.507059e+37 }
 0x589   : > { %v3158_v54 = vpop.eup %3157  ;;  %v2209_v19 = vmul.f32 %v3156_v37, %v4456_v9  ;;  %vm2214_vm1 = vweird.f32 %v3156_v37  ;;  %v2190_v39 = vor.u32 1.1754944e-38, %v2189_v0 }
 0x58a   : > { %v2171_v43 = vsel %vm2170_vm14, %v3150_v20, %v2167_v32  ;;  %v2254_v7 = vmul.f32 %v3158_v54, %v4458_v13  ;;  %3165 = vrcp.f32 %v4465_v12  ;;  %v3160_v6 = vpop.eup %3159  ;;  %vm2259_vm3 = vweird.f32 %v3158_v54  ;;  %vm2215_vm4 = vmor %vm2213_vm15, %vm2214_vm1 }
 0x58b   : > { %v2176_v14 = vsel %vm2173_vm13, %v2175_v17, %v2171_v43  ;;  %v2210_v30 = vsub.f32 1.0, %v2209_v19  ;;  %v3162_v8 = vpop.eup %3161  ;;  %v4477_v58 = vadd.f32 1.0, %v3160_v6  ;;  %3167 = vpow2.f32 %v2912_v49  ;;  %vm2260_vm6 = vmor %vm2258_vm0, %vm2259_vm3 }
 0x58c   : > { %2284 = vst.msk [vmem:[#allocation5] sm:$0xff] %vm2283_vm12, %v2176_v14  ;;  %v2255_v55 = vsub.f32 1.0, %v2254_v7  ;;  %v3164_v45 = vpop.eup %3163  ;;  %v2179_v27 = vmul.f32 %v3162_v8, %v4462_v60  ;;  %vm2184_vm7 = vweird.f32 %v3162_v8  ;;  %v2232_v42 = vand.u32 2147483647, %v4465_v12 }
 0x58d   : > { %v2211_v34 = vmul.f32 %v3156_v37, %v2210_v30  ;;  %3169 = vrcp.f32 %v4477_v58  ;;  %v4490_v23 = vadd.f32 1.0, %v3164_v45  ;;  %vm2185_vm10 = vmor %vm2183_vm5, %vm2184_vm7  ;;  %v2234_v15 = vand.u32 2147483648, %v4465_v12 }
 0x58e   : > { %v2256_v28 = vmul.f32 %v3158_v54, %v2255_v55  ;;  %v2180_v18 = vsub.f32 1.0, %v2179_v27  ;;  %vm2228_vm13 = vweird.f32 %v4465_v12  ;;  %vm2233_vm15 = vcmp.eq.f32.partialorder %v2232_v42, 8.507059e+37 }
 0x58f   : > { %v2212_v24 = vadd.f32 %v3156_v37, %v2211_v34  ;;  %3171 = vrcp.f32 %v4490_v23  ;;  %v2235_v36 = vor.u32 1.1754944e-38, %v2234_v15  ;;  %vm2273_vm0 = vweird.f32 %v4477_v58 }
 0x590   : > { %v3166_v50 = vpop.eup %3165  ;;  %v2257_v4 = vadd.f32 %v3158_v54, %v2256_v28  ;;  %v2181_v59 = vmul.f32 %v3162_v8, %v2180_v18  ;;  %v2279_v57 = vand.u32 2147483648, %v4477_v58  ;;  %v2277_v11 = vand.u32 2147483647, %v4477_v58 }
 0x591   : > { %v2216_v61 = vsel %vm2215_vm4, %v3156_v37, %v2212_v24  ;;  %v2224_v40 = vmul.f32 %v3166_v50, %v4465_v12  ;;  %v3168_v25 = vpop.eup %3167  ;;  %vm2229_vm11 = vweird.f32 %v3166_v50  ;;  %v2204_v49 = vand.u32 2147483648, %v4490_v23 }
 0x592   : > { %v2221_v62 = vsel %vm4479_vm2, %v2220_v22, %v2216_v61  ;;  %v2261_v3 = vsel %vm2260_vm6, %v3158_v54, %v2257_v4  ;;  %v2182_v33 = vadd.f32 %v3162_v8, %v2181_v59  ;;  %v2160_v21 = vadd.f32 1.0, %v3168_v25  ;;  %vm2230_vm14 = vmor %vm2228_vm13, %vm2229_vm11 }
 0x593   : > { %2287 = vst.msk [vmem:[#allocation5 + $0x18] sm:$0xff] %vm2283_vm12, %v2221_v62  ;;  %v2266_v29 = vsel %vm2263_vm8, %v2265_v48, %v2261_v3  ;;  %v2225_v46 = vsub.f32 1.0, %v2224_v40  ;;  %v3170_v35 = vpop.eup %3169  ;;  %v2280_v37 = vor.u32 1.1754944e-38, %v2279_v57  ;;  %vm2278_vm3 = vcmp.eq.f32.partialorder %v2277_v11, 8.507059e+37 }
 0x594   : > { %2290 = vst.msk [vmem:[#allocation5 + $0x30] sm:$0xff] %vm2283_vm12, %v2266_v29  ;;  %v2186_v9 = vsel %vm2185_vm10, %v3162_v8, %v2182_v33  ;;  %v2269_v13 = vmul.f32 %v3170_v35, %v4477_v58  ;;  %3173 = vrcp.f32 %v2160_v21  ;;  %vm2274_vm1 = vweird.f32 %v3170_v35 }
 0x595   : > { %v2226_v20 = vmul.f32 %v3166_v50, %v2225_v46  ;;  %v2191_v47 = vsel %vm4497_vm9, %v2190_v39, %v2186_v9  ;;  %v3172_v52 = vpop.eup %3171  ;;  %vm2275_vm2 = vmor %vm2273_vm0, %vm2274_vm1  ;;  %v2202_v63 = vand.u32 2147483647, %v4490_v23  ;;  %vm2198_vm5 = vweird.f32 %v4490_v23 }
 0x596   : > { %2285 = vst.msk [vmem:[#allocation5 + $0x8] sm:$0xff] %vm2283_vm12, %v2191_v47  ;;  %v2270_v5 = vsub.f32 1.0, %v2269_v13  ;;  %v2194_v31 = vmul.f32 %v3172_v52, %v4490_v23  ;;  %vm2199_vm4 = vweird.f32 %v3172_v52  ;;  %v2249_v7 = vand.u32 2147483648, %v2160_v21 }
 0x597   : > { %v2227_v16 = vadd.f32 %v3166_v50, %v2226_v20  ;;  %vm2200_vm6 = vmor %vm2198_vm5, %vm2199_vm4  ;;  %v2205_v6 = vor.u32 1.1754944e-38, %v2204_v49  ;;  %v2247_v30 = vand.u32 2147483647, %v2160_v21  ;;  %vm2203_vm8 = vcmp.eq.f32.partialorder %v2202_v63, 8.507059e+37 }
 0x598   : > { %v2271_v60 = vmul.f32 %v3170_v35, %v2270_v5  ;;  %v2195_v32 = vsub.f32 1.0, %v2194_v31  ;;  %vm2243_vm9 = vweird.f32 %v2160_v21  ;;  %v2250_v53 = vor.u32 1.1754944e-38, %v2249_v7 }
 0x599   : > { %v2231_v51 = vsel %vm2230_vm14, %v3166_v50, %v2227_v16  ;;  %vm2248_vm11 = vcmp.eq.f32.partialorder %v2247_v30, 8.507059e+37 }
 0x59a   : > { %v2236_v38 = vsel %vm2233_vm15, %v2235_v36, %v2231_v51  ;;  %v2272_v44 = vadd.f32 %v3170_v35, %v2271_v60  ;;  %v3174_v56 = vpop.eup %3173  ;;  %v2196_v19 = vmul.f32 %v3172_v52, %v2195_v32 }
 0x59b   : > { %2288 = vst.msk [vmem:[#allocation5 + $0x20] sm:$0xff] %vm2283_vm12, %v2236_v38  ;;  %v2239_v54 = vmul.f32 %v3174_v56, %v2160_v21  ;;  %vm2244_vm7 = vweird.f32 %v3174_v56 }
 0x59c   : > { %v2276_v12 = vsel %vm2275_vm2, %v3170_v35, %v2272_v44  ;;  %v2197_v10 = vadd.f32 %v3172_v52, %v2196_v19  ;;  %vm2245_vm10 = vmor %vm2243_vm9, %vm2244_vm7 }
 0x59d   : > { %v2281_v17 = vsel %vm2278_vm3, %v2280_v37, %v2276_v12  ;;  %v2240_v43 = vsub.f32 1.0, %v2239_v54 }
 0x59e   : > { %2291 = vst.msk [vmem:[#allocation5 + $0x38] sm:$0xff] %vm2283_vm12, %v2281_v17  ;;  %v2201_v1 = vsel %vm2200_vm6, %v3172_v52, %v2197_v10 }
 0x59f   : > { %v2241_v14 = vmul.f32 %v3174_v56, %v2240_v43  ;;  %v2206_v8 = vsel %vm2203_vm8, %v2205_v6, %v2201_v1 }
 0x5a0   : > { %2286 = vst.msk [vmem:[#allocation5 + $0x10] sm:$0xff] %vm2283_vm12, %v2206_v8 }
 0x5a1   : > { %v2242_v55 = vadd.f32 %v3174_v56, %v2241_v14 }
 0x5a3   : > { %v2246_v58 = vsel %vm2245_vm10, %v3174_v56, %v2242_v55 }
 0x5a4   : > { %v2251_v45 = vsel %vm2248_vm11, %v2250_v53, %v2246_v58 }
 0x5a5   : > { %2289 = vst.msk [vmem:[#allocation5 + $0x28] sm:$0xff] %vm2283_vm12, %v2251_v45 }
 0x5a6 PF: > { %v2393_v2 = vld [vmem:[#allocation5] sm:$0xff]  ;;  %v3359_v27 = vmov 0   ;;  %v2396_v26 = vld [vmem:[#allocation5 + $0x18] sm:$0xff]  ;;  %v2394_v24 = vld [vmem:[#allocation5 + $0x8] sm:$0xff]  ;;  %s2915_s24 = sshll.u32 %s3322_s15, 9 }
 0x5a7   : > { %v2395_v34 = vld [vmem:[#allocation5 + $0x10] sm:$0xff]  ;;  %3176 = vset.pattern.permute.xlu1 %v3359_v27  ;;  %3175 = vset.pattern.permute.xlu0 %v3359_v27  ;;  %v2397_v28 = vld [vmem:[#allocation5 + $0x20] sm:$0xff]  ;;  %v2400_v48 = vld [vmem:[#allocation5 + $0x38] sm:$0xff]  ;;  %s2293_s19 = sshra.s32 %s2915_s24, 7 }
 0x5a8   : > { %2413 = vperm.xlu1 %3176, %v2395_v34   ;;  %2403 = vperm.xlu0 %3175, %v2393_v2   ;;  %v2399_v18 = vld [vmem:[#allocation5 + $0x30] sm:$0xff]  ;;  %s2916_s4 = sshll.u32 %s2293_s19, 2  ;;  %v2353_v0 = vld [vmem:[%s3545_s17 + $0x40] sm:$0xff]  ;;  %v2354_v23 = vld [vmem:[%s3545_s17 + $0x48] sm:$0xff] }
 0x5a9   : > { %3177 = vset.pattern.permute.xlu2 %v3359_v27  ;;  %s4525_s9 = scalar_lea.vmem [#allocation2], %s2916_s4  ;;  %v2377_v62 = vunpack.c.l.bf16 %v2353_v0  ;;  %v2378_v3 = vunpack.c.h.bf16 %v2353_v0  ;;  %v2379_v41 = vunpack.c.l.bf16 %v2354_v23  ;;  %v2380_v29 = vunpack.c.h.bf16 %v2354_v23  ;;  %v2355_v36 = vld [vmem:[%s3545_s17 + $0x50] sm:$0xff]  ;;  %v2356_v57 = vld [vmem:[%s3545_s17 + $0x58] sm:$0xff]  ;;  %v2349_v8 = vld [vmem:[%s3545_s17 + $0x20] sm:$0xff] }
 0x5aa   : > { %2423 = vperm.xlu2 %3177, %v2397_v28   ;;  %v2305_v50 = vld [vmem:[%s4525_s9 + $0x80] sm:$0xff]  ;;  %v2306_v4 = vld [vmem:[%s4525_s9 + $0x88] sm:$0xff]  ;;  %v2381_v38 = vunpack.c.l.bf16 %v2355_v36  ;;  %v2382_v31 = vunpack.c.h.bf16 %v2355_v36  ;;  %v2383_v44 = vunpack.c.l.bf16 %v2356_v57  ;;  %v2384_v56 = vunpack.c.h.bf16 %v2356_v57 }
 0x5ab   : > { %v2329_v61 = vunpack.c.l.bf16 %v2305_v50  ;;  %v2330_v59 = vunpack.c.h.bf16 %v2305_v50  ;;  %v2331_v40 = vunpack.c.l.bf16 %v2306_v4  ;;  %v2332_v25 = vunpack.c.h.bf16 %v2306_v4  ;;  %v2307_v15 = vld [vmem:[%s4525_s9 + $0xa0] sm:$0xff]  ;;  %v2308_v21 = vld [vmem:[%s4525_s9 + $0xa8] sm:$0xff] }
 0x5ac   : > { %v2398_v22 = vld [vmem:[#allocation5 + $0x28] sm:$0xff]  ;;  %v2333_v16 = vunpack.c.l.bf16 %v2307_v15  ;;  %v2334_v5 = vunpack.c.h.bf16 %v2307_v15  ;;  %v2335_v60 = vunpack.c.l.bf16 %v2308_v21  ;;  %v2336_v11 = vunpack.c.h.bf16 %v2308_v21  ;;  %v2301_v6 = vld [vmem:[%s4525_s9 + $0x40] sm:$0xff] }
 0x5ad   : > { %v2302_v14 = vld [vmem:[%s4525_s9 + $0x48] sm:$0xff]  ;;  %v2297_v30 = vld [vmem:[%s4525_s9] sm:$0xff]  ;;  %v2321_v53 = vunpack.c.l.bf16 %v2301_v6  ;;  %v2322_v58 = vunpack.c.h.bf16 %v2301_v6  ;;  %v2369_v50 = vunpack.c.l.bf16 %v2349_v8  ;;  %v2370_v4 = vunpack.c.h.bf16 %v2349_v8 }
 0x5ae   : > { %v2298_v1 = vld [vmem:[%s4525_s9 + $0x8] sm:$0xff]  ;;  %v2323_v45 = vunpack.c.l.bf16 %v2302_v14  ;;  %v2324_v34 = vunpack.c.h.bf16 %v2302_v14  ;;  %v2345_v2 = vld [vmem:[%s3545_s17] sm:$0xff]  ;;  %v2313_v28 = vunpack.c.l.bf16 %v2297_v30 }
 0x5af   : > { %v2350_v55 = vld [vmem:[%s3545_s17 + $0x28] sm:$0xff] }
 0x5b0   : > { %2418 = vperm.xlu1 %3176, %v2396_v26   ;;  %2408 = vperm.xlu0 %3175, %v2394_v24   ;;  %v2346_v27 = vld [vmem:[%s3545_s17 + $0x8] sm:$0xff]  ;;  %v2314_v26 = vunpack.c.h.bf16 %v2297_v30  ;;  %v2315_v24 = vunpack.c.l.bf16 %v2298_v1  ;;  %v2371_v0 = vunpack.c.l.bf16 %v2350_v55  ;;  %v2372_v23 = vunpack.c.h.bf16 %v2350_v55 }
 0x5b2   : > { %2428 = vperm.xlu2 %3177, %v2398_v22   ;;  %v2316_v22 = vunpack.c.h.bf16 %v2298_v1 }
 0x5b8   : > { %2438 = vperm.xlu1 %3176, %v2400_v48   ;;  %2433 = vperm.xlu0 %3175, %v2399_v18   ;;  %v4548_v48 = vld [vmem:[%s4525_s9 + $0x60] sm:$0xff]  ;;  %v4551_v18 = vld [vmem:[%s4525_s9 + $0x68] sm:$0xff] }
 0x604   : > { %v2424_v33 = vpop.permute.xlu2 %2423 }
 0x605   : > { %v2457_v46 = vmul.f32 %v2424_v33, %v2329_v61  ;;  %v2458_v35 = vmul.f32 %v2424_v33, %v2330_v59  ;;  %v2459_v39 = vmul.f32 %v2424_v33, %v2331_v40  ;;  %v2460_v42 = vmul.f32 %v2424_v33, %v2332_v25  ;;  %v4554_v61 = vld [vmem:[%s3545_s17 + $0x30] sm:$0xff]  ;;  %v4557_v59 = vld [vmem:[%s3545_s17 + $0x38] sm:$0xff] }
 0x606   : > { %v2361_v40 = vunpack.c.l.bf16 %v2345_v2  ;;  %v2362_v25 = vunpack.c.h.bf16 %v2345_v2  ;;  %v2327_v33 = vunpack.c.l.bf16 %v4551_v18  ;;  %v2374_v15 = vunpack.c.h.bf16 %v4554_v61 }
 0x607   : > { %v2489_v9 = vadd.f32 %v2457_v46, %v2377_v62  ;;  %v2490_v20 = vadd.f32 %v2458_v35, %v2378_v3  ;;  %v2491_v13 = vadd.f32 %v2459_v39, %v2379_v41  ;;  %v2492_v47 = vadd.f32 %v2460_v42, %v2380_v29 }
 0x608   : > { %v2363_v62 = vunpack.c.l.bf16 %v2346_v27  ;;  %v2364_v3 = vunpack.c.h.bf16 %v2346_v27  ;;  %v2325_v41 = vunpack.c.l.bf16 %v4548_v48  ;;  %v2326_v29 = vunpack.c.h.bf16 %v4548_v48 }
 0x609   : > { %v2513_v52 = vpack.c.bf16 %v2490_v20, %v2489_v9  ;;  %v2514_v51 = vpack.c.bf16 %v2492_v47, %v2491_v13  ;;  %v2328_v46 = vunpack.c.h.bf16 %v4551_v18  ;;  %v2373_v42 = vunpack.c.l.bf16 %v4554_v61  ;;  %v2309_v61 = vld [vmem:[%s4525_s9 + $0xc0] sm:$0xff] }
 0x60a   : > { %v2375_v21 = vunpack.c.l.bf16 %v4557_v59  ;;  %v2376_v9 = vunpack.c.h.bf16 %v4557_v59 }
 0x60b   : > { %2529 = vst [vmem:[%s3554_s14 + $0x40] sm:$0xff] %v2513_v52 }
 0x60c   : > { %2530 = vst [vmem:[%s3554_s14 + $0x48] sm:$0xff] %v2514_v51  ;;  %v2429_v37 = vpop.permute.xlu2 %2428  ;;  %v2299_v51 = vld [vmem:[%s4525_s9 + $0x20] sm:$0xff] }
 0x60d   : > { %v2461_v32 = vmul.f32 %v2429_v37, %v2333_v16  ;;  %v2462_v12 = vmul.f32 %v2429_v37, %v2334_v5  ;;  %v2463_v49 = vmul.f32 %v2429_v37, %v2335_v60  ;;  %v2464_v54 = vmul.f32 %v2429_v37, %v2336_v11 }
 0x60f   : > { %v2493_v17 = vadd.f32 %v2461_v32, %v2381_v38  ;;  %v2494_v19 = vadd.f32 %v2462_v12, %v2382_v31  ;;  %v2495_v63 = vadd.f32 %v2463_v49, %v2383_v44  ;;  %v2496_v43 = vadd.f32 %v2464_v54, %v2384_v56  ;;  %v2300_v44 = vld [vmem:[%s4525_s9 + $0x28] sm:$0xff]  ;;  %v2347_v49 = vld [vmem:[%s3545_s17 + $0x10] sm:$0xff]  ;;  %v2348_v54 = vld [vmem:[%s3545_s17 + $0x18] sm:$0xff] }
 0x610   : > { %v2319_v30 = vunpack.c.l.bf16 %v2300_v44  ;;  %v2320_v1 = vunpack.c.h.bf16 %v2300_v44  ;;  %v2365_v8 = vunpack.c.l.bf16 %v2347_v49  ;;  %v2366_v55 = vunpack.c.h.bf16 %v2347_v49 }
 0x611   : > { %v2515_v10 = vpack.c.bf16 %v2494_v19, %v2493_v17  ;;  %v2516_v7 = vpack.c.bf16 %v2496_v43, %v2495_v63  ;;  %v2317_v63 = vunpack.c.l.bf16 %v2299_v51  ;;  %v2318_v43 = vunpack.c.h.bf16 %v2299_v51 }
 0x613   : > { %2531 = vst [vmem:[%s3554_s14 + $0x50] sm:$0xff] %v2515_v10  ;;  %v4572_v10 = vld [vmem:[%s4525_s9 + $0xe0] sm:$0xff] }
 0x614   : > { %2532 = vst [vmem:[%s3554_s14 + $0x58] sm:$0xff] %v2516_v7  ;;  %v4575_v7 = vld [vmem:[%s4525_s9 + $0xe8] sm:$0xff]  ;;  %v2341_v2 = vunpack.c.l.bf16 %v4572_v10  ;;  %v2342_v27 = vunpack.c.h.bf16 %v4572_v10 }
 0x61a   : > { %v2414_v35 = vpop.permute.xlu1 %2413  ;;  %v2404_v39 = vpop.permute.xlu0 %2403 }
 0x61b   : > { %v2449_v20 = vmul.f32 %v2414_v35, %v2321_v53  ;;  %v2450_v13 = vmul.f32 %v2414_v35, %v2322_v58  ;;  %v2451_v47 = vmul.f32 %v2414_v35, %v2323_v45  ;;  %v2452_v16 = vmul.f32 %v2414_v35, %v2324_v34 }
 0x61c   : > { %v2441_v5 = vmul.f32 %v2404_v39, %v2313_v28  ;;  %v2442_v36 = vmul.f32 %v2404_v39, %v2314_v26  ;;  %v2443_v57 = vmul.f32 %v2404_v39, %v2315_v24  ;;  %v2444_v52 = vmul.f32 %v2404_v39, %v2316_v22  ;;  %v2360_v39 = vld [vmem:[%s3545_s17 + $0x78] sm:$0xff] }
 0x61d   : > { %v2481_v60 = vadd.f32 %v2449_v20, %v2369_v50  ;;  %v2482_v11 = vadd.f32 %v2450_v13, %v2370_v4  ;;  %v2483_v38 = vadd.f32 %v2451_v47, %v2371_v0  ;;  %v2484_v31 = vadd.f32 %v2452_v16, %v2372_v23 }
 0x61e   : > { %v2473_v56 = vadd.f32 %v2441_v5, %v2361_v40  ;;  %v2474_v37 = vadd.f32 %v2442_v36, %v2362_v25  ;;  %v2475_v32 = vadd.f32 %v2443_v57, %v2363_v62  ;;  %v2476_v12 = vadd.f32 %v2444_v52, %v2364_v3  ;;  %v2310_v3 = vld [vmem:[%s4525_s9 + $0xc8] sm:$0xff]  ;;  %v2357_v5 = vld [vmem:[%s3545_s17 + $0x60] sm:$0xff] }
 0x61f   : > { %v2509_v17 = vpack.c.bf16 %v2482_v11, %v2481_v60  ;;  %v2510_v19 = vpack.c.bf16 %v2484_v31, %v2483_v38  ;;  %v2367_v53 = vunpack.c.l.bf16 %v2348_v54  ;;  %v2368_v58 = vunpack.c.h.bf16 %v2348_v54  ;;  %v2358_v36 = vld [vmem:[%s3545_s17 + $0x68] sm:$0xff] }
 0x620   : > { %v2505_v6 = vpack.c.bf16 %v2474_v37, %v2473_v56  ;;  %v2506_v14 = vpack.c.bf16 %v2476_v12, %v2475_v32  ;;  %v2343_v28 = vunpack.c.l.bf16 %v4575_v7  ;;  %v2344_v26 = vunpack.c.h.bf16 %v4575_v7 }
 0x621   : > { %2525 = vst [vmem:[%s3554_s14 + $0x20] sm:$0xff] %v2509_v17  ;;  %v2337_v47 = vunpack.c.l.bf16 %v2309_v61  ;;  %v2338_v16 = vunpack.c.h.bf16 %v2309_v61  ;;  %v2391_v51 = vunpack.c.l.bf16 %v2360_v39  ;;  %v2392_v60 = vunpack.c.h.bf16 %v2360_v39 }
 0x622   : > { %2526 = vst [vmem:[%s3554_s14 + $0x28] sm:$0xff] %v2510_v19  ;;  %v2419_v45 = vpop.permute.xlu1 %2418  ;;  %v2409_v34 = vpop.permute.xlu0 %2408  ;;  %v2385_v31 = vunpack.c.l.bf16 %v2357_v5  ;;  %v2386_v44 = vunpack.c.h.bf16 %v2357_v5  ;;  %v2387_v56 = vunpack.c.l.bf16 %v2358_v36  ;;  %v2388_v37 = vunpack.c.h.bf16 %v2358_v36 }
 0x623   : > { %2521 = vst [vmem:[%s3554_s14] sm:$0xff] %v2505_v6  ;;  %v2453_v24 = vmul.f32 %v2419_v45, %v2325_v41  ;;  %v2454_v22 = vmul.f32 %v2419_v45, %v2326_v29  ;;  %v2455_v48 = vmul.f32 %v2419_v45, %v2327_v33  ;;  %v2456_v18 = vmul.f32 %v2419_v45, %v2328_v46  ;;  %v2359_v46 = vld [vmem:[%s3545_s17 + $0x70] sm:$0xff] }
 0x624   : > { %2522 = vst [vmem:[%s3554_s14 + $0x8] sm:$0xff] %v2506_v14  ;;  %v2445_v50 = vmul.f32 %v2409_v34, %v2317_v63  ;;  %v2446_v4 = vmul.f32 %v2409_v34, %v2318_v43  ;;  %v2447_v0 = vmul.f32 %v2409_v34, %v2319_v30  ;;  %v2448_v23 = vmul.f32 %v2409_v34, %v2320_v1 }
 0x625   : > { %v2485_v59 = vadd.f32 %v2453_v24, %v2373_v42  ;;  %v2486_v40 = vadd.f32 %v2454_v22, %v2374_v15  ;;  %v2487_v25 = vadd.f32 %v2455_v48, %v2375_v21  ;;  %v2488_v62 = vadd.f32 %v2456_v18, %v2376_v9 }
 0x626   : > { %v2477_v35 = vadd.f32 %v2445_v50, %v2365_v8  ;;  %v2478_v41 = vadd.f32 %v2446_v4, %v2366_v55  ;;  %v2479_v29 = vadd.f32 %v2447_v0, %v2367_v53  ;;  %v2480_v33 = vadd.f32 %v2448_v23, %v2368_v58 }
 0x627   : > { %v2511_v20 = vpack.c.bf16 %v2486_v40, %v2485_v59  ;;  %v2512_v13 = vpack.c.bf16 %v2488_v62, %v2487_v25  ;;  %v2339_v21 = vunpack.c.l.bf16 %v2310_v3  ;;  %v2340_v9 = vunpack.c.h.bf16 %v2310_v3 }
 0x628   : > { %v2507_v42 = vpack.c.bf16 %v2478_v41, %v2477_v35  ;;  %v2508_v15 = vpack.c.bf16 %v2480_v33, %v2479_v29  ;;  %v2389_v57 = vunpack.c.l.bf16 %v2359_v46  ;;  %v2390_v52 = vunpack.c.h.bf16 %v2359_v46 }
 0x629   : > { %2527 = vst [vmem:[%s3554_s14 + $0x30] sm:$0xff] %v2511_v20 }
 0x62a   : > { %2528 = vst [vmem:[%s3554_s14 + $0x38] sm:$0xff] %v2512_v13  ;;  %v2439_v11 = vpop.permute.xlu1 %2438  ;;  %v2434_v38 = vpop.permute.xlu0 %2433 }
 0x62b   : > { %2523 = vst [vmem:[%s3554_s14 + $0x10] sm:$0xff] %v2507_v42  ;;  %v2469_v32 = vmul.f32 %v2439_v11, %v2341_v2  ;;  %v2470_v12 = vmul.f32 %v2439_v11, %v2342_v27  ;;  %v2471_v49 = vmul.f32 %v2439_v11, %v2343_v28  ;;  %v2472_v54 = vmul.f32 %v2439_v11, %v2344_v26 }
 0x62c   : > { %2524 = vst [vmem:[%s3554_s14 + $0x18] sm:$0xff] %v2508_v15  ;;  %v2465_v17 = vmul.f32 %v2434_v38, %v2337_v47  ;;  %v2466_v19 = vmul.f32 %v2434_v38, %v2338_v16  ;;  %v2467_v63 = vmul.f32 %v2434_v38, %v2339_v21  ;;  %v2468_v43 = vmul.f32 %v2434_v38, %v2340_v9 }
 0x62d   : > { %v2501_v10 = vadd.f32 %v2469_v32, %v2389_v57  ;;  %v2502_v7 = vadd.f32 %v2470_v12, %v2390_v52  ;;  %v2503_v6 = vadd.f32 %v2471_v49, %v2391_v51  ;;  %v2504_v14 = vadd.f32 %v2472_v54, %v2392_v60 }
 0x62e   : > { %v2497_v30 = vadd.f32 %v2465_v17, %v2385_v31  ;;  %v2498_v1 = vadd.f32 %v2466_v19, %v2386_v44  ;;  %v2499_v8 = vadd.f32 %v2467_v63, %v2387_v56  ;;  %v2500_v55 = vadd.f32 %v2468_v43, %v2388_v37 }
 0x62f   : > { %v2519_v53 = vpack.c.bf16 %v2502_v7, %v2501_v10  ;;  %v2520_v58 = vpack.c.bf16 %v2504_v14, %v2503_v6 }
 0x630   : > { %v2517_v45 = vpack.c.bf16 %v2498_v1, %v2497_v30  ;;  %v2518_v34 = vpack.c.bf16 %v2500_v55, %v2499_v8 }
 0x631   : > { %2535 = vst [vmem:[%s3554_s14 + $0x70] sm:$0xff] %v2519_v53 }
 0x632   : > { %2536 = vst [vmem:[%s3554_s14 + $0x78] sm:$0xff] %v2520_v58 }
 0x633   : > { %2533 = vst [vmem:[%s3554_s14 + $0x60] sm:$0xff] %v2517_v45 }
 0x634   : > { %2534 = vst [vmem:[%s3554_s14 + $0x68] sm:$0xff] %v2518_v34 }
 0x635 PF: > { %s4731_s17 = sld [smem:[#allocation14_spill]]  ;;  %s2545_s26 = smul.u32 %s3322_s15, %s3326_s16 }
 0x636   : > { %s2553_s11 = sshll.u32 %s3554_s14, 4  ;;  %s4732_s19 = sld [smem:[#allocation31_spill]]  ;;  %s2554_s11 = int_to_ptr.vmem [resolvable:$true] %s2553_s11 }
 0x637   : > { %s2918_s18 = sshll.u32 %s2545_s26, 2  ;;  %s4734_s0 = sand.u32 1, %s3302_s10  }
 0x638   : > { %s2538_s1 = scalar_lea.sflag [#allocation8], %s4734_s0 }
 0x63b   : > { %s2919_s29 = sshll.u32 %s4731_s17, 6 }
 0x63c   : > { %s2550_s22 = sadd.s32 %s2919_s29, %s2918_s18  ;;  %s4733_s4 = smov %s4732_s19 }
 0x63d   : > { %s2920_s5 = sshll.u32 %s2550_s22, 2  ;;  %s3228_s14 = scalar_lea.hbm %s4733_s4, 512 }
 0x63e   : > { %s2552_s9 = scalar_lea.hbm %s4732_s19, %s2920_s5 }
 0x63f   : > { %s2555_s3 = sshll.u32 %s2552_s9, 4  ;;  %s2556_s3 = int_to_ptr.hbm [resolvable:$true] %s2555_s3 }
 0x640   : > { %s3222_s2 = sshra.s32 %s2556_s3, 4  ;;  %s3223_s2 = int_to_ptr.hbm [resolvable:$true] %s3222_s2 }
 0x641   : > { %s3224_s6 = scalar_lea.hbm %s3223_s2, 128  ;;  %p3229_p3 = scmp.lt.s32.totalorder %s3223_s2, %s4733_s4 }
 0x642   : > { %p3225_p12 = scmp.ne.s32.totalorder %s3223_s2, %s3224_s6  ;;  %p3230_p4 = scmp.lt.s32.totalorder %s3228_s14, %s3224_s6 }
 0x644   : > { %p3226_p13 = pnand %p3225_p12, %p3515_p0  ;;  %p3231_p6 = por %p3230_p4, %p3229_p3 }
 0x646   : > { %p3227_p1 = pneg %p3226_p13 }
 0x648   : > { %p3232_p8 = pnand %p3231_p6, %p3227_p1 }
 0x64a   : > { %3235 = shalt.err (!%p3232_p8)
}
 0x64b   : > { %s3360_s0 = smov 256   ;;  %s3361_s29 = smov 512  }
 0x64c   : > { %s3362_s18 = smov 16  }
 0x64d   : > { %2972 = dma.vmem_to_hbm [thread:$0]  (%p3515_p0), %s2554_s11, 2048, %s2556_s3, %s2538_s1, %s3360_s0, %s3361_s29, %s3362_s18  }
 0x64e PF: > { %p2983_p9 = scmp.ge.s32.totalorder %s3346_s21, 2  ;;  %s2570_s5 = sand.u32 1, %s3298_s30  }
 0x64f   : > { %s2571_s2 = scalar_lea.sflag [#allocation8], %s2570_s5 }
 0x650   : > { %p2979_p5 = pnand %p2983_p9, %p3529_p2 }
 0x652   : > { %p2980_p10 = pneg %p2979_p5 }
 0x654   : > { %3293 = dma.done.wait (%p2980_p10), %s2571_s2, 2048  }
 0x655   : > { %3295 = vsyncadd (%p2980_p10), %s2571_s2, 4294965248  ;;  %s25_s21 = sadd.s32 1, %s3346_s21   ;;  %s4737_s1 = sld [smem:[#allocation12_spill]] }
 0x656   : > { %p4623_p7 = scmp.ge.s32.totalorder %s25_s21, 10   ;;  %s4738_s11 = sld [smem:[#allocation21_spill]] }
 0x657   : > { %s4739_s25 = sld [smem:[#allocation13_spill]]  ;;  %s4746_s30 = smov %s3302_s10 }
 0x658   : > { %s4740_s14 = sld [smem:[#allocation20_spill]]  ;;  %s4748_s12 = smov %s3314_s13 }
 0x659   : > { %s4741_s15 = sld [smem:[#allocation15_spill]]  ;;  %s4750_s17 = smov %s3342_s20 }
 0x65a   : > { %s4742_s16 = sld [smem:[#allocation16_spill]] }
 0x65b   : > { %s4743_s18 = sld [smem:[#allocation17_spill]]  ;;  %s4747_s10 = smov %s4737_s1 }
 0x65c   : > { %s4744_s19 = sld [smem:[#allocation18_spill]] }
 0x65d   : > { %s4745_s3 = sld [smem:[#allocation19_spill]]  ;;  %s4749_s13 = smov %s4739_s25 }
 0x65f   :  { %24 = sbr.rel (!%p4623_p7) target bundleno = 20 (0x14), region = 123 }
 0x663   : > { %s4751_s20 = smov %s4745_s3 }
 0x664   :  { %2577 = vsyncpa [#allocation7], 1 }
 0x665   :  { %2579 = vsyncpa [#allocation7 + $0x1], 1 }
 0x666   :  { %2580 = vsyncpa [#allocation8], 1 }
 0x667   :  { %2582 = vsyncpa [#allocation8 + $0x1], 1 }

</bundles_post_ra>
